<compile_context>
chip_gen: v5e
topology: v5e:2x2
jax: 0.10.0
libtpu: 0.0.40
codegen_flags: <defaults>
</compile_context>

<pallas_src>
import functools

import jax
import jax.numpy as jnp
from jax.experimental import pallas as pl
from jax.experimental.pallas import tpu as pltpu

RGB_MEAN = (0.4488, 0.4371, 0.4040)  # common.MeanShift defaults, rgb_range=1, std=1

CIN_P = 4     # input / residual / output channels padded 3 -> 4
FRONT = 128   # lane pad in front of the flattened activation: keeps every shifted tap
BACK = 128    # slice in-bounds; centre taps stay lane-aligned when W % 128 == 0


def _pick_row_tile(H, W, target_lanes=2048):
    """Largest divisor of H giving ~target_lanes output pixels per row tile."""
    tm = max(1, min(H, target_lanes // max(W, 1)))
    while H % tm:
        tm -= 1
    return tm


# ---------------------------------------------------------------------------
# Fused kernel: one VDSR conv layer per grid step, row-tiled im2col matmul.
# ---------------------------------------------------------------------------
def _vdsr_fused_kernel(x_ref, w_ref, b_ref, o_ref, act_ref, *, H, W, TM):
    """grid = (batch, layer).

    x_ref:   (CIN_P, Hp*W)  bf16  sub_mean input, 1-row zero halo top/bottom
    w_ref:   (L, C, 9*C)    bf16  all layers' weights, resident (cout, tap*C + cin)
    b_ref:   (L, C, 1)      f32   all layers' biases, resident
    o_ref:   (CIN_P, H*W)   f32   body output + residual (written on the last layer)
    act_ref: (2, C, FLAT)   bf16  ping-pong flattened activations,
                                  FLAT = FRONT + Hp*W + BACK
    """
    C = act_ref.shape[1]
    FLAT = act_ref.shape[2]
    HpW = (H + 2) * W
    M = TM * W                      # output pixels per row tile
    n_tiles = H // TM
    COUT = o_ref.shape[0]           # 4 = 3 RGB + 1 zero pad

    l = pl.program_id(1)
    L = pl.num_programs(1)
    rs = l % 2                      # read slot  (layer l-1 output / the input)
    ws = 1 - rs                     # write slot (layer l output)

    # ---- per-image init: input -> slot 0; zero everything read unmasked later ----
    @pl.when(l == 0)
    def _():
        act_ref[0, 0:COUT, FRONT:FRONT + HpW] = x_ref[...]
        act_ref[0, COUT:C, :] = jnp.zeros((C - COUT, FLAT), act_ref.dtype)
        zrow = jnp.zeros((C, W), act_ref.dtype)                 # slot-1 zero row halo
        act_ref[1, :, FRONT:FRONT + W] = zrow
        act_ref[1, :, FRONT + (H + 1) * W:FRONT + HpW] = zrow

    # ---- per-layer constants (weights already resident in VMEM) ----
    w_l = w_ref[l]                  # (C, 9C) bf16
    b_l = b_ref[l]                  # (C, 1)  f32

    # Column masks: the activation has NO column halo; the left/right taps are
    # contiguous lane-shifted loads that wrap across rows and get masked to zero.
    col = jax.lax.broadcasted_iota(jnp.int32, (1, M), 1) % W
    ok_left = col > 0               # valid lanes for dx == 0 taps
    ok_right = col < (W - 1)        # valid lanes for dx == 2 taps
    zero = jnp.zeros((), act_ref.dtype)

    def make_patch(r):
        """im2col^T for output rows [r, r+TM): (9*C, TM*W) bf16, no reshapes."""
        taps = []
        for dy in range(3):
            for dx in range(3):
                start = FRONT + (r + dy) * W + (dx - 1)
                t = act_ref[rs, :, pl.ds(start, M)]             # (C, M)
                if dx == 0:
                    t = jnp.where(ok_left, t, zero)
                elif dx == 2:
                    t = jnp.where(ok_right, t, zero)
                taps.append(t)
        return jnp.concatenate(taps, axis=0)                    # (9C, M)

    # ---- hidden layers: conv + bias + ReLU, row tile by row tile ----
    @pl.when(l < L - 1)
    def _():
        def tile(t, carry):
            r = t * TM
            patch = make_patch(r)
            acc = jnp.dot(w_l, patch, preferred_element_type=jnp.float32) + b_l
            h = jnp.maximum(acc, 0.0).astype(act_ref.dtype)     # (C, M)
            act_ref[ws, :, pl.ds(FRONT + (r + 1) * W, M)] = h   # W-aligned lane store
            return carry
        jax.lax.fori_loop(0, n_tiles, tile, 0)

    # ---- last layer: 4-channel conv (no ReLU) + fused global residual ----
    @pl.when(l == L - 1)
    def _():
        def tile(t, carry):
            r = t * TM
            patch = make_patch(r)
            acc = jnp.dot(w_l[0:COUT], patch, preferred_element_type=jnp.float32)
            acc = acc + b_l[0:COUT]
            resid = x_ref[:, pl.ds((r + 1) * W, M)].astype(jnp.float32)
            o_ref[:, pl.ds(r * W, M)] = acc + resid
            return carry
        jax.lax.fori_loop(0, n_tiles, tile, 0)


# ---------------------------------------------------------------------------
# Wrappers
# ---------------------------------------------------------------------------
def _pack_params(params, C):
    """Stack per-layer HWIO weights/biases into (L, C, 9C) bf16 / (L, C, 1) f32."""
    w_list, b_list = [], []
    for (w, b) in params:
        cin, cout = w.shape[2], w.shape[3]
        w9 = jnp.pad(w.reshape(9, cin, cout),                   # tap = ky*3 + kx
                     ((0, 0), (0, C - cin), (0, C - cout)))     # (9, C, C)
        w_list.append(jnp.transpose(w9, (2, 0, 1)).reshape(C, 9 * C))  # (cout, tap*C+cin)
        b_list.append(jnp.pad(b, (0, C - cout)).reshape(C, 1))
    w_all = jnp.stack(w_list).astype(jnp.bfloat16)              # (L, C, 9C)
    b_all = jnp.stack(b_list).astype(jnp.float32)               # (L, C, 1)
    return w_all, b_all


def vdsr_forward(x_nchw, params, n_feats=64):
    """Fused Pallas VDSR forward. Input/output NCHW float32 (RGB, rgb_range=1)."""
    N, C_in, H, W = x_nchw.shape
    C = n_feats
    L = len(params)
    HpW = (H + 2) * W
    FLAT = FRONT + HpW + BACK
    TM = _pick_row_tile(H, W)

    mean = jnp.asarray(RGB_MEAN, jnp.float32).reshape(1, C_in, 1, 1)
    xs = x_nchw.astype(jnp.float32) - mean                                  # sub_mean
    xs_p = jnp.pad(xs, ((0, 0), (0, CIN_P - C_in), (1, 1), (0, 0)))         # row halo
    xs_flat = xs_p.reshape(N, CIN_P, HpW).astype(jnp.bfloat16)

    w_all, b_all = _pack_params(params, C)

    flops = 2 * N * L * H * W * (9 * C) * C
    bytes_accessed = (xs_flat.size * 2 + w_all.size * 2 + b_all.size * 4
                      + N * CIN_P * H * W * 4)

    kernel = functools.partial(_vdsr_fused_kernel, H=H, W=W, TM=TM)

    out = pl.pallas_call(
        kernel,
        out_shape=jax.ShapeDtypeStruct((N, CIN_P, H * W), jnp.float32),
        grid_spec=pltpu.PrefetchScalarGridSpec(
            num_scalar_prefetch=0,
            grid=(N, L),
            in_specs=[
                # Per-image flattened sub_mean input, resident across the layer loop.
                pl.BlockSpec((None, CIN_P, HpW), lambda b, l: (b, 0, 0)),
                # ALL layers' weights / biases as one resident block (fetched once).
                pl.BlockSpec((L, C, 9 * C), lambda b, l: (0, 0, 0)),
                pl.BlockSpec((L, C, 1), lambda b, l: (0, 0, 0)),
            ],
            # Constant in l -> stays resident, flushed once per image.
            out_specs=pl.BlockSpec((None, CIN_P, H * W), lambda b, l: (b, 0, 0)),
            scratch_shapes=[pltpu.VMEM((2, C, FLAT), jnp.bfloat16)],
        ),
        compiler_params=pltpu.CompilerParams(
            dimension_semantics=("parallel", "arbitrary"),
            vmem_limit_bytes=48 * 1024 * 1024,
        ),
        cost_estimate=pl.CostEstimate(
            flops=flops, transcendentals=0, bytes_accessed=bytes_accessed),
    )(xs_flat, w_all, b_all)

    out_rgb = out.reshape(N, CIN_P, H, W)[:, :C_in] + mean                  # add_mean
    return out_rgb


def init_vdsr_params(key, n_resblocks=20, n_feats=64):
    """Deterministic synthetic parameters (He-normal weights, small bias)."""
    dims = [(3, n_feats)] + [(n_feats, n_feats)] * (n_resblocks - 2) + [(n_feats, 3)]
    params = []
    for i, (cin, cout) in enumerate(dims):
        kw, kb = jax.random.split(jax.random.fold_in(key, i))
        scale = jnp.sqrt(2.0 / (9.0 * cin))
        w = jax.random.normal(kw, (3, 3, cin, cout), jnp.float32) * scale   # HWIO
        b = jax.random.normal(kb, (cout,), jnp.float32) * 0.01
        params.append((w, b))
    return params


# ---------------------------------------------------------------------------
# Pure-JAX references (exact f32, and one emulating the kernel's bf16 storage)
# ---------------------------------------------------------------------------
def vdsr_reference(x_nchw, params, emulate_bf16=False):
    x = jnp.transpose(x_nchw, (0, 2, 3, 1)).astype(jnp.float32)
    mean = jnp.asarray(RGB_MEAN, jnp.float32).reshape(1, 1, 1, 3)
    xs = x - mean

    def q(a):
        return a.astype(jnp.bfloat16).astype(jnp.float32) if emulate_bf16 else a

    h = q(xs)
    n = len(params)
    for i, (w, b) in enumerate(params):
        h = jax.lax.conv_general_dilated(
            h, q(w), window_strides=(1, 1), padding="SAME",
            dimension_numbers=("NHWC", "HWIO", "NHWC")) + b
        if i < n - 1:
            h = q(jnp.maximum(h, 0.0))
    out = h + q(xs) + mean
    return jnp.transpose(out, (0, 3, 1, 2))


if __name__ == "__main__":
    key = jax.random.PRNGKey(0)
    kx, kp = jax.random.split(key)

    # Small deterministic input: batch=2, 3 RGB channels, 16x16 spatial (NCHW).
    x = jax.random.uniform(kx, (2, 3, 16, 16), jnp.float32)
    params = init_vdsr_params(kp)

    out = jax.block_until_ready(jax.jit(vdsr_forward)(x, params))
    ref_bf16 = jax.block_until_ready(vdsr_reference(x, params, emulate_bf16=True))
    ref_f32 = jax.block_until_ready(vdsr_reference(x, params, emulate_bf16=False))

    assert out.shape == x.shape and out.dtype == jnp.float32
    # Tight check against a reference emulating the kernel's bf16 operand precision.
    assert jnp.allclose(out, ref_bf16, rtol=5e-2, atol=5e-2), \
        float(jnp.max(jnp.abs(out - ref_bf16)))
    # Loose sanity check against the exact f32 reference (catches semantic bugs).
    assert jnp.allclose(out, ref_f32, rtol=0.0, atol=0.5), \
        float(jnp.max(jnp.abs(out - ref_f32)))
    print("KERNEL_OK")
</pallas_src>

<mosaic_0001>
module attributes {stable_mosaic.version = 11 : i64} {
  func.func @_vdsr_fused_kernel(%arg0: i32, %arg1: i32, %arg2: memref<1x4x288xbf16, #tpu.memory_space<vmem>>, %arg3: memref<20x64x576xbf16, #tpu.memory_space<vmem>>, %arg4: memref<20x64x1xf32, #tpu.memory_space<vmem>>, %arg5: memref<1x4x256xf32, #tpu.memory_space<vmem>>, %arg6: memref<2x64x544xbf16, #tpu.memory_space<vmem>>) attributes {dimension_semantics = [#tpu.dimension_semantics<parallel>, #tpu.dimension_semantics<arbitrary>], iteration_bounds = array<i64: 2, 20>, scalar_prefetch = 0 : i64, scratch_operands = 1 : i64, tpu.core_type = #tpu.core_type<tc>, window_params = [{transform_indices = @transform_0, window_bounds = array<i64: 1, 4, 288>}, {pipeline_mode = #tpu.pipeline_mode<synchronous>, transform_indices = @transform_1, window_bounds = array<i64: 20, 64, 576>}, {pipeline_mode = #tpu.pipeline_mode<synchronous>, transform_indices = @transform_2, window_bounds = array<i64: 20, 64, 1>}, {transform_indices = @transform_3, window_bounds = array<i64: 1, 4, 256>}]} {
    %c2_i32 = arith.constant 2 : i32
    %c0_i32 = arith.constant 0 : i32
    %0 = arith.cmpi eq, %c2_i32, %c0_i32 : i32
    %c1_i32 = arith.constant 1 : i32
    %1 = arith.select %0, %c1_i32, %c2_i32 : i32
    %2 = arith.remsi %arg1, %1 : i32
    %c0_i32_0 = arith.constant 0 : i32
    %3 = arith.cmpi ne, %2, %c0_i32_0 : i32
    %c0_i32_1 = arith.constant 0 : i32
    %4 = arith.cmpi slt, %2, %c0_i32_1 : i32
    %c0_i32_2 = arith.constant 0 : i32
    %5 = arith.cmpi slt, %1, %c0_i32_2 : i32
    %6 = arith.xori %4, %5 : i1
    %7 = arith.andi %6, %3 : i1
    %8 = arith.addi %2, %1 : i32
    %9 = arith.select %7, %8, %2 : i32
    %c1_i32_3 = arith.constant 1 : i32
    %10 = arith.subi %c1_i32_3, %9 : i32
    %c0_i32_4 = arith.constant 0 : i32
    %11 = arith.cmpi eq, %arg1, %c0_i32_4 : i32
    %12 = arith.extui %11 : i1 to i32
    %c0_i32_5 = arith.constant 0 : i32
    %13 = arith.cmpi ne, %12, %c0_i32_5 : i32
    scf.if %13 {
      %c0_19 = arith.constant 0 : index
      %c0_20 = arith.constant 0 : index
      %c0_21 = arith.constant 0 : index
      %47 = vector.load %arg2[%c0_19, %c0_20, %c0_21] : memref<1x4x288xbf16, #tpu.memory_space<vmem>>, vector<1x4x288xbf16>
      %48 = vector.shape_cast %47 : vector<1x4x288xbf16> to vector<4x288xbf16>
      %c0_22 = arith.constant 0 : index
      %c0_23 = arith.constant 0 : index
      %c128 = arith.constant 128 : index
      %49 = vector.load %arg6[%c0_22, %c0_23, %c128] : memref<2x64x544xbf16, #tpu.memory_space<vmem>>, vector<1x4x288xbf16>
      %50 = vector.shape_cast %49 : vector<1x4x288xbf16> to vector<4x288xbf16>
      %51 = vector.shape_cast %48 : vector<4x288xbf16> to vector<1x4x288xbf16>
      tpu.vector_store %arg6[%c0_22, %c0_23, %c128], %51 {strides = array<i32>} : memref<2x64x544xbf16, #tpu.memory_space<vmem>>, vector<1x4x288xbf16>,
      %cst_24 = arith.constant 0.000000e+00 : bf16
      %52 = vector.broadcast %cst_24 : bf16 to vector<60x544xbf16>
      %c0_25 = arith.constant 0 : index
      %c4 = arith.constant 4 : index
      %c0_26 = arith.constant 0 : index
      %53 = vector.load %arg6[%c0_25, %c4, %c0_26] : memref<2x64x544xbf16, #tpu.memory_space<vmem>>, vector<1x60x544xbf16>
      %54 = vector.shape_cast %53 : vector<1x60x544xbf16> to vector<60x544xbf16>
      %55 = vector.shape_cast %52 : vector<60x544xbf16> to vector<1x60x544xbf16>
      tpu.vector_store %arg6[%c0_25, %c4, %c0_26], %55 {strides = array<i32>} : memref<2x64x544xbf16, #tpu.memory_space<vmem>>, vector<1x60x544xbf16>,
      %cst_27 = arith.constant 0.000000e+00 : bf16
      %56 = vector.broadcast %cst_27 : bf16 to vector<64x16xbf16>
      %c1 = arith.constant 1 : index
      %c0_28 = arith.constant 0 : index
      %c128_29 = arith.constant 128 : index
      %57 = vector.load %arg6[%c1, %c0_28, %c128_29] : memref<2x64x544xbf16, #tpu.memory_space<vmem>>, vector<1x64x16xbf16>
      %58 = vector.shape_cast %57 : vector<1x64x16xbf16> to vector<64x16xbf16>
      %59 = vector.shape_cast %56 : vector<64x16xbf16> to vector<1x64x16xbf16>
      tpu.vector_store %arg6[%c1, %c0_28, %c128_29], %59 {strides = array<i32>} : memref<2x64x544xbf16, #tpu.memory_space<vmem>>, vector<1x64x16xbf16>,
      %c1_30 = arith.constant 1 : index
      %c0_31 = arith.constant 0 : index
      %c400 = arith.constant 400 : index
      %60 = vector.load %arg6[%c1_30, %c0_31, %c400] : memref<2x64x544xbf16, #tpu.memory_space<vmem>>, vector<1x64x16xbf16>
      %61 = vector.shape_cast %60 : vector<1x64x16xbf16> to vector<64x16xbf16>
      %62 = vector.shape_cast %56 : vector<64x16xbf16> to vector<1x64x16xbf16>
      tpu.vector_store %arg6[%c1_30, %c0_31, %c400], %62 {strides = array<i32>} : memref<2x64x544xbf16, #tpu.memory_space<vmem>>, vector<1x64x16xbf16>,
    } else {
    }
    %14 = arith.index_cast %arg1 : i32 to index
    %c0 = arith.constant 0 : index
    %c0_6 = arith.constant 0 : index
    %15 = vector.load %arg3[%14, %c0, %c0_6] : memref<20x64x576xbf16, #tpu.memory_space<vmem>>, vector<1x64x576xbf16>
    %16 = vector.shape_cast %15 : vector<1x64x576xbf16> to vector<64x576xbf16>
    %17 = arith.index_cast %arg1 : i32 to index
    %c0_7 = arith.constant 0 : index
    %c0_8 = arith.constant 0 : index
    %18 = vector.load %arg4[%17, %c0_7, %c0_8] : memref<20x64x1xf32, #tpu.memory_space<vmem>>, vector<1x64x1xf32>
    %19 = vector.shape_cast %18 : vector<1x64x1xf32> to vector<64x1xf32>
    %20 = tpu.iota {dimensions = array<i32: 1>} : vector<1x256xi32>
    %c16_i32 = arith.constant 16 : i32
    %c0_i32_9 = arith.constant 0 : i32
    %21 = arith.cmpi eq, %c16_i32, %c0_i32_9 : i32
    %c1_i32_10 = arith.constant 1 : i32
    %22 = arith.select %21, %c1_i32_10, %c16_i32 : i32
    %23 = vector.broadcast %22 : i32 to vector<1x256xi32>
    %24 = arith.remsi %20, %23 : vector<1x256xi32>
    %c0_i32_11 = arith.constant 0 : i32
    %25 = vector.broadcast %c0_i32_11 : i32 to vector<1x256xi32>
    %26 = arith.cmpi ne, %24, %25 : vector<1x256xi32>
    %c0_i32_12 = arith.constant 0 : i32
    %27 = vector.broadcast %c0_i32_12 : i32 to vector<1x256xi32>
    %28 = arith.cmpi slt, %24, %27 : vector<1x256xi32>
    %c0_i32_13 = arith.constant 0 : i32
    %29 = arith.cmpi slt, %22, %c0_i32_13 : i32
    %30 = vector.broadcast %29 : i1 to vector<1x256xi1>
    %31 = vector.broadcast %30 : vector<1x256xi1> to vector<1x256xi1>
    %32 = arith.xori %28, %31 : vector<1x256xi1>
    %33 = arith.andi %32, %26 : vector<1x256xi1>
    %34 = vector.broadcast %22 : i32 to vector<1x256xi32>
    %35 = arith.addi %24, %34 : vector<1x256xi32>
    %36 = arith.select %33, %35, %24 : vector<1x256xi1>, vector<1x256xi32>
    %c0_i32_14 = arith.constant 0 : i32
    %37 = vector.broadcast %c0_i32_14 : i32 to vector<1x256xi32>
    %38 = arith.cmpi sgt, %36, %37 : vector<1x256xi32>
    %c15_i32 = arith.constant 15 : i32
    %39 = vector.broadcast %c15_i32 : i32 to vector<1x256xi32>
    %40 = arith.cmpi slt, %36, %39 : vector<1x256xi32>
    %c19_i32 = arith.constant 19 : i32
    %41 = arith.cmpi slt, %arg1, %c19_i32 : i32
    %42 = arith.extui %41 : i1 to i32
    %cst = arith.constant 0.000000e+00 : bf16
    %c0_i32_15 = arith.constant 0 : i32
    %43 = arith.cmpi ne, %42, %c0_i32_15 : i32
    scf.if %43 {
      %c0_i32_19 = arith.constant 0 : i32
      %c16_i32_20 = arith.constant 16 : i32
      %47 = arith.muli %c0_i32_19, %c16_i32_20 : i32
      %c0_i32_21 = arith.constant 0 : i32
      %48 = arith.addi %47, %c0_i32_21 : i32
      %c16_i32_22 = arith.constant 16 : i32
      %49 = arith.muli %48, %c16_i32_22 : i32
      %c128_i32 = arith.constant 128 : i32
      %50 = arith.addi %c128_i32, %49 : i32
      %c-1_i32 = arith.constant -1 : i32
      %51 = arith.addi %50, %c-1_i32 : i32
      %52 = arith.index_cast %9 : i32 to index
      %c0_23 = arith.constant 0 : index
      %53 = arith.index_cast %51 : i32 to index
      %54 = vector.load %arg6[%52, %c0_23, %53] : memref<2x64x544xbf16, #tpu.memory_space<vmem>>, vector<1x64x256xbf16>
      %55 = vector.shape_cast %54 : vector<1x64x256xbf16> to vector<64x256xbf16>
      %56 = vector.shape_cast %38 : vector<1x256xi1> to vector<1x256xi1>
      %57 = vector.broadcast %56 : vector<1x256xi1> to vector<64x256xi1>
      %58 = vector.broadcast %cst : bf16 to vector<64x256xbf16>
      %59 = arith.select %57, %55, %58 : vector<64x256xi1>, vector<64x256xbf16>
      %c0_i32_24 = arith.constant 0 : i32
      %60 = arith.addi %47, %c0_i32_24 : i32
      %c16_i32_25 = arith.constant 16 : i32
      %61 = arith.muli %60, %c16_i32_25 : i32
      %c128_i32_26 = arith.constant 128 : i32
      %62 = arith.addi %c128_i32_26, %61 : i32
      %c0_i32_27 = arith.constant 0 : i32
      %63 = arith.addi %62, %c0_i32_27 : i32
      %64 = arith.index_cast %9 : i32 to index
      %c0_28 = arith.constant 0 : index
      %65 = arith.index_cast %63 : i32 to index
      %66 = vector.load %arg6[%64, %c0_28, %65] : memref<2x64x544xbf16, #tpu.memory_space<vmem>>, vector<1x64x256xbf16>
      %67 = vector.shape_cast %66 : vector<1x64x256xbf16> to vector<64x256xbf16>
      %c0_i32_29 = arith.constant 0 : i32
      %68 = arith.addi %47, %c0_i32_29 : i32
      %c16_i32_30 = arith.constant 16 : i32
      %69 = arith.muli %68, %c16_i32_30 : i32
      %c128_i32_31 = arith.constant 128 : i32
      %70 = arith.addi %c128_i32_31, %69 : i32
      %c1_i32_32 = arith.constant 1 : i32
      %71 = arith.addi %70, %c1_i32_32 : i32
      %72 = arith.index_cast %9 : i32 to index
      %c0_33 = arith.constant 0 : index
      %73 = arith.index_cast %71 : i32 to index
      %74 = vector.load %arg6[%72, %c0_33, %73] : memref<2x64x544xbf16, #tpu.memory_space<vmem>>, vector<1x64x256xbf16>
      %75 = vector.shape_cast %74 : vector<1x64x256xbf16> to vector<64x256xbf16>
      %76 = vector.shape_cast %40 : vector<1x256xi1> to vector<1x256xi1>
      %77 = vector.broadcast %76 : vector<1x256xi1> to vector<64x256xi1>
      %78 = vector.broadcast %cst : bf16 to vector<64x256xbf16>
      %79 = arith.select %77, %75, %78 : vector<64x256xi1>, vector<64x256xbf16>
      %c1_i32_34 = arith.constant 1 : i32
      %80 = arith.addi %47, %c1_i32_34 : i32
      %c16_i32_35 = arith.constant 16 : i32
      %81 = arith.muli %80, %c16_i32_35 : i32
      %c128_i32_36 = arith.constant 128 : i32
      %82 = arith.addi %c128_i32_36, %81 : i32
      %c-1_i32_37 = arith.constant -1 : i32
      %83 = arith.addi %82, %c-1_i32_37 : i32
      %84 = arith.index_cast %9 : i32 to index
      %c0_38 = arith.constant 0 : index
      %85 = arith.index_cast %83 : i32 to index
      %86 = vector.load %arg6[%84, %c0_38, %85] : memref<2x64x544xbf16, #tpu.memory_space<vmem>>, vector<1x64x256xbf16>
      %87 = vector.shape_cast %86 : vector<1x64x256xbf16> to vector<64x256xbf16>
      %88 = vector.shape_cast %38 : vector<1x256xi1> to vector<1x256xi1>
      %89 = vector.broadcast %88 : vector<1x256xi1> to vector<64x256xi1>
      %90 = vector.broadcast %cst : bf16 to vector<64x256xbf16>
      %91 = arith.select %89, %87, %90 : vector<64x256xi1>, vector<64x256xbf16>
      %c1_i32_39 = arith.constant 1 : i32
      %92 = arith.addi %47, %c1_i32_39 : i32
      %c16_i32_40 = arith.constant 16 : i32
      %93 = arith.muli %92, %c16_i32_40 : i32
      %c128_i32_41 = arith.constant 128 : i32
      %94 = arith.addi %c128_i32_41, %93 : i32
      %c0_i32_42 = arith.constant 0 : i32
      %95 = arith.addi %94, %c0_i32_42 : i32
      %96 = arith.index_cast %9 : i32 to index
      %c0_43 = arith.constant 0 : index
      %97 = arith.index_cast %95 : i32 to index
      %98 = vector.load %arg6[%96, %c0_43, %97] : memref<2x64x544xbf16, #tpu.memory_space<vmem>>, vector<1x64x256xbf16>
      %99 = vector.shape_cast %98 : vector<1x64x256xbf16> to vector<64x256xbf16>
      %c1_i32_44 = arith.constant 1 : i32
      %100 = arith.addi %47, %c1_i32_44 : i32
      %c16_i32_45 = arith.constant 16 : i32
      %101 = arith.muli %100, %c16_i32_45 : i32
      %c128_i32_46 = arith.constant 128 : i32
      %102 = arith.addi %c128_i32_46, %101 : i32
      %c1_i32_47 = arith.constant 1 : i32
      %103 = arith.addi %102, %c1_i32_47 : i32
      %104 = arith.index_cast %9 : i32 to index
      %c0_48 = arith.constant 0 : index
      %105 = arith.index_cast %103 : i32 to index
      %106 = vector.load %arg6[%104, %c0_48, %105] : memref<2x64x544xbf16, #tpu.memory_space<vmem>>, vector<1x64x256xbf16>
      %107 = vector.shape_cast %106 : vector<1x64x256xbf16> to vector<64x256xbf16>
      %108 = vector.shape_cast %40 : vector<1x256xi1> to vector<1x256xi1>
      %109 = vector.broadcast %108 : vector<1x256xi1> to vector<64x256xi1>
      %110 = vector.broadcast %cst : bf16 to vector<64x256xbf16>
      %111 = arith.select %109, %107, %110 : vector<64x256xi1>, vector<64x256xbf16>
      %c2_i32_49 = arith.constant 2 : i32
      %112 = arith.addi %47, %c2_i32_49 : i32
      %c16_i32_50 = arith.constant 16 : i32
      %113 = arith.muli %112, %c16_i32_50 : i32
      %c128_i32_51 = arith.constant 128 : i32
      %114 = arith.addi %c128_i32_51, %113 : i32
      %c-1_i32_52 = arith.constant -1 : i32
      %115 = arith.addi %114, %c-1_i32_52 : i32
      %116 = arith.index_cast %9 : i32 to index
      %c0_53 = arith.constant 0 : index
      %117 = arith.index_cast %115 : i32 to index
      %118 = vector.load %arg6[%116, %c0_53, %117] : memref<2x64x544xbf16, #tpu.memory_space<vmem>>, vector<1x64x256xbf16>
      %119 = vector.shape_cast %118 : vector<1x64x256xbf16> to vector<64x256xbf16>
      %120 = vector.shape_cast %38 : vector<1x256xi1> to vector<1x256xi1>
      %121 = vector.broadcast %120 : vector<1x256xi1> to vector<64x256xi1>
      %122 = vector.broadcast %cst : bf16 to vector<64x256xbf16>
      %123 = arith.select %121, %119, %122 : vector<64x256xi1>, vector<64x256xbf16>
      %c2_i32_54 = arith.constant 2 : i32
      %124 = arith.addi %47, %c2_i32_54 : i32
      %c16_i32_55 = arith.constant 16 : i32
      %125 = arith.muli %124, %c16_i32_55 : i32
      %c128_i32_56 = arith.constant 128 : i32
      %126 = arith.addi %c128_i32_56, %125 : i32
      %c0_i32_57 = arith.constant 0 : i32
      %127 = arith.addi %126, %c0_i32_57 : i32
      %128 = arith.index_cast %9 : i32 to index
      %c0_58 = arith.constant 0 : index
      %129 = arith.index_cast %127 : i32 to index
      %130 = vector.load %arg6[%128, %c0_58, %129] : memref<2x64x544xbf16, #tpu.memory_space<vmem>>, vector<1x64x256xbf16>
      %131 = vector.shape_cast %130 : vector<1x64x256xbf16> to vector<64x256xbf16>
      %c2_i32_59 = arith.constant 2 : i32
      %132 = arith.addi %47, %c2_i32_59 : i32
      %c16_i32_60 = arith.constant 16 : i32
      %133 = arith.muli %132, %c16_i32_60 : i32
      %c128_i32_61 = arith.constant 128 : i32
      %134 = arith.addi %c128_i32_61, %133 : i32
      %c1_i32_62 = arith.constant 1 : i32
      %135 = arith.addi %134, %c1_i32_62 : i32
      %136 = arith.index_cast %9 : i32 to index
      %c0_63 = arith.constant 0 : index
      %137 = arith.index_cast %135 : i32 to index
      %138 = vector.load %arg6[%136, %c0_63, %137] : memref<2x64x544xbf16, #tpu.memory_space<vmem>>, vector<1x64x256xbf16>
      %139 = vector.shape_cast %138 : vector<1x64x256xbf16> to vector<64x256xbf16>
      %140 = vector.shape_cast %40 : vector<1x256xi1> to vector<1x256xi1>
      %141 = vector.broadcast %140 : vector<1x256xi1> to vector<64x256xi1>
      %142 = vector.broadcast %cst : bf16 to vector<64x256xbf16>
      %143 = arith.select %141, %139, %142 : vector<64x256xi1>, vector<64x256xbf16>
      %144 = tpu.concatenate %59, %67, %79, %91, %99, %111, %123, %131, %143 in 0 : vector<64x256xbf16>, vector<64x256xbf16>, vector<64x256xbf16>, vector<64x256xbf16>, vector<64x256xbf16>, vector<64x256xbf16>, vector<64x256xbf16>, vector<64x256xbf16>, vector<64x256xbf16> -> vector<576x256xbf16>
      %cst_64 = arith.constant dense<0.000000e+00> : vector<64x256xf32>
      %145 = tpu.matmul %16, %144, %cst_64 {dimension_numbers = #tpu.dot_dimension_numbers<[1], [0], [0], [1], [0, 0, 1, 1], [], []>} : vector<64x576xbf16>, vector<576x256xbf16>, vector<64x256xf32> -> vector<64x256xf32>
      %146 = vector.broadcast %19 : vector<64x1xf32> to vector<64x256xf32>
      %147 = arith.addf %145, %146 : vector<64x256xf32>
      %cst_65 = arith.constant 0.000000e+00 : f32
      %148 = vector.broadcast %cst_65 : f32 to vector<64x256xf32>
      %149 = arith.maximumf %147, %148 : vector<64x256xf32>
      %150 = arith.truncf %149 : vector<64x256xf32> to vector<64x256xbf16>
      %c1_i32_66 = arith.constant 1 : i32
      %151 = arith.addi %47, %c1_i32_66 : i32
      %c16_i32_67 = arith.constant 16 : i32
      %152 = arith.muli %151, %c16_i32_67 : i32
      %c128_i32_68 = arith.constant 128 : i32
      %153 = arith.addi %c128_i32_68, %152 : i32
      %154 = arith.index_cast %10 : i32 to index
      %c0_69 = arith.constant 0 : index
      %155 = arith.index_cast %153 : i32 to index
      %156 = vector.load %arg6[%154, %c0_69, %155] : memref<2x64x544xbf16, #tpu.memory_space<vmem>>, vector<1x64x256xbf16>
      %157 = vector.shape_cast %156 : vector<1x64x256xbf16> to vector<64x256xbf16>
      %158 = vector.shape_cast %150 : vector<64x256xbf16> to vector<1x64x256xbf16>
      tpu.vector_store %arg6[%154, %c0_69, %155], %158 {strides = array<i32>} : memref<2x64x544xbf16, #tpu.memory_space<vmem>>, vector<1x64x256xbf16>,
      %c1_i32_70 = arith.constant 1 : i32
    } else {
    }
    %c19_i32_16 = arith.constant 19 : i32
    %44 = arith.cmpi eq, %arg1, %c19_i32_16 : i32
    %45 = arith.extui %44 : i1 to i32
    %cst_17 = arith.constant 0.000000e+00 : bf16
    %c0_i32_18 = arith.constant 0 : i32
    %46 = arith.cmpi ne, %45, %c0_i32_18 : i32
    scf.if %46 {
      %c0_i32_19 = arith.constant 0 : i32
      %c16_i32_20 = arith.constant 16 : i32
      %47 = arith.muli %c0_i32_19, %c16_i32_20 : i32
      %c0_i32_21 = arith.constant 0 : i32
      %48 = arith.addi %47, %c0_i32_21 : i32
      %c16_i32_22 = arith.constant 16 : i32
      %49 = arith.muli %48, %c16_i32_22 : i32
      %c128_i32 = arith.constant 128 : i32
      %50 = arith.addi %c128_i32, %49 : i32
      %c-1_i32 = arith.constant -1 : i32
      %51 = arith.addi %50, %c-1_i32 : i32
      %52 = arith.index_cast %9 : i32 to index
      %c0_23 = arith.constant 0 : index
      %53 = arith.index_cast %51 : i32 to index
      %54 = vector.load %arg6[%52, %c0_23, %53] : memref<2x64x544xbf16, #tpu.memory_space<vmem>>, vector<1x64x256xbf16>
      %55 = vector.shape_cast %54 : vector<1x64x256xbf16> to vector<64x256xbf16>
      %56 = vector.shape_cast %38 : vector<1x256xi1> to vector<1x256xi1>
      %57 = vector.broadcast %56 : vector<1x256xi1> to vector<64x256xi1>
      %58 = vector.broadcast %cst_17 : bf16 to vector<64x256xbf16>
      %59 = arith.select %57, %55, %58 : vector<64x256xi1>, vector<64x256xbf16>
      %c0_i32_24 = arith.constant 0 : i32
      %60 = arith.addi %47, %c0_i32_24 : i32
      %c16_i32_25 = arith.constant 16 : i32
      %61 = arith.muli %60, %c16_i32_25 : i32
      %c128_i32_26 = arith.constant 128 : i32
      %62 = arith.addi %c128_i32_26, %61 : i32
      %c0_i32_27 = arith.constant 0 : i32
      %63 = arith.addi %62, %c0_i32_27 : i32
      %64 = arith.index_cast %9 : i32 to index
      %c0_28 = arith.constant 0 : index
      %65 = arith.index_cast %63 : i32 to index
      %66 = vector.load %arg6[%64, %c0_28, %65] : memref<2x64x544xbf16, #tpu.memory_space<vmem>>, vector<1x64x256xbf16>
      %67 = vector.shape_cast %66 : vector<1x64x256xbf16> to vector<64x256xbf16>
      %c0_i32_29 = arith.constant 0 : i32
      %68 = arith.addi %47, %c0_i32_29 : i32
      %c16_i32_30 = arith.constant 16 : i32
      %69 = arith.muli %68, %c16_i32_30 : i32
      %c128_i32_31 = arith.constant 128 : i32
      %70 = arith.addi %c128_i32_31, %69 : i32
      %c1_i32_32 = arith.constant 1 : i32
      %71 = arith.addi %70, %c1_i32_32 : i32
      %72 = arith.index_cast %9 : i32 to index
      %c0_33 = arith.constant 0 : index
      %73 = arith.index_cast %71 : i32 to index
      %74 = vector.load %arg6[%72, %c0_33, %73] : memref<2x64x544xbf16, #tpu.memory_space<vmem>>, vector<1x64x256xbf16>
      %75 = vector.shape_cast %74 : vector<1x64x256xbf16> to vector<64x256xbf16>
      %76 = vector.shape_cast %40 : vector<1x256xi1> to vector<1x256xi1>
      %77 = vector.broadcast %76 : vector<1x256xi1> to vector<64x256xi1>
      %78 = vector.broadcast %cst_17 : bf16 to vector<64x256xbf16>
      %79 = arith.select %77, %75, %78 : vector<64x256xi1>, vector<64x256xbf16>
      %c1_i32_34 = arith.constant 1 : i32
      %80 = arith.addi %47, %c1_i32_34 : i32
      %c16_i32_35 = arith.constant 16 : i32
      %81 = arith.muli %80, %c16_i32_35 : i32
      %c128_i32_36 = arith.constant 128 : i32
      %82 = arith.addi %c128_i32_36, %81 : i32
      %c-1_i32_37 = arith.constant -1 : i32
      %83 = arith.addi %82, %c-1_i32_37 : i32
      %84 = arith.index_cast %9 : i32 to index
      %c0_38 = arith.constant 0 : index
      %85 = arith.index_cast %83 : i32 to index
      %86 = vector.load %arg6[%84, %c0_38, %85] : memref<2x64x544xbf16, #tpu.memory_space<vmem>>, vector<1x64x256xbf16>
      %87 = vector.shape_cast %86 : vector<1x64x256xbf16> to vector<64x256xbf16>
      %88 = vector.shape_cast %38 : vector<1x256xi1> to vector<1x256xi1>
      %89 = vector.broadcast %88 : vector<1x256xi1> to vector<64x256xi1>
      %90 = vector.broadcast %cst_17 : bf16 to vector<64x256xbf16>
      %91 = arith.select %89, %87, %90 : vector<64x256xi1>, vector<64x256xbf16>
      %c1_i32_39 = arith.constant 1 : i32
      %92 = arith.addi %47, %c1_i32_39 : i32
      %c16_i32_40 = arith.constant 16 : i32
      %93 = arith.muli %92, %c16_i32_40 : i32
      %c128_i32_41 = arith.constant 128 : i32
      %94 = arith.addi %c128_i32_41, %93 : i32
      %c0_i32_42 = arith.constant 0 : i32
      %95 = arith.addi %94, %c0_i32_42 : i32
      %96 = arith.index_cast %9 : i32 to index
      %c0_43 = arith.constant 0 : index
      %97 = arith.index_cast %95 : i32 to index
      %98 = vector.load %arg6[%96, %c0_43, %97] : memref<2x64x544xbf16, #tpu.memory_space<vmem>>, vector<1x64x256xbf16>
      %99 = vector.shape_cast %98 : vector<1x64x256xbf16> to vector<64x256xbf16>
      %c1_i32_44 = arith.constant 1 : i32
      %100 = arith.addi %47, %c1_i32_44 : i32
      %c16_i32_45 = arith.constant 16 : i32
      %101 = arith.muli %100, %c16_i32_45 : i32
      %c128_i32_46 = arith.constant 128 : i32
      %102 = arith.addi %c128_i32_46, %101 : i32
      %c1_i32_47 = arith.constant 1 : i32
      %103 = arith.addi %102, %c1_i32_47 : i32
      %104 = arith.index_cast %9 : i32 to index
      %c0_48 = arith.constant 0 : index
      %105 = arith.index_cast %103 : i32 to index
      %106 = vector.load %arg6[%104, %c0_48, %105] : memref<2x64x544xbf16, #tpu.memory_space<vmem>>, vector<1x64x256xbf16>
      %107 = vector.shape_cast %106 : vector<1x64x256xbf16> to vector<64x256xbf16>
      %108 = vector.shape_cast %40 : vector<1x256xi1> to vector<1x256xi1>
      %109 = vector.broadcast %108 : vector<1x256xi1> to vector<64x256xi1>
      %110 = vector.broadcast %cst_17 : bf16 to vector<64x256xbf16>
      %111 = arith.select %109, %107, %110 : vector<64x256xi1>, vector<64x256xbf16>
      %c2_i32_49 = arith.constant 2 : i32
      %112 = arith.addi %47, %c2_i32_49 : i32
      %c16_i32_50 = arith.constant 16 : i32
      %113 = arith.muli %112, %c16_i32_50 : i32
      %c128_i32_51 = arith.constant 128 : i32
      %114 = arith.addi %c128_i32_51, %113 : i32
      %c-1_i32_52 = arith.constant -1 : i32
      %115 = arith.addi %114, %c-1_i32_52 : i32
      %116 = arith.index_cast %9 : i32 to index
      %c0_53 = arith.constant 0 : index
      %117 = arith.index_cast %115 : i32 to index
      %118 = vector.load %arg6[%116, %c0_53, %117] : memref<2x64x544xbf16, #tpu.memory_space<vmem>>, vector<1x64x256xbf16>
      %119 = vector.shape_cast %118 : vector<1x64x256xbf16> to vector<64x256xbf16>
      %120 = vector.shape_cast %38 : vector<1x256xi1> to vector<1x256xi1>
      %121 = vector.broadcast %120 : vector<1x256xi1> to vector<64x256xi1>
      %122 = vector.broadcast %cst_17 : bf16 to vector<64x256xbf16>
      %123 = arith.select %121, %119, %122 : vector<64x256xi1>, vector<64x256xbf16>
      %c2_i32_54 = arith.constant 2 : i32
      %124 = arith.addi %47, %c2_i32_54 : i32
      %c16_i32_55 = arith.constant 16 : i32
      %125 = arith.muli %124, %c16_i32_55 : i32
      %c128_i32_56 = arith.constant 128 : i32
      %126 = arith.addi %c128_i32_56, %125 : i32
      %c0_i32_57 = arith.constant 0 : i32
      %127 = arith.addi %126, %c0_i32_57 : i32
      %128 = arith.index_cast %9 : i32 to index
      %c0_58 = arith.constant 0 : index
      %129 = arith.index_cast %127 : i32 to index
      %130 = vector.load %arg6[%128, %c0_58, %129] : memref<2x64x544xbf16, #tpu.memory_space<vmem>>, vector<1x64x256xbf16>
      %131 = vector.shape_cast %130 : vector<1x64x256xbf16> to vector<64x256xbf16>
      %c2_i32_59 = arith.constant 2 : i32
      %132 = arith.addi %47, %c2_i32_59 : i32
      %c16_i32_60 = arith.constant 16 : i32
      %133 = arith.muli %132, %c16_i32_60 : i32
      %c128_i32_61 = arith.constant 128 : i32
      %134 = arith.addi %c128_i32_61, %133 : i32
      %c1_i32_62 = arith.constant 1 : i32
      %135 = arith.addi %134, %c1_i32_62 : i32
      %136 = arith.index_cast %9 : i32 to index
      %c0_63 = arith.constant 0 : index
      %137 = arith.index_cast %135 : i32 to index
      %138 = vector.load %arg6[%136, %c0_63, %137] : memref<2x64x544xbf16, #tpu.memory_space<vmem>>, vector<1x64x256xbf16>
      %139 = vector.shape_cast %138 : vector<1x64x256xbf16> to vector<64x256xbf16>
      %140 = vector.shape_cast %40 : vector<1x256xi1> to vector<1x256xi1>
      %141 = vector.broadcast %140 : vector<1x256xi1> to vector<64x256xi1>
      %142 = vector.broadcast %cst_17 : bf16 to vector<64x256xbf16>
      %143 = arith.select %141, %139, %142 : vector<64x256xi1>, vector<64x256xbf16>
      %144 = tpu.concatenate %59, %67, %79, %91, %99, %111, %123, %131, %143 in 0 : vector<64x256xbf16>, vector<64x256xbf16>, vector<64x256xbf16>, vector<64x256xbf16>, vector<64x256xbf16>, vector<64x256xbf16>, vector<64x256xbf16>, vector<64x256xbf16>, vector<64x256xbf16> -> vector<576x256xbf16>
      %145 = vector.extract_strided_slice %16 {offsets = [0, 0], sizes = [4, 576], strides = [1, 1]} : vector<64x576xbf16> to vector<4x576xbf16>
      %cst_64 = arith.constant dense<0.000000e+00> : vector<4x256xf32>
      %146 = tpu.matmul %145, %144, %cst_64 {dimension_numbers = #tpu.dot_dimension_numbers<[1], [0], [0], [1], [0, 0, 1, 1], [], []>} : vector<4x576xbf16>, vector<576x256xbf16>, vector<4x256xf32> -> vector<4x256xf32>
      %147 = vector.extract_strided_slice %19 {offsets = [0, 0], sizes = [4, 1], strides = [1, 1]} : vector<64x1xf32> to vector<4x1xf32>
      %148 = vector.broadcast %147 : vector<4x1xf32> to vector<4x256xf32>
      %149 = arith.addf %146, %148 : vector<4x256xf32>
      %c1_i32_65 = arith.constant 1 : i32
      %150 = arith.addi %47, %c1_i32_65 : i32
      %c16_i32_66 = arith.constant 16 : i32
      %151 = arith.muli %150, %c16_i32_66 : i32
      %c0_67 = arith.constant 0 : index
      %c0_68 = arith.constant 0 : index
      %152 = arith.index_cast %151 : i32 to index
      %153 = vector.load %arg2[%c0_67, %c0_68, %152] : memref<1x4x288xbf16, #tpu.memory_space<vmem>>, vector<1x4x256xbf16>
      %154 = vector.shape_cast %153 : vector<1x4x256xbf16> to vector<4x256xbf16>
      %155 = arith.extf %154 : vector<4x256xbf16> to vector<4x256xf32>
      %156 = arith.addf %149, %155 : vector<4x256xf32>
      %c16_i32_69 = arith.constant 16 : i32
      %157 = arith.muli %47, %c16_i32_69 : i32
      %c0_70 = arith.constant 0 : index
      %c0_71 = arith.constant 0 : index
      %158 = arith.index_cast %157 : i32 to index
      %159 = vector.load %arg5[%c0_70, %c0_71, %158] : memref<1x4x256xf32, #tpu.memory_space<vmem>>, vector<1x4x256xf32>
      %160 = vector.shape_cast %159 : vector<1x4x256xf32> to vector<4x256xf32>
      %161 = vector.shape_cast %156 : vector<4x256xf32> to vector<1x4x256xf32>
      tpu.vector_store %arg5[%c0_70, %c0_71, %158], %161 {strides = array<i32>} : memref<1x4x256xf32, #tpu.memory_space<vmem>>, vector<1x4x256xf32>,
      %c1_i32_72 = arith.constant 1 : i32
    } else {
    }
    return
  }
  func.func @transform_0(%arg0: i32, %arg1: i32) -> (i32, i32, i32) {
    %c0_i32 = arith.constant 0 : i32
    %c0_i32_0 = arith.constant 0 : i32
    %c0_i32_1 = arith.constant 0 : i32
    return %arg0, %c0_i32, %c0_i32_0 : i32, i32, i32
  }
  func.func @transform_1(%arg0: i32, %arg1: i32) -> (i32, i32, i32) {
    %c0_i32 = arith.constant 0 : i32
    %c0_i32_0 = arith.constant 0 : i32
    %c0_i32_1 = arith.constant 0 : i32
    %c0_i32_2 = arith.constant 0 : i32
    return %c0_i32, %c0_i32_0, %c0_i32_1 : i32, i32, i32
  }
  func.func @transform_2(%arg0: i32, %arg1: i32) -> (i32, i32, i32) {
    %c0_i32 = arith.constant 0 : i32
    %c0_i32_0 = arith.constant 0 : i32
    %c0_i32_1 = arith.constant 0 : i32
    %c0_i32_2 = arith.constant 0 : i32
    return %c0_i32, %c0_i32_0, %c0_i32_1 : i32, i32, i32
  }
  func.func @transform_3(%arg0: i32, %arg1: i32) -> (i32, i32, i32) {
    %c0_i32 = arith.constant 0 : i32
    %c0_i32_0 = arith.constant 0 : i32
    %c0_i32_1 = arith.constant 0 : i32
    return %arg0, %c0_i32, %c0_i32_0 : i32, i32, i32
  }
}

</mosaic_0001>

<bundles_post_ra>
// kernel: vdsr_forward.1
= control target key start
LH: loop header
LB: loop body
LE: loop exit
PB: predicated region body
PF: predicated region fallthrough
CT: control target
= control target key end

     0   :  { %s4050_s12 = smov 0   ;;  %s4052_s13 = smov 0   ;;  %s7486_s0 = inlined_call_operand.vmem [shape: bf16[2,4,288], index: 0, kind: input, shape index: {}]   ;;  %s7487_s1 = inlined_call_operand.vmem [shape: bf16[20,64,576], index: 1, kind: input, shape index: {}]   ;;  %s7488_s2 = inlined_call_operand.vmem [shape: f32[20,64,1], index: 2, kind: input, shape index: {}]   ;;  %s7489_s3 = inlined_call_operand.vmem [shape: f32[2,4,256], index: 3, kind: output, shape index: {}]  }
   0x1   :  { %s4054_s14 = smov 0   ;;  %s4056_s15 = smov 0  }
   0x2   :  { %s4058_s16 = smov 0  }
   0x3 LB: > { %s22_s17 = sadd.s32 1, %s3990_s14  ;;  %s25_s18 = sadd.s32 1, %s3994_s15  ;;  %s3998_s16 = sphi %s4058_s16, %s13_s16   ;;  %s3994_s15 = sphi %s4056_s15, %s7933_s15   ;;  %s3990_s14 = sphi %s4054_s14, %s7932_s14   ;;  %s3986_s13 = sphi %s4052_s13, %s7931_s13   ;;  %s3982_s12 = sphi %s4050_s12, %s7930_s12  }
   0x4   : > { %p23_p0 = scmp.ge.s32.totalorder %s22_s17, 20  ;;  %p3612_p1 = scmp.ge.s32.totalorder %s3998_s16, 1 }
   0x5   : > { %p149_p2 = scmp.lt.s32.totalorder %s3998_s16, 41 }
   0x6   : > { %s7935_s17 = smov (%p23_p0, %s22_s17), 0  ;;  %s7937_s18 = smov (!%p23_p0, %s25_s18), %s3994_s15 }
   0x7   : > { %p150_p3 = pnand %p3612_p1, %p149_p2  ;;  %p27_p4 = scmp.ge.s32.totalorder %s7937_s18, 2 }
   0x9   : > { %s7939_s18 = smov (%p27_p4, %s7937_s18), 0  ;;  %153 = sbr.rel (%p150_p3) target bundleno = 2099 (0x833), region = 32 }
   0xe   : > { %p173_p5 = scmp.lt.s32.totalorder %s3986_s13, 1  ;;  %s187_s19 = ssub.s32 0, %s3982_s12 }
   0xf   : > { %p186_p6 = scmp.lt.s32.totalorder %s3982_s12, 0  ;;  %s3616_s20 = smin.u32 %s3982_s12, %s187_s19 }
  0x10   : > { %s7941_s13 = smov (!%p173_p5, %s3986_s13), 1  ;;  %s189_s26 = sand.u32 1, %s3616_s20  }
  0x11   : > { %s3880_s21 = smul.u32 6, %s7941_s13  ;;  %s3815_s22 = sshll.u32 %s7941_s13, 3 }
  0x12   : > { %s4088_s25 = scalar_lea.vmem %s7489_s3, %s3815_s22  ;;  %s190_s30 = ssub.s32 0, %s189_s26 }
  0x13   : > { %s4093_s29 = scalar_lea.vmem %s7486_s0, %s3880_s21  ;;  %s7943_s30 = smov (!%p186_p6, %s190_s30), %s189_s26 }
  0x14   : > { %p3618_p7 = scmp.lt.s32.totalorder %s7943_s30, 0  ;;  %s196_s4 = sadd.s32 2, %s7943_s30 }
  0x15   : > { %p3619_p8 = scmp.ne.s32.totalorder %s3982_s12, 0 }
  0x16   : > { %s7945_s4 = smov (!%p3618_p7, %s196_s4), %s7943_s30 }
  0x17   : > { %s198_s5 = ssub.s32 1, %s7945_s4  ;;  %202 = sbr.rel (%p3619_p8) target bundleno = 73 (0x49), region = 36 }
  0x1c   : > { %v203_v0 = vld [vmem:[%s4093_s29] sm:$0x3f]  ;;  %v4000_v1 = vmov 0   ;;  %vm211_vm0 = vcmask 254976   ;;  %vm215_vm1 = vcmask 257026   ;;  %vm219_vm2 = vcmask 257024  }
  0x1d   : > { %205 = vst [vmem:[#allocation1] ss:$2 sm:$0xff] %v203_v0  ;;  %vm240_vm3 = vcmask 125952   ;;  %vm249_vm4 = vcmask 257152  }
  0x1e   : > { %213 = vst [vmem:[#allocation2] sm:$0xcc] %v4000_v1 }
  0x1f   : > { %214 = vst [vmem:[#allocation2 + $0x8] sm:$0xcc] %v4000_v1 }
  0x20   : > { %217 = vst [vmem:[#allocation2 + $0x14] sm:$0xff] %v4000_v1 }
  0x21   : > { %218 = vst [vmem:[#allocation2 + $0x1c] sm:$0xff] %v4000_v1 }
  0x22   : > { %221 = vst [vmem:[#allocation2 + $0x28] sm:$0xff] %v4000_v1 }
  0x23   : > { %222 = vst [vmem:[#allocation2 + $0x30] sm:$0xff] %v4000_v1 }
  0x24   : > { %v206_v2 = vld.sshfl [vmem:[#allocation1] sm:$0xff pattern:$0x75643120]  ;;  %v207_v3 = vld.sshfl [vmem:[#allocation1 + $0x8] sm:$0xff pattern:$0x75643120] }
  0x25   : > { %210 = vst [vmem:[#allocation2 + $0x4] sm:$0x33] %v206_v2 }
  0x26   : > { %212 = vst.msk [vmem:[#allocation2 + $0xc] sm:$0x3] %vm211_vm0, %v207_v3 }
  0x27   : > { %224 = vst [vmem:[#allocation2 + $0x3c] sm:$0xff] %v4000_v1 }
  0x28   : > { %225 = vst [vmem:[#allocation2 + $0x44] sm:$0xff] %v4000_v1 }
  0x29   : > { %227 = vst [vmem:[#allocation2 + $0x50] sm:$0xff] %v4000_v1 }
  0x2a   : > { %228 = vst [vmem:[#allocation2 + $0x58] sm:$0xff] %v4000_v1 }
  0x2b   : > { %230 = vst [vmem:[#allocation2 + $0x64] sm:$0xff] %v4000_v1 }
  0x2c   : > { %231 = vst [vmem:[#allocation2 + $0x6c] sm:$0xff] %v4000_v1 }
  0x2d   : > { %233 = vst [vmem:[#allocation2 + $0x78] sm:$0xff] %v4000_v1 }
  0x2e   : > { %234 = vst [vmem:[#allocation2 + $0x80] sm:$0xff] %v4000_v1 }
  0x2f   : > { %236 = vst [vmem:[#allocation2 + $0x8c] sm:$0xff] %v4000_v1 }
  0x30   : > { %237 = vst [vmem:[#allocation2 + $0x94] sm:$0xff] %v4000_v1 }
  0x31   : > { %216 = vst.msk [vmem:[#allocation2 + $0x10] sm:$0xc] %vm215_vm1, %v4000_v1 }
  0x32   : > { %220 = vst.msk [vmem:[#allocation2 + $0x24] sm:$0xf] %vm219_vm2, %v4000_v1 }
  0x33   : > { %223 = vst.msk [vmem:[#allocation2 + $0x38] sm:$0xf] %vm219_vm2, %v4000_v1 }
  0x34   : > { %226 = vst.msk [vmem:[#allocation2 + $0x4c] sm:$0xf] %vm219_vm2, %v4000_v1 }
  0x35   : > { %229 = vst.msk [vmem:[#allocation2 + $0x60] sm:$0xf] %vm219_vm2, %v4000_v1 }
  0x36   : > { %232 = vst.msk [vmem:[#allocation2 + $0x74] sm:$0xf] %vm219_vm2, %v4000_v1 }
  0x37   : > { %235 = vst.msk [vmem:[#allocation2 + $0x88] sm:$0xf] %vm219_vm2, %v4000_v1 }
  0x38   : > { %238 = vst.msk [vmem:[#allocation2 + $0x9c] sm:$0xf] %vm219_vm2, %v4000_v1 }
  0x39   : > { %241 = vst.msk [vmem:[#allocation2 + $0xa4] sm:$0xf] %vm240_vm3, %v4000_v1 }
  0x3a   : > { %242 = vst.msk [vmem:[#allocation2 + $0xb8] sm:$0xf] %vm240_vm3, %v4000_v1 }
  0x3b   : > { %243 = vst.msk [vmem:[#allocation2 + $0xcc] sm:$0xf] %vm240_vm3, %v4000_v1 }
  0x3c   : > { %244 = vst.msk [vmem:[#allocation2 + $0xe0] sm:$0xf] %vm240_vm3, %v4000_v1 }
  0x3d   : > { %245 = vst.msk [vmem:[#allocation2 + $0xf4] sm:$0xf] %vm240_vm3, %v4000_v1 }
  0x3e   : > { %246 = vst.msk [vmem:[#allocation2 + $0x108] sm:$0xf] %vm240_vm3, %v4000_v1 }
  0x3f   : > { %247 = vst.msk [vmem:[#allocation2 + $0x11c] sm:$0xf] %vm240_vm3, %v4000_v1 }
  0x40   : > { %248 = vst.msk [vmem:[#allocation2 + $0x130] sm:$0xf] %vm240_vm3, %v4000_v1 }
  0x41   : > { %250 = vst.msk [vmem:[#allocation2 + $0xac] sm:$0xf] %vm249_vm4, %v4000_v1 }
  0x42   : > { %251 = vst.msk [vmem:[#allocation2 + $0xc0] sm:$0xf] %vm249_vm4, %v4000_v1 }
  0x43   : > { %252 = vst.msk [vmem:[#allocation2 + $0xd4] sm:$0xf] %vm249_vm4, %v4000_v1 }
  0x44   : > { %253 = vst.msk [vmem:[#allocation2 + $0xe8] sm:$0xf] %vm249_vm4, %v4000_v1 }
  0x45   : > { %254 = vst.msk [vmem:[#allocation2 + $0xfc] sm:$0xf] %vm249_vm4, %v4000_v1 }
  0x46   : > { %255 = vst.msk [vmem:[#allocation2 + $0x110] sm:$0xf] %vm249_vm4, %v4000_v1 }
  0x47   : > { %256 = vst.msk [vmem:[#allocation2 + $0x124] sm:$0xf] %vm249_vm4, %v4000_v1 }
  0x48   : > { %257 = vst.msk [vmem:[#allocation2 + $0x138] sm:$0xf] %vm249_vm4, %v4000_v1 }
  0x49 PF: > { %s3816_s6 = smul.u32 160, %s3982_s12  ;;  %s3621_s7 = sshll.u32 %s3982_s12, 6  ;;  %v295_v4 = vlaneseq  ;;  %v7589_v60 = vmov 0  ;;  %v7592_v61 = vmov 0  ;;  %v7595_v62 = vmov 0 }
  0x4a   : > { %s4105_s10 = scalar_lea.vmem %s7488_s2, %s3621_s7  ;;  %v7598_v63 = vmov 0  ;;  %p3622_p9 = scmp.ge.s32.totalorder %s3982_s12, 19 }
  0x4b   : > { %s4110_s19 = scalar_lea.vmem %s7487_s1, %s3816_s6  ;;  %v4113_v5 = vld [vmem:[%s4105_s10] sm:$0xff]  ;;  %v4116_v6 = vld [vmem:[%s4105_s10 + $0x8] sm:$0xff]  ;;  %v4119_v7 = vld [vmem:[%s4105_s10 + $0x10] sm:$0xff]  ;;  %v296_v8 = vand.u32 127, %v295_v4 }
  0x4c   : > { %7538 = vst [vmem:[#allocation3_spill] sm:$0xff] %v4113_v5  ;;  %v4122_v9 = vld [vmem:[%s4110_s19] sm:$0xff]  ;;  %v4131_v12 = vld [vmem:[%s4110_s19 + $0x8] sm:$0xff]  ;;  %v4140_v16 = vld [vmem:[%s4110_s19 + $0x10] sm:$0xf] }
  0x4d   : > { %7539 = vst [vmem:[#allocation4_spill] sm:$0xff] %v4116_v6  ;;  %v4125_v10 = vld [vmem:[%s4110_s19 + $0x4] sm:$0xf]  ;;  %v4128_v11 = vld [vmem:[%s4110_s19] sm:$0xf]  ;;  %v297_v15 = vadd.s32 128, %v296_v8 }
  0x4e   : > { %7540 = vst [vmem:[#allocation5_spill] sm:$0xff] %v4119_v7  ;;  %v4134_v13 = vld [vmem:[%s4110_s19 + $0xc] sm:$0xf]  ;;  %v4137_v14 = vld [vmem:[%s4110_s19 + $0x8] sm:$0xf]  ;;  %v4251_v53 = vld [vmem:[%s4105_s10 + $0x18] sm:$0xff] }
  0x4f   : > { %7541 = vst [vmem:[#allocation6_spill] sm:$0xff] %v4122_v9  ;;  %v4143_v17 = vld [vmem:[%s4110_s19 + $0x10] sm:$0xf]  ;;  %v4146_v18 = vld [vmem:[%s4110_s19 + $0x14] sm:$0xf0]  ;;  %v4254_v54 = vld [vmem:[%s4105_s10 + $0x20] sm:$0xff] }
  0x50   : > { %7542 = vst [vmem:[#allocation7_spill] sm:$0xff] %v4125_v10  ;;  %v4149_v19 = vld [vmem:[%s4110_s19 + $0x10] sm:$0xf0]  ;;  %v4152_v20 = vld [vmem:[%s4110_s19 + $0x1c] sm:$0xf0]  ;;  %v302_v55 = vand.u32 15, %v296_v8 }
  0x51   : > { %7543 = vst [vmem:[#allocation8_spill] sm:$0xff] %v4128_v11  ;;  %v4155_v21 = vld [vmem:[%s4110_s19 + $0x18] sm:$0xf0]  ;;  %v4158_v22 = vld [vmem:[%s4110_s19 + $0x20] sm:$0xf0]  ;;  %v309_v56 = vand.u32 15, %v297_v15 }
  0x52   : > { %7544 = vst [vmem:[#allocation9_spill] sm:$0xff] %v4131_v12  ;;  %v4161_v23 = vld [vmem:[%s4110_s19 + $0x2c] sm:$0xf]  ;;  %v4164_v24 = vld [vmem:[%s4110_s19 + $0x28] sm:$0xf]  ;;  %v4260_v58 = vld [vmem:[%s4105_s10 + $0x30] sm:$0xff] }
  0x53   : > { %7545 = vst [vmem:[#allocation10_spill] sm:$0xff] %v4134_v13  ;;  %v4167_v25 = vld [vmem:[%s4110_s19 + $0x34] sm:$0xf]  ;;  %v4170_v26 = vld [vmem:[%s4110_s19 + $0x30] sm:$0xf]  ;;  %v4257_v57 = vld [vmem:[%s4105_s10 + $0x28] sm:$0xff] }
  0x54   : > { %7546 = vst [vmem:[#allocation11_spill] sm:$0xff] %v4137_v14  ;;  %v4173_v27 = vld [vmem:[%s4110_s19 + $0x38] sm:$0xf]  ;;  %v4176_v28 = vld [vmem:[%s4110_s19 + $0x3c] sm:$0xf0]  ;;  %vm4265_vm5 = vcmp.gt.s32.totalorder %v302_v55, 0 }
  0x55   : > { %7547 = vst [vmem:[#allocation12_spill] sm:$0xff] %v4140_v16  ;;  %v4179_v29 = vld [vmem:[%s4110_s19 + $0x38] sm:$0xf0]  ;;  %v4182_v30 = vld [vmem:[%s4110_s19 + $0x44] sm:$0xf0]  ;;  %v7590_v60 = vsel %vm4265_vm5, 4294967295, %v7589_v60 }
  0x56   : > { %7548 = vst [vmem:[#allocation13_spill] sm:$0xff] %v4143_v17  ;;  %v4185_v31 = vld [vmem:[%s4110_s19 + $0x40] sm:$0xf0]  ;;  %v4188_v32 = vld [vmem:[%s4110_s19 + $0x48] sm:$0xf0]  ;;  %v4263_v59 = vld [vmem:[%s4105_s10 + $0x38] sm:$0xff] }
  0x57   : > { %7549 = vst [vmem:[#allocation14_spill] sm:$0xff] %v4146_v18  ;;  %v4191_v33 = vld [vmem:[%s4110_s19 + $0x54] sm:$0xf]  ;;  %v4194_v34 = vld [vmem:[%s4110_s19 + $0x50] sm:$0xf]  ;;  %vm4269_vm6 = vcmp.gt.s32.totalorder %v309_v56, 0 }
  0x58   : > { %7550 = vst [vmem:[#allocation15_spill] sm:$0xff] %v4149_v19  ;;  %v4197_v35 = vld [vmem:[%s4110_s19 + $0x5c] sm:$0xf]  ;;  %v4200_v36 = vld [vmem:[%s4110_s19 + $0x58] sm:$0xf]  ;;  %v7593_v61 = vsel %vm4269_vm6, 4294967295, %v7592_v61 }
  0x59   : > { %7551 = vst [vmem:[#allocation16_spill] sm:$0xff] %v4152_v20  ;;  %v4203_v37 = vld [vmem:[%s4110_s19 + $0x60] sm:$0xf]  ;;  %v4206_v38 = vld [vmem:[%s4110_s19 + $0x64] sm:$0xf0]  ;;  %vm4273_vm7 = vcmp.lt.s32.totalorder %v302_v55, 15 }
  0x5a   : > { %7552 = vst [vmem:[#allocation17_spill] sm:$0xff] %v4155_v21  ;;  %v4209_v39 = vld [vmem:[%s4110_s19 + $0x60] sm:$0xf0]  ;;  %v4212_v40 = vld [vmem:[%s4110_s19 + $0x6c] sm:$0xf0]  ;;  %v7596_v62 = vsel %vm4273_vm7, 4294967295, %v7595_v62 }
  0x5b   : > { %7553 = vst [vmem:[#allocation18_spill] sm:$0xff] %v4158_v22  ;;  %v4215_v41 = vld [vmem:[%s4110_s19 + $0x68] sm:$0xf0]  ;;  %v4218_v42 = vld [vmem:[%s4110_s19 + $0x70] sm:$0xf0]  ;;  %vm4277_vm8 = vcmp.lt.s32.totalorder %v309_v56, 15 }
  0x5c   : > { %7554 = vst [vmem:[#allocation19_spill] sm:$0xff] %v4161_v23  ;;  %v4221_v43 = vld [vmem:[%s4110_s19 + $0x7c] sm:$0xf]  ;;  %v4224_v44 = vld [vmem:[%s4110_s19 + $0x78] sm:$0xf]  ;;  %v7599_v63 = vsel %vm4277_vm8, 4294967295, %v7598_v63 }
  0x5d   : > { %7555 = vst [vmem:[#allocation20_spill] sm:$0xff] %v4164_v24  ;;  %v4227_v45 = vld [vmem:[%s4110_s19 + $0x84] sm:$0xf]  ;;  %v4230_v46 = vld [vmem:[%s4110_s19 + $0x80] sm:$0xf] }
  0x5e   : > { %7556 = vst [vmem:[#allocation21_spill] sm:$0xff] %v4167_v25  ;;  %v4233_v47 = vld [vmem:[%s4110_s19 + $0x88] sm:$0xf]  ;;  %v4236_v48 = vld [vmem:[%s4110_s19 + $0x8c] sm:$0xf0] }
  0x5f   : > { %7557 = vst [vmem:[#allocation22_spill] sm:$0xff] %v4170_v26  ;;  %v4239_v49 = vld [vmem:[%s4110_s19 + $0x88] sm:$0xf0]  ;;  %v4242_v50 = vld [vmem:[%s4110_s19 + $0x94] sm:$0xf0] }
  0x60   : > { %7558 = vst [vmem:[#allocation23_spill] sm:$0xff] %v4173_v27  ;;  %v4245_v51 = vld [vmem:[%s4110_s19 + $0x90] sm:$0xf0]  ;;  %v4248_v52 = vld [vmem:[%s4110_s19 + $0x98] sm:$0xf0] }
  0x61   : > { %7559 = vst [vmem:[#allocation24_spill] sm:$0xff] %v4176_v28 }
  0x62   : > { %7560 = vst [vmem:[#allocation25_spill] sm:$0xff] %v4179_v29 }
  0x63   : > { %7561 = vst [vmem:[#allocation26_spill] sm:$0xff] %v4182_v30 }
  0x64   : > { %7562 = vst [vmem:[#allocation27_spill] sm:$0xff] %v4185_v31 }
  0x65   : > { %7563 = vst [vmem:[#allocation28_spill] sm:$0xff] %v4188_v32 }
  0x66   : > { %7564 = vst [vmem:[#allocation29_spill] sm:$0xff] %v4191_v33 }
  0x67   : > { %7565 = vst [vmem:[#allocation30_spill] sm:$0xff] %v4194_v34 }
  0x68   : > { %7566 = vst [vmem:[#allocation31_spill] sm:$0xff] %v4197_v35 }
  0x69   : > { %7567 = vst [vmem:[#allocation32_spill] sm:$0xff] %v4200_v36 }
  0x6a   : > { %7568 = vst [vmem:[#allocation33_spill] sm:$0xff] %v4203_v37 }
  0x6b   : > { %7569 = vst [vmem:[#allocation34_spill] sm:$0xff] %v4206_v38 }
  0x6c   : > { %7570 = vst [vmem:[#allocation35_spill] sm:$0xff] %v4209_v39 }
  0x6d   : > { %7571 = vst [vmem:[#allocation36_spill] sm:$0xff] %v4212_v40 }
  0x6e   : > { %7572 = vst [vmem:[#allocation37_spill] sm:$0xff] %v4215_v41 }
  0x6f   : > { %7573 = vst [vmem:[#allocation38_spill] sm:$0xff] %v4218_v42 }
  0x70   : > { %7574 = vst [vmem:[#allocation39_spill] sm:$0xff] %v4221_v43 }
  0x71   : > { %7575 = vst [vmem:[#allocation40_spill] sm:$0xff] %v4224_v44 }
  0x72   : > { %7576 = vst [vmem:[#allocation41_spill] sm:$0xff] %v4227_v45 }
  0x73   : > { %7577 = vst [vmem:[#allocation42_spill] sm:$0xff] %v4230_v46 }
  0x74   : > { %7578 = vst [vmem:[#allocation43_spill] sm:$0xff] %v4233_v47 }
  0x75   : > { %7579 = vst [vmem:[#allocation44_spill] sm:$0xff] %v4236_v48 }
  0x76   : > { %7580 = vst [vmem:[#allocation45_spill] sm:$0xff] %v4239_v49 }
  0x77   : > { %7581 = vst [vmem:[#allocation46_spill] sm:$0xff] %v4242_v50 }
  0x78   : > { %7582 = vst [vmem:[#allocation47_spill] sm:$0xff] %v4245_v51 }
  0x79   : > { %7583 = vst [vmem:[#allocation48_spill] sm:$0xff] %v4248_v52 }
  0x7a   : > { %7584 = vst [vmem:[#allocation49_spill] sm:$0xff] %v4251_v53 }
  0x7b   : > { %7585 = vst [vmem:[#allocation50_spill] sm:$0xff] %v4254_v54 }
  0x7c   : > { %7586 = vst [vmem:[#allocation51_spill] sm:$0xff] %v4257_v57 }
  0x7d   : > { %7587 = vst [vmem:[#allocation52_spill] sm:$0xff] %v4260_v58 }
  0x7e   : > { %7588 = vst [vmem:[#allocation53_spill] sm:$0xff] %v4263_v59  ;;  %329 = sbr.rel (%p3622_p9) target bundleno = 1220 (0x4c4), region = 40 }
  0x7f   : > { %7591 = vst [vmem:[#allocation54_spill] sm:$0xff] %v7590_v60 }
  0x80   : > { %7594 = vst [vmem:[#allocation55_spill] sm:$0xff] %v7593_v61 }
  0x81   : > { %7597 = vst [vmem:[#allocation56_spill] sm:$0xff] %v7596_v62 }
  0x82   : > { %7600 = vst [vmem:[#allocation57_spill] sm:$0xff] %v7599_v63 }
  0x83   : > { %vm353_vm9 = vmpackc.low %vm4269_vm6, %vm4265_vm5  ;;  %v7490_v0 = vmov 0   ;;  %s4002_s20 = smov 127   ;;  %s4003_s21 = smov 15   ;;  %vm7499_vm11 = vcmask 1039360   ;;  %v7601_v47 = vmov 0   ;;  %vm7498_vm2 = vcmask 7168  }
  0x84   : > { %v354_v1 = vsel %vm353_vm9, 65537, %v7490_v0  ;;  %3953 = vset.pattern.permute.xlu1 %v7490_v0  ;;  %3952 = vset.pattern.permute.xlu0 %v7490_v0  ;;  %s3837_s22 = smul.u32 160, %s7945_s4  ;;  %s4004_s23 = smov 31   ;;  %vm410_vm10 = vmpackc.low %vm4277_vm8, %vm4273_vm7  ;;  %v4377_v45 = vunpack.c.l.b16 %v7601_v47  ;;  %v4380_v50 = vunpack.c.h.b16 %v7601_v47  ;;  %v7602_v47 = vmov 0 }
  0x85   : > { %355 = vrot.lane.b32.xlu0 %v354_v1, %s4002_s20  ;;  %447 = vrot.lane.b32.xlu1 %v354_v1, %s4003_s21  ;;  %v411_v2 = vsel %vm410_vm10, 65537, %v7490_v0  ;;  %s4005_s24 = smov 1   ;;  %s4006_s26 = smov 17   ;;  %vm485_vm8 = vcmask 138240  }
  0x86   : > { %517 = vrot.lane.b32.xlu2 %v354_v1, %s4004_s23  ;;  %s4298_s27 = scalar_lea.vmem [#allocation2], %s3837_s22  ;;  %s4007_s28 = smov 33  }
  0x87   : > { %3951 = vset.pattern.permute.xlu2 %v7490_v0  ;;  %v3626_v3 = vld [vmem:[%s4298_s27 + $0x4] sm:$0xf]  ;;  %v3839_v4 = vld [vmem:[%s4298_s27 + $0x14] sm:$0xf0]  ;;  %v3838_v8 = vld [vmem:[%s4298_s27 + $0x8] sm:$0xf] }
  0x88   : > { %v3628_v15 = vld [vmem:[%s4298_s27 + $0x18] sm:$0xf0]  ;;  %v3634_v55 = vld [vmem:[%s4298_s27 + $0x2c] sm:$0xf]  ;;  %v3841_v56 = vld [vmem:[%s4298_s27 + $0x3c] sm:$0xf0]  ;;  %v4306_v1 = vor.u32 %v3839_v4, %v3626_v3 }
  0x89   : > { %v4308_v0 = vor.u32 %v3838_v8, %v3628_v15  ;;  %v4310_v16 = vor.u32 %v3841_v56, %v3634_v55  ;;  %v3840_v12 = vld [vmem:[%s4298_s27 + $0x30] sm:$0xf]  ;;  %v3642_v9 = vld [vmem:[%s4298_s27 + $0x54] sm:$0xf]  ;;  %v3843_v63 = vld [vmem:[%s4298_s27 + $0x64] sm:$0xf0] }
  0x8a   : > { %v3842_v3 = vld [vmem:[%s4298_s27 + $0x58] sm:$0xf]  ;;  %v3644_v4 = vld [vmem:[%s4298_s27 + $0x68] sm:$0xf0]  ;;  %v4326_v15 = vor.u32 %v3843_v63, %v3642_v9  ;;  %v3650_v56 = vld [vmem:[%s4298_s27 + $0x7c] sm:$0xf] }
  0x8b   : > { %v4328_v55 = vor.u32 %v3842_v3, %v3644_v4  ;;  %v3845_v62 = vld [vmem:[%s4298_s27 + $0x8c] sm:$0xf0]  ;;  %v3844_v61 = vld [vmem:[%s4298_s27 + $0x80] sm:$0xf]  ;;  %v3652_v60 = vld [vmem:[%s4298_s27 + $0x90] sm:$0xf0] }
  0x8c   : > { %v4342_v9 = vor.u32 %v3844_v61, %v3652_v60  ;;  %v3658_v63 = vld [vmem:[%s4298_s27 + $0xc] sm:$0xf]  ;;  %s4008_s30 = smov 111   ;;  %v3662_v60 = vld [vmem:[%s4298_s27 + $0x34] sm:$0xf]  ;;  %v4405_v35 = vld [vmem:[%s4298_s27 + $0x4] sm:$0xff] }
  0x8d   : > { %412 = vrot.lane.b32.xlu0 %v411_v2, %s4005_s24  ;;  %482 = vrot.lane.b32.xlu1 %v411_v2, %s4006_s26  ;;  %v3847_v61 = vld [vmem:[%s4298_s27 + $0x44] sm:$0xf0]  ;;  %v3666_v4 = vld [vmem:[%s4298_s27 + $0x5c] sm:$0xf]  ;;  %s4009_s6 = smov 126   ;;  %s4010_s7 = smov 112  }
  0x8e   : > { %552 = vrot.lane.b32.xlu2 %v411_v2, %s4007_s28  ;;  %v3636_v2 = vld [vmem:[%s4298_s27 + $0x40] sm:$0xf0]  ;;  %v4397_v58 = vld [vmem:[%s4298_s27 + $0xc] sm:$0xf]  ;;  %v4408_v40 = vld [vmem:[%s4298_s27 + $0x18] sm:$0xff]  ;;  %s4011_s8 = smov 110  }
  0x8f   : > { %v4324_v8 = vor.u32 %v3840_v12, %v3636_v2  ;;  %v4340_v12 = vor.u32 %v3845_v62, %v3650_v56  ;;  %v3846_v2 = vld [vmem:[%s4298_s27 + $0x1c] sm:$0xf0]  ;;  %v4358_v62 = vor.u32 %v3847_v61, %v3662_v60  ;;  %v3848_v56 = vld [vmem:[%s4298_s27 + $0x6c] sm:$0xf0]  ;;  %v3849_v60 = vld [vmem:[%s4298_s27 + $0x94] sm:$0xf0] }
  0x90   : > { %v4351_v3 = vor.u32 %v3846_v2, %v3658_v63  ;;  %v4368_v63 = vor.u32 %v3848_v56, %v3666_v4  ;;  %v3670_v2 = vld [vmem:[%s4298_s27 + $0x84] sm:$0xf]  ;;  %v4433_v36 = vld [vmem:[%s4298_s27 + $0x34] sm:$0xf]  ;;  %v4436_v6 = vld [vmem:[%s4298_s27 + $0x48] sm:$0xf] }
  0x91   : > { %v4373_v61 = vor.u32 %v3849_v60, %v3670_v2  ;;  %v4439_v25 = vld [vmem:[%s4298_s27 + $0x2c] sm:$0xff]  ;;  %v4466_v21 = vld [vmem:[%s4298_s27 + $0x54] sm:$0xff]  ;;  %s4012_s9 = smov 96   ;;  %s4013_s10 = smov 95  }
  0x92   : > { %s4014_s11 = smov 94   ;;  %s4015_s13 = smov 16  }
  0x93   : > { %s3850_s19 = smul.u32 160, %s198_s5 }
  0x95   : > { %671 = vrot.lane.b32.xlu0 %v4306_v1, %s4002_s20  ;;  %673 = vrot.lane.b32.xlu1 %v4308_v0, %s4002_s20 }
  0x96   : > { %675 = vrot.lane.b32.xlu2 %v4310_v16, %s4002_s20 }
  0x9d   : > { %677 = vrot.lane.b32.xlu0 %v4324_v8, %s4002_s20  ;;  %679 = vrot.lane.b32.xlu1 %v4326_v15, %s4002_s20 }
  0x9e   : > { %681 = vrot.lane.b32.xlu2 %v4328_v55, %s4002_s20 }
  0xa5   : > { %683 = vrot.lane.b32.xlu0 %v4340_v12, %s4002_s20  ;;  %685 = vrot.lane.b32.xlu1 %v4342_v9, %s4002_s20  ;;  %s5834_s20 = scalar_lea.vmem [#allocation2], %s3850_s19 }
  0xa6   : > { %881 = vrot.lane.b32.xlu2 %v4306_v1, %s4008_s30 }
  0xad   : > { %883 = vrot.lane.b32.xlu0 %v4308_v0, %s4008_s30  ;;  %885 = vrot.lane.b32.xlu1 %v4351_v3, %s4008_s30 }
  0xae   : > { %887 = vrot.lane.b32.xlu2 %v4310_v16, %s4008_s30 }
  0xb5   : > { %889 = vrot.lane.b32.xlu0 %v4324_v8, %s4008_s30  ;;  %891 = vrot.lane.b32.xlu1 %v4358_v62, %s4008_s30 }
  0xb6   : > { %893 = vrot.lane.b32.xlu2 %v4326_v15, %s4008_s30 }
  0xbd   : > { %895 = vrot.lane.b32.xlu0 %v4328_v55, %s4008_s30  ;;  %897 = vrot.lane.b32.xlu1 %v4368_v63, %s4008_s30 }
  0xbe   : > { %899 = vrot.lane.b32.xlu2 %v4340_v12, %s4008_s30 }
  0xc5   : > { %901 = vrot.lane.b32.xlu0 %v4342_v9, %s4008_s30  ;;  %903 = vrot.lane.b32.xlu1 %v4373_v61, %s4008_s30 }
  0xf7   : > { %v356_v52 = vpop.permute.xlu0 %355  ;;  %v448_v30 = vpop.permute.xlu1 %447 }
  0xf8   : > { %v357_v51 = vrot.slane %v356_v52, 4 }
  0xfa   : > { %v359_v4 = vsel %vm7499_vm11, %v357_v51, %v356_v52  ;;  %v367_v56 = vunpack.c.l.b16 %v357_v51  ;;  %v368_v46 = vunpack.c.h.b16 %v357_v51 }
  0xfb   : > { %v360_v42 = vunpack.c.l.b16 %v359_v4  ;;  %v361_v37 = vunpack.c.h.b16 %v359_v4 }
  0xfc   : > { %vm371_vm12 = vcmp.ne.s32.totalorder %v367_v56, %v4377_v45  ;;  %vm372_vm13 = vcmp.ne.s32.totalorder %v368_v46, %v4380_v50 }
  0xfd   : > { %vm364_vm14 = vcmp.ne.s32.totalorder %v360_v42, %v4377_v45  ;;  %vm365_vm15 = vcmp.ne.s32.totalorder %v361_v37, %v4380_v50  ;;  %vm4387_vm0 = vmpackc.low %vm372_vm13, %vm371_vm12  ;;  %v4400_v37 = vld [vmem:[%s4298_s27 + $0x20] sm:$0xf] }
  0xfe   : > { %v7603_v47 = vsel %vm4387_vm0, 4294967295, %v7602_v47  ;;  %vm4391_vm1 = vmpackc.low %vm365_vm15, %vm364_vm14  ;;  %vm450_vm14 = vcmask 121856   ;;  %vm520_vm15 = vcmask 252928  }
  0xff   : > { %7604 = vst [vmem:[#allocation58_spill] sm:$0xff] %v7603_v47  ;;  %v413_v52 = vpop.permute.xlu0 %412 }
 0x100   : > { %v414_v2 = vrot.slane %v413_v52, 4 }
 0x102   : > { %v416_v60 = vsel %vm7498_vm2, %v414_v2, %v413_v52  ;;  %v424_v46 = vunpack.c.l.b16 %v414_v2  ;;  %v425_v4 = vunpack.c.h.b16 %v414_v2 }
 0x103   : > { %v417_v42 = vunpack.c.l.b16 %v416_v60  ;;  %v418_v56 = vunpack.c.h.b16 %v416_v60 }
 0x104   : > { %vm428_vm3 = vcmp.ne.s32.totalorder %v424_v46, %v4377_v45  ;;  %vm429_vm4 = vcmp.ne.s32.totalorder %v425_v4, %v4380_v50 }
 0x105   : > { %vm421_vm9 = vcmp.ne.s32.totalorder %v417_v42, %v4377_v45  ;;  %vm422_vm10 = vcmp.ne.s32.totalorder %v418_v56, %v4380_v50  ;;  %vm4412_vm12 = vmpackc.low %vm429_vm4, %vm428_vm3 }
 0x106   : > { %vm4416_vm13 = vmpackc.low %vm422_vm10, %vm421_vm9  ;;  %v432_v60 = vsel %vm4412_vm12, %v4397_v58, 0  ;;  %v434_v46 = vsel %vm4412_vm12, %v4400_v37, 0  ;;  %v436_v10 = vsel %vm4412_vm12, %v4433_v36, 0  ;;  %v438_v18 = vsel %vm4412_vm12, %v4436_v6, 0 }
 0x107   : > { %v709_v4 = vunpack.c.l.b16 %v432_v60  ;;  %v712_v42 = vunpack.c.l.b16 %v434_v46  ;;  %v431_v56 = vsel %vm4416_vm13, %v4405_v35, 0  ;;  %v433_v41 = vsel %vm4416_vm13, %v4408_v40, 0  ;;  %v4442_v60 = vld [vmem:[%s4298_s27 + $0x40] sm:$0xff] }
 0x108   : > { %v708_v23 = vunpack.c.h.b16 %v431_v56  ;;  %v711_v28 = vunpack.c.h.b16 %v433_v41  ;;  %v707_v32 = vunpack.c.l.b16 %v431_v56  ;;  %v710_v27 = vunpack.c.l.b16 %v433_v41  ;;  %v4463_v56 = vld [vmem:[%s4298_s27 + $0x70] sm:$0xf] }
 0x109   : > { %v733_v46 = vpack.c.b16 %v712_v42, %v709_v4  ;;  %v435_v41 = vsel %vm4416_vm13, %v4439_v25, 0  ;;  %v715_v4 = vunpack.c.l.b16 %v436_v10  ;;  %v718_v42 = vunpack.c.l.b16 %v438_v18 }
 0x10a   : > { %v732_v31 = vpack.c.b16 %v711_v28, %v708_v23  ;;  %v731_v26 = vpack.c.b16 %v710_v27, %v707_v32  ;;  %v437_v23 = vsel %vm4416_vm13, %v4442_v60, 0  ;;  %v4460_v27 = vld [vmem:[%s4298_s27 + $0x5c] sm:$0xf]  ;;  %v449_v28 = vrot.slane %v448_v30, 4  ;;  %v518_v32 = vpop.permute.xlu2 %517 }
 0x10b   : > { %747 = vrot.lane.b32.xlu1 %v733_v46, %s4009_s6  ;;  %v519_v46 = vrot.slane %v518_v32, 4  ;;  %v714_v22 = vunpack.c.h.b16 %v435_v41  ;;  %v717_v17 = vunpack.c.h.b16 %v437_v23  ;;  %v713_v13 = vunpack.c.l.b16 %v435_v41 }
 0x10c   : > { %745 = vrot.lane.b32.xlu0 %v732_v31, %s4009_s6  ;;  %743 = vrot.lane.b32.xlu2 %v731_v26, %s4009_s6  ;;  %v716_v20 = vunpack.c.l.b16 %v437_v23  ;;  %v4469_v31 = vld [vmem:[%s4298_s27 + $0x68] sm:$0xff]  ;;  %v440_v26 = vsel %vm4412_vm12, %v4460_v27, 0  ;;  %v442_v10 = vsel %vm4412_vm12, %v4463_v56, 0  ;;  %v4478_v18 = vsel %vm450_vm14, %v449_v28, %v448_v30 }
 0x10d   : > { %v459_v14 = vunpack.c.l.b16 %v449_v28  ;;  %v460_v29 = vunpack.c.h.b16 %v449_v28  ;;  %v736_v24 = vpack.c.b16 %v718_v42, %v715_v4  ;;  %v439_v41 = vsel %vm4416_vm13, %v4466_v21, 0 }
 0x10e   : > { %v441_v23 = vsel %vm4416_vm13, %v4469_v31, 0  ;;  %v521_v57 = vsel %vm520_vm15, %v519_v46, %v518_v32  ;;  %v735_v59 = vpack.c.b16 %v717_v17, %v714_v22  ;;  %v734_v43 = vpack.c.b16 %v716_v20, %v713_v13  ;;  %v4492_v20 = vld [vmem:[%s4298_s27 + $0x84] sm:$0xf]  ;;  %v4495_v22 = vld [vmem:[%s4298_s27 + $0x98] sm:$0xf] }
 0x10f   : > { %v721_v48 = vunpack.c.l.b16 %v440_v26  ;;  %v522_v30 = vunpack.c.l.b16 %v521_v57  ;;  %v724_v28 = vunpack.c.l.b16 %v442_v10  ;;  %v523_v4 = vunpack.c.h.b16 %v521_v57 }
 0x110   : > { %v529_v42 = vunpack.c.l.b16 %v519_v46  ;;  %v530_v53 = vunpack.c.h.b16 %v519_v46  ;;  %v720_v54 = vunpack.c.h.b16 %v439_v41  ;;  %v723_v49 = vunpack.c.h.b16 %v441_v23 }
 0x111   : > { %v719_v17 = vunpack.c.l.b16 %v439_v41  ;;  %vm526_vm3 = vcmp.ne.s32.totalorder %v522_v30, %v4377_v45  ;;  %v722_v13 = vunpack.c.l.b16 %v441_v23  ;;  %vm527_vm4 = vcmp.ne.s32.totalorder %v523_v4, %v4380_v50 }
 0x112   : > { %vm533_vm9 = vcmp.ne.s32.totalorder %v529_v42, %v4377_v45  ;;  %vm534_vm10 = vcmp.ne.s32.totalorder %v530_v53, %v4380_v50  ;;  %v453_v57 = vunpack.c.h.b16 %v4478_v18  ;;  %vm4505_vm14 = vmpackc.low %vm527_vm4, %vm526_vm3  ;;  %v553_v32 = vpop.permute.xlu2 %552  ;;  %vm4510_vm15 = vcmp.ne.s32.totalorder %v459_v14, %v4377_v45  ;;  %v4520_v53 = vld [vmem:[%s4298_s27 + $0x90] sm:$0xff] }
 0x113   : > { %753 = vrot.lane.b32.xlu1 %v736_v24, %s4009_s6  ;;  %v4498_v24 = vld [vmem:[%s4298_s27 + $0x7c] sm:$0xff]  ;;  %vm4515_vm2 = vcmp.ne.s32.totalorder %v460_v29, %v4380_v50  ;;  %vm4522_vm11 = vmpackc.low %vm534_vm10, %vm533_vm9  ;;  %vm555_vm3 = vcmask 269312   ;;  %v739_v41 = vpack.c.b16 %v724_v28, %v721_v48  ;;  %v444_v14 = vsel %vm4412_vm12, %v4492_v20, 0 }
 0x114   : > { %751 = vrot.lane.b32.xlu0 %v735_v59, %s4009_s6  ;;  %749 = vrot.lane.b32.xlu2 %v734_v43, %s4009_s6  ;;  %v452_v43 = vunpack.c.l.b16 %v4478_v18  ;;  %v554_v18 = vrot.slane %v553_v32, 4  ;;  %v446_v29 = vsel %vm4412_vm12, %v4495_v22, 0  ;;  %v443_v23 = vsel %vm4416_vm13, %v4498_v24, 0  ;;  %vm4548_vm12 = vmpackc.low %vm4515_vm2, %vm4510_vm15 }
 0x115   : > { %v738_v30 = vpack.c.b16 %v723_v49, %v720_v54  ;;  %v737_v4 = vpack.c.b16 %v722_v13, %v719_v17  ;;  %v445_v48 = vsel %vm4416_vm13, %v4520_v53, 0  ;;  %v727_v54 = vunpack.c.l.b16 %v444_v14  ;;  %v483_v17 = vpop.permute.xlu1 %482 }
 0x116   : > { %v556_v42 = vsel %vm555_vm3, %v554_v18, %v553_v32  ;;  %v564_v44 = vunpack.c.l.b16 %v554_v18  ;;  %v565_v11 = vunpack.c.h.b16 %v554_v18  ;;  %vm4540_vm4 = vcmp.ne.s32.totalorder %v452_v43, %v4377_v45 }
 0x117   : > { %v557_v28 = vunpack.c.l.b16 %v556_v42  ;;  %v558_v19 = vunpack.c.h.b16 %v556_v42  ;;  %v730_v13 = vunpack.c.l.b16 %v446_v29  ;;  %vm457_vm15 = vcmp.ne.s32.totalorder %v453_v57, %v4380_v50 }
 0x118   : > { %vm4553_vm13 = vcmp.ne.s32.totalorder %v564_v44, %v4377_v45  ;;  %vm569_vm2 = vcmp.ne.s32.totalorder %v565_v11, %v4380_v50  ;;  %v726_v43 = vunpack.c.h.b16 %v443_v23  ;;  %v729_v32 = vunpack.c.h.b16 %v445_v48 }
 0x119   : > { %vm561_vm9 = vcmp.ne.s32.totalorder %v557_v28, %v4377_v45  ;;  %vm562_vm10 = vcmp.ne.s32.totalorder %v558_v19, %v4380_v50  ;;  %v725_v46 = vunpack.c.l.b16 %v443_v23  ;;  %v728_v26 = vunpack.c.l.b16 %v445_v48  ;;  %vm4572_vm7 = vmpackc.low %vm569_vm2, %vm4553_vm13 }
 0x11a   : > { %vm4563_vm3 = vmpackc.low %vm562_vm10, %vm561_vm9  ;;  %v467_v18 = vsel %vm4548_vm12, %v4397_v58, 0  ;;  %v484_v11 = vrot.slane %v483_v17, 4  ;;  %v469_v57 = vsel %vm4548_vm12, %v4400_v37, 0  ;;  %v742_v14 = vpack.c.b16 %v730_v13, %v727_v54 }
 0x11b   : > { %759 = vrot.lane.b32.xlu1 %v739_v41, %s4009_s6  ;;  %vm4581_vm9 = vmpackc.low %vm457_vm15, %vm4540_vm4  ;;  %v794_v42 = vunpack.c.l.b16 %v467_v18  ;;  %v740_v2 = vpack.c.b16 %v728_v26, %v725_v46  ;;  %v797_v5 = vunpack.c.l.b16 %v469_v57  ;;  %v473_v57 = vsel %vm4548_vm12, %v4436_v6, 0 }
 0x11c   : > { %757 = vrot.lane.b32.xlu0 %v738_v30, %s4009_s6  ;;  %755 = vrot.lane.b32.xlu2 %v737_v4, %s4009_s6  ;;  %v486_v29 = vsel %vm485_vm8, %v484_v11, %v483_v17  ;;  %v494_v23 = vunpack.c.l.b16 %v484_v11  ;;  %v495_v30 = vunpack.c.h.b16 %v484_v11  ;;  %v741_v4 = vpack.c.b16 %v729_v32, %v726_v43 }
 0x11d   : > { %v487_v48 = vunpack.c.l.b16 %v486_v29  ;;  %v488_v28 = vunpack.c.h.b16 %v486_v29  ;;  %v466_v52 = vsel %vm4581_vm9, %v4405_v35, 0  ;;  %v468_v54 = vsel %vm4581_vm9, %v4408_v40, 0 }
 0x11e   : > { %vm498_vm13 = vcmp.ne.s32.totalorder %v494_v23, %v4377_v45  ;;  %vm499_vm10 = vcmp.ne.s32.totalorder %v495_v30, %v4380_v50  ;;  %v793_v43 = vunpack.c.h.b16 %v466_v52  ;;  %v796_v32 = vunpack.c.h.b16 %v468_v54 }
 0x11f   : > { %vm491_vm8 = vcmp.ne.s32.totalorder %v487_v48, %v4377_v45  ;;  %vm492_vm4 = vcmp.ne.s32.totalorder %v488_v28, %v4380_v50  ;;  %vm4596_vm2 = vmpackc.low %vm499_vm10, %vm498_vm13  ;;  %v792_v46 = vunpack.c.l.b16 %v466_v52  ;;  %v795_v26 = vunpack.c.l.b16 %v468_v54 }
 0x120   : > { %vm4602_vm15 = vmpackc.low %vm492_vm4, %vm491_vm8  ;;  %v818_v18 = vpack.c.b16 %v797_v5, %v794_v42  ;;  %v817_v45 = vpack.c.b16 %v796_v32, %v793_v43  ;;  %v471_v50 = vsel %vm4548_vm12, %v4433_v36, 0  ;;  %v470_v29 = vsel %vm4581_vm9, %v4439_v25, 0 }
 0x121   : > { %v816_v11 = vpack.c.b16 %v795_v26, %v792_v46  ;;  %v472_v5 = vsel %vm4581_vm9, %v4442_v60, 0  ;;  %v800_v23 = vunpack.c.l.b16 %v471_v50  ;;  %v803_v30 = vunpack.c.l.b16 %v473_v57 }
 0x122   : > { %v802_v42 = vunpack.c.h.b16 %v472_v5  ;;  %v798_v48 = vunpack.c.l.b16 %v470_v29  ;;  %v801_v28 = vunpack.c.l.b16 %v472_v5  ;;  %v475_v43 = vsel %vm4548_vm12, %v4460_v27, 0 }
 0x123   : > { %765 = vrot.lane.b32.xlu1 %v742_v14, %s4009_s6  ;;  %v4612_v14 = vpop.permute.xlu2 %675  ;;  %v477_v32 = vsel %vm4548_vm12, %v4463_v56, 0  ;;  %v474_v46 = vsel %vm4581_vm9, %v4466_v21, 0  ;;  %v476_v26 = vsel %vm4581_vm9, %v4469_v31, 0  ;;  %v504_v41 = vsel %vm4596_vm2, %v4400_v37, 0 }
 0x124   : > { %763 = vrot.lane.b32.xlu0 %v741_v4, %s4009_s6  ;;  %761 = vrot.lane.b32.xlu2 %v740_v2, %s4009_s6  ;;  %v799_v4 = vunpack.c.h.b16 %v470_v29  ;;  %v821_v2 = vpack.c.b16 %v803_v30, %v800_v23  ;;  %v819_v54 = vpack.c.b16 %v801_v28, %v798_v48  ;;  %v805_v50 = vunpack.c.h.b16 %v474_v46  ;;  %v4640_v23 = vpop.permute.xlu1 %673 }
 0x125   : > { %v808_v57 = vunpack.c.h.b16 %v476_v26  ;;  %v804_v29 = vunpack.c.l.b16 %v474_v46  ;;  %v807_v5 = vunpack.c.l.b16 %v476_v26  ;;  %v479_v28 = vsel %vm4548_vm12, %v4492_v20, 0 }
 0x126   : > { %v820_v52 = vpack.c.b16 %v802_v42, %v799_v4  ;;  %v4642_v4 = vpop.permute.xlu0 %671  ;;  %v510_v33 = vsel %vm4596_vm2, %v4460_v27, 0  ;;  %v545_v47 = vsel %vm4522_vm11, %v4460_v27, 0  ;;  %vm1108_vm10 = vcmask 777216  }
 0x127   : > { %v823_v42 = vpack.c.b16 %v808_v57, %v805_v50  ;;  %v822_v48 = vpack.c.b16 %v807_v5, %v804_v29  ;;  %v502_v50 = vsel %vm4596_vm2, %v4397_v58, 0  ;;  %v1029_v27 = vunpack.c.l.b16 %v545_v47 }
 0x128   : > { %v551_v47 = vsel %vm4522_vm11, %v4495_v22, 0  ;;  %vm1193_vm8 = vcmask 769024   ;;  %vm7657_vm4 = vcmask 7168  }
 0x12b   : > { %832 = vrot.lane.b32.xlu1 %v818_v18, %s4010_s7  ;;  %v4638_v18 = vpop.permute.xlu2 %681 }
 0x12c   : > { %830 = vrot.lane.b32.xlu0 %v817_v45, %s4010_s7  ;;  %828 = vrot.lane.b32.xlu2 %v816_v11, %s4010_s7  ;;  %v806_v45 = vunpack.c.l.b16 %v475_v43  ;;  %v809_v11 = vunpack.c.l.b16 %v477_v32  ;;  %v812_v43 = vunpack.c.l.b16 %v479_v28  ;;  %v4667_v29 = vpop.permute.xlu1 %679  ;;  %v501_v28 = vsel %vm4602_vm15, %v4405_v35, 0 }
 0x12e   : > { %v824_v30 = vpack.c.b16 %v809_v11, %v806_v45 }
 0x133   : > { %838 = vrot.lane.b32.xlu1 %v821_v2, %s4010_s7  ;;  %v481_v2 = vsel %vm4548_vm12, %v4495_v22, 0  ;;  %v4659_v11 = vpop.permute.xlu2 %881 }
 0x134   : > { %836 = vrot.lane.b32.xlu0 %v820_v52, %s4010_s7  ;;  %834 = vrot.lane.b32.xlu2 %v819_v54, %s4010_s7  ;;  %v478_v52 = vsel %vm4581_vm9, %v4498_v24, 0  ;;  %v480_v54 = vsel %vm4581_vm9, %v4520_v53, 0  ;;  %v815_v32 = vunpack.c.l.b16 %v481_v2  ;;  %7635 = vst [vmem:[#allocation59_spill] sm:$0xff] %v4659_v11  ;;  %v503_v2 = vsel %vm4602_vm15, %v4408_v40, 0 }
 0x135   : > { %v811_v46 = vunpack.c.h.b16 %v478_v52  ;;  %v814_v26 = vunpack.c.h.b16 %v480_v54  ;;  %v810_v49 = vunpack.c.l.b16 %v478_v52  ;;  %v813_v45 = vunpack.c.l.b16 %v480_v54  ;;  %v4676_v52 = vpop.permute.xlu0 %677 }
 0x136   : > { %v827_v57 = vpack.c.b16 %v815_v32, %v812_v43  ;;  %v931_v54 = vunpack.c.h.b16 %v501_v28  ;;  %v934_v43 = vunpack.c.h.b16 %v503_v2  ;;  %v930_v32 = vunpack.c.l.b16 %v501_v28 }
 0x137   : > { %v826_v5 = vpack.c.b16 %v814_v26, %v811_v46  ;;  %v933_v46 = vunpack.c.l.b16 %v503_v2  ;;  %v514_v11 = vsel %vm4596_vm2, %v4492_v20, 0 }
 0x13b   : > { %844 = vrot.lane.b32.xlu1 %v824_v30, %s4010_s7  ;;  %v825_v30 = vpack.c.b16 %v813_v45, %v810_v49  ;;  %v4680_v49 = vpop.permute.xlu2 %887  ;;  %v955_v45 = vpack.c.b16 %v934_v43, %v931_v54 }
 0x13c   : > { %842 = vrot.lane.b32.xlu0 %v823_v42, %s4010_s7  ;;  %840 = vrot.lane.b32.xlu2 %v822_v48, %s4010_s7  ;;  %v932_v42 = vunpack.c.l.b16 %v502_v50  ;;  %v935_v48 = vunpack.c.l.b16 %v504_v41  ;;  %v954_v50 = vpack.c.b16 %v933_v46, %v930_v32  ;;  %v506_v41 = vsel %vm4596_vm2, %v4433_v36, 0 }
 0x13d   : > { %v4699_v2 = vpop.permute.xlu0 %683 }
 0x13e   : > { %v956_v26 = vpack.c.b16 %v935_v48, %v932_v42  ;;  %v4695_v42 = vpop.permute.xlu1 %685  ;;  %v938_v48 = vunpack.c.l.b16 %v506_v41  ;;  %v511_v41 = vsel %vm4602_vm15, %v4469_v31, 0 }
 0x143   : > { %850 = vrot.lane.b32.xlu1 %v827_v57, %s4010_s7  ;;  %v508_v57 = vsel %vm4596_vm2, %v4436_v6, 0  ;;  %v4701_v34 = vpop.permute.xlu2 %893 }
 0x144   : > { %848 = vrot.lane.b32.xlu0 %v826_v5, %s4010_s7  ;;  %846 = vrot.lane.b32.xlu2 %v825_v30, %s4010_s7  ;;  %v505_v5 = vsel %vm4602_vm15, %v4439_v25, 0  ;;  %v507_v30 = vsel %vm4602_vm15, %v4442_v60, 0  ;;  %v941_v28 = vunpack.c.l.b16 %v508_v57  ;;  %v944_v57 = vunpack.c.l.b16 %v510_v33 }
 0x145   : > { %v937_v54 = vunpack.c.h.b16 %v505_v5  ;;  %v940_v43 = vunpack.c.h.b16 %v507_v30  ;;  %v936_v32 = vunpack.c.l.b16 %v505_v5  ;;  %v939_v46 = vunpack.c.l.b16 %v507_v30 }
 0x146   : > { %v4718_v30 = vpop.permute.xlu1 %885  ;;  %v513_v33 = vsel %vm4602_vm15, %v4498_v24, 0 }
 0x147   : > { %v958_v7 = vpack.c.b16 %v940_v43, %v937_v54  ;;  %v957_v39 = vpack.c.b16 %v939_v46, %v936_v32  ;;  %7636 = vst [vmem:[#allocation60_spill] sm:$0xff] %v4718_v30  ;;  %v945_v43 = vunpack.c.l.b16 %v511_v41  ;;  %v4720_v32 = vpop.permute.xlu0 %883  ;;  %v949_v17 = vunpack.c.h.b16 %v513_v33 }
 0x148   : > { %7637 = vst [vmem:[#allocation61_spill] sm:$0xff] %v4720_v32  ;;  %v541_v32 = vsel %vm4522_vm11, %v4433_v36, 0 }
 0x14b   : > { %970 = vrot.lane.b32.xlu1 %v956_v26, %s4011_s8  ;;  %v959_v26 = vpack.c.b16 %v941_v28, %v938_v48  ;;  %v946_v28 = vunpack.c.h.b16 %v511_v41 }
 0x14c   : > { %968 = vrot.lane.b32.xlu0 %v955_v45, %s4011_s8  ;;  %966 = vrot.lane.b32.xlu2 %v954_v50, %s4011_s8  ;;  %v512_v45 = vsel %vm4596_vm2, %v4463_v56, 0  ;;  %v509_v50 = vsel %vm4602_vm15, %v4466_v21, 0 }
 0x14d   : > { %v947_v5 = vunpack.c.l.b16 %v512_v45  ;;  %v943_v48 = vunpack.c.h.b16 %v509_v50  ;;  %v942_v54 = vunpack.c.l.b16 %v509_v50  ;;  %v4737_v45 = vpop.permute.xlu2 %899  ;;  %v950_v50 = vunpack.c.l.b16 %v514_v11 }
 0x14e   : > { %v536_v11 = vsel %vm4505_vm14, %v4405_v35, 0 }
 0x14f   : > { %v962_v46 = vpack.c.b16 %v947_v5, %v944_v57  ;;  %v960_v38 = vpack.c.b16 %v945_v43, %v942_v54  ;;  %v948_v5 = vunpack.c.l.b16 %v513_v33  ;;  %v4741_v43 = vpop.permute.xlu0 %889 }
 0x153   : > { %976 = vrot.lane.b32.xlu1 %v959_v26, %s4011_s8  ;;  %v961_v26 = vpack.c.b16 %v946_v28, %v943_v48  ;;  %v4739_v28 = vpop.permute.xlu1 %891 }
 0x154   : > { %974 = vrot.lane.b32.xlu0 %v958_v7, %s4011_s8  ;;  %972 = vrot.lane.b32.xlu2 %v957_v39, %s4011_s8  ;;  %v516_v7 = vsel %vm4596_vm2, %v4495_v22, 0  ;;  %v515_v39 = vsel %vm4602_vm15, %v4520_v53, 0  ;;  %7638 = vst [vmem:[#allocation62_spill] sm:$0xff] %v4739_v28  ;;  %vm7658_vm2 = vmmov %vm7657_vm4 }
 0x155   : > { %v953_v41 = vunpack.c.l.b16 %v516_v7  ;;  %v952_v57 = vunpack.c.h.b16 %v515_v39  ;;  %v951_v48 = vunpack.c.l.b16 %v515_v39  ;;  %v538_v7 = vsel %vm4505_vm14, %v4408_v40, 0  ;;  %vm7659_vm15 = vmmov %vm7658_vm2 }
 0x157   : > { %v965_v54 = vpack.c.b16 %v953_v41, %v950_v50  ;;  %v963_v13 = vpack.c.b16 %v951_v48, %v948_v5  ;;  %v1016_v41 = vunpack.c.h.b16 %v536_v11  ;;  %v1018_v5 = vunpack.c.l.b16 %v538_v7 }
 0x15b   : > { %982 = vrot.lane.b32.xlu1 %v962_v46, %s4011_s8  ;;  %v964_v46 = vpack.c.b16 %v952_v57, %v949_v17  ;;  %v1019_v17 = vunpack.c.h.b16 %v538_v7  ;;  %v1015_v57 = vunpack.c.l.b16 %v536_v11  ;;  %v1023_v11 = vunpack.c.l.b16 %v541_v32 }
 0x15c   : > { %980 = vrot.lane.b32.xlu0 %v961_v26, %s4011_s8  ;;  %978 = vrot.lane.b32.xlu2 %v960_v38, %s4011_s8  ;;  %v537_v26 = vsel %vm4522_vm11, %v4397_v58, 0  ;;  %v539_v38 = vsel %vm4522_vm11, %v4400_v37, 0 }
 0x15d   : > { %v1017_v33 = vunpack.c.l.b16 %v537_v26  ;;  %v1020_v39 = vunpack.c.l.b16 %v539_v38  ;;  %v1040_v30 = vpack.c.b16 %v1019_v17, %v1016_v41  ;;  %v1039_v28 = vpack.c.b16 %v1018_v5, %v1015_v57  ;;  %v4775_v38 = vpop.permute.xlu0 %895 }
 0x15e   : > { %v542_v26 = vsel %vm4505_vm14, %v4442_v60, 0 }
 0x15f   : > { %v1041_v48 = vpack.c.b16 %v1020_v39, %v1017_v33  ;;  %v1025_v41 = vunpack.c.h.b16 %v542_v26  ;;  %v1024_v57 = vunpack.c.l.b16 %v542_v26 }
 0x163   : > { %988 = vrot.lane.b32.xlu1 %v965_v54, %s4011_s8  ;;  %v4760_v54 = vpop.permute.xlu1 %897 }
 0x164   : > { %986 = vrot.lane.b32.xlu0 %v964_v46, %s4011_s8  ;;  %984 = vrot.lane.b32.xlu2 %v963_v13, %s4011_s8  ;;  %7639 = vst [vmem:[#allocation63_spill] sm:$0xff] %v4760_v54  ;;  %v543_v46 = vsel %vm4522_vm11, %v4436_v6, 0  ;;  %v540_v13 = vsel %vm4505_vm14, %v4439_v25, 0 }
 0x165   : > { %v1026_v7 = vunpack.c.l.b16 %v543_v46  ;;  %v1022_v39 = vunpack.c.h.b16 %v540_v13  ;;  %v1021_v17 = vunpack.c.l.b16 %v540_v13  ;;  %v546_v46 = vsel %vm4505_vm14, %v4469_v31, 0  ;;  %v4798_v26 = vpop.permute.xlu0 %901 }
 0x166   : > { %v4758_v50 = vpop.permute.xlu2 %743 }
 0x167   : > { %v1044_v5 = vpack.c.b16 %v1026_v7, %v1023_v11  ;;  %v1042_v54 = vpack.c.b16 %v1024_v57, %v1021_v17  ;;  %v1031_v7 = vunpack.c.h.b16 %v546_v46 }
 0x16b   : > { %1055 = vrot.lane.b32.xlu1 %v1041_v48, %s4012_s9  ;;  %v1043_v48 = vpack.c.b16 %v1025_v41, %v1022_v39  ;;  %v4788_v32 = vpop.permute.xlu1 %903  ;;  %v1030_v41 = vunpack.c.l.b16 %v546_v46 }
 0x16c   : > { %1053 = vrot.lane.b32.xlu0 %v1040_v30, %s4012_s9  ;;  %1051 = vrot.lane.b32.xlu2 %v1039_v28, %s4012_s9  ;;  %v547_v30 = vsel %vm4522_vm11, %v4463_v56, 0  ;;  %7640 = vst [vmem:[#allocation64_spill] sm:$0xff] %v4788_v32  ;;  %v544_v28 = vsel %vm4505_vm14, %v4466_v21, 0  ;;  %v549_v32 = vsel %vm4522_vm11, %v4492_v20, 0  ;;  %vm852_vm11 = vcmask 916480  }
 0x16d   : > { %v1032_v13 = vunpack.c.l.b16 %v547_v30  ;;  %v1028_v11 = vunpack.c.h.b16 %v544_v28  ;;  %v1027_v39 = vunpack.c.l.b16 %v544_v28  ;;  %v1035_v20 = vunpack.c.l.b16 %v549_v32 }
 0x16e   : > { %v4779_v33 = vpop.permute.xlu2 %749  ;;  %v1038_v28 = vunpack.c.l.b16 %v551_v47 }
 0x16f   : > { %v1047_v17 = vpack.c.b16 %v1032_v13, %v1029_v27  ;;  %v1046_v57 = vpack.c.b16 %v1031_v7, %v1028_v11 }
 0x170   : > { %v1050_v7 = vpack.c.b16 %v1038_v28, %v1035_v20 }
 0x173   : > { %1061 = vrot.lane.b32.xlu1 %v1044_v5, %s4012_s9  ;;  %v1045_v5 = vpack.c.b16 %v1030_v41, %v1027_v39 }
 0x174   : > { %1059 = vrot.lane.b32.xlu0 %v1043_v48, %s4012_s9  ;;  %1057 = vrot.lane.b32.xlu2 %v1042_v54, %s4012_s9  ;;  %v548_v54 = vsel %vm4505_vm14, %v4498_v24, 0  ;;  %v550_v48 = vsel %vm4505_vm14, %v4520_v53, 0  ;;  %vm7647_vm14 = vcmask 1039360  }
 0x175   : > { %v1034_v46 = vunpack.c.h.b16 %v548_v54  ;;  %v1037_v27 = vunpack.c.h.b16 %v550_v48  ;;  %v1033_v13 = vunpack.c.l.b16 %v548_v54  ;;  %v1036_v11 = vunpack.c.l.b16 %v550_v48  ;;  %vm7648_vm12 = vmmov %vm7647_vm14 }
 0x176   : > { %v4800_v56 = vpop.permute.xlu2 %755  ;;  %vm7649_vm9 = vmmov %vm7648_vm12 }
 0x177   : > { %v1049_v39 = vpack.c.b16 %v1037_v27, %v1034_v46  ;;  %v1048_v59 = vpack.c.b16 %v1036_v11, %v1033_v13  ;;  %vm7652_vm13 = vmmov %vm7649_vm9 }
 0x17b   : > { %1067 = vrot.lane.b32.xlu1 %v1047_v17, %s4012_s9 }
 0x17c   : > { %1065 = vrot.lane.b32.xlu0 %v1046_v57, %s4012_s9  ;;  %1063 = vrot.lane.b32.xlu2 %v1045_v5, %s4012_s9 }
 0x17d   : > { %v4817_v30 = vpop.permute.xlu1 %747 }
 0x17e   : > { %7641 = vst [vmem:[#allocation65_spill] sm:$0xff] %v4817_v30  ;;  %v4819_v10 = vpop.permute.xlu0 %745  ;;  %v4821_v22 = vpop.permute.xlu2 %761 }
 0x183   : > { %1073 = vrot.lane.b32.xlu1 %v1050_v7, %s4012_s9 }
 0x184   : > { %1071 = vrot.lane.b32.xlu0 %v1049_v39, %s4012_s9  ;;  %1069 = vrot.lane.b32.xlu2 %v1048_v59, %s4012_s9  ;;  %v577_v39 = vsel %vm4563_vm3, %v4442_v60, 0  ;;  %v579_v60 = vsel %vm4563_vm3, %v4466_v21, 0 }
 0x185   : > { %v4826_v41 = vpop.permute.xlu1 %753 }
 0x186   : > { %7642 = vst [vmem:[#allocation66_spill] sm:$0xff] %v4826_v41  ;;  %v4828_v32 = vpop.permute.xlu0 %751  ;;  %v4830_v17 = vpop.permute.xlu2 %828 }
 0x18b   : > { %1088 = vrot.lane.b32.xlu1 %v4351_v3, %s4013_s10 }
 0x18c   : > { %1086 = vrot.lane.b32.xlu0 %v4308_v0, %s4013_s10  ;;  %1084 = vrot.lane.b32.xlu2 %v4306_v1, %s4013_s10 }
 0x18d   : > { %v4835_v57 = vpop.permute.xlu1 %759 }
 0x18e   : > { %7643 = vst [vmem:[#allocation67_spill] sm:$0xff] %v4835_v57  ;;  %v4837_v5 = vpop.permute.xlu0 %757  ;;  %v4839_v47 = vpop.permute.xlu2 %834 }
 0x193   : > { %1094 = vrot.lane.b32.xlu1 %v4358_v62, %s4013_s10 }
 0x194   : > { %1092 = vrot.lane.b32.xlu0 %v4324_v8, %s4013_s10  ;;  %1090 = vrot.lane.b32.xlu2 %v4310_v16, %s4013_s10  ;;  %v572_v16 = vsel %vm4572_vm7, %v4397_v58, 0  ;;  %v574_v8 = vsel %vm4572_vm7, %v4400_v37, 0 }
 0x195   : > { %v4844_v54 = vpop.permute.xlu1 %765  ;;  %v1135_v58 = vunpack.c.l.b16 %v572_v16  ;;  %v1138_v20 = vunpack.c.l.b16 %v574_v8 }
 0x196   : > { %7644 = vst [vmem:[#allocation68_spill] sm:$0xff] %v4844_v54  ;;  %v4846_v48 = vpop.permute.xlu0 %763  ;;  %v4848_v3 = vpop.permute.xlu2 %840 }
 0x197   : > { %v1159_v13 = vpack.c.b16 %v1138_v20, %v1135_v58 }
 0x19b   : > { %1100 = vrot.lane.b32.xlu1 %v4368_v63, %s4013_s10 }
 0x19c   : > { %1098 = vrot.lane.b32.xlu0 %v4328_v55, %s4013_s10  ;;  %1096 = vrot.lane.b32.xlu2 %v4326_v15, %s4013_s10  ;;  %v571_v15 = vsel %vm4563_vm3, %v4405_v35, 0  ;;  %v573_v55 = vsel %vm4563_vm3, %v4408_v40, 0  ;;  %v576_v40 = vsel %vm4572_vm7, %v4433_v36, 0 }
 0x19d   : > { %v4853_v0 = vpop.permute.xlu1 %832  ;;  %v1137_v46 = vunpack.c.h.b16 %v573_v55  ;;  %v1133_v27 = vunpack.c.l.b16 %v571_v15  ;;  %v1136_v35 = vunpack.c.l.b16 %v573_v55  ;;  %v1141_v59 = vunpack.c.l.b16 %v576_v40 }
 0x19e   : > { %7645 = vst [vmem:[#allocation69_spill] sm:$0xff] %v4853_v0  ;;  %v4855_v1 = vpop.permute.xlu0 %830  ;;  %v4857_v62 = vpop.permute.xlu2 %846  ;;  %v1143_v55 = vunpack.c.h.b16 %v577_v39  ;;  %v341_v0 = vld [vmem:[%s4298_s27 + $0x50] sm:$0xff] }
 0x19f   : > { %7646 = vst [vmem:[#allocation70_spill] sm:$0xff] %v4855_v1  ;;  %v1157_v7 = vpack.c.b16 %v1136_v35, %v1133_v27  ;;  %v581_v27 = vsel %vm4563_vm3, %v4469_v31, 0 }
 0x1a0   : > { %v1149_v40 = vunpack.c.h.b16 %v581_v27 }
 0x1a3   : > { %1106 = vrot.lane.b32.xlu1 %v4373_v61, %s4013_s10  ;;  %v1134_v61 = vunpack.c.h.b16 %v571_v15 }
 0x1a4   : > { %1104 = vrot.lane.b32.xlu0 %v4342_v9, %s4013_s10  ;;  %1102 = vrot.lane.b32.xlu2 %v4340_v12, %s4013_s10  ;;  %v578_v12 = vsel %vm4572_vm7, %v4436_v6, 0  ;;  %v575_v9 = vsel %vm4563_vm3, %v4439_v25, 0  ;;  %v1142_v25 = vunpack.c.l.b16 %v577_v39 }
 0x1a5   : > { %v4874_v63 = vpop.permute.xlu1 %838  ;;  %v1158_v11 = vpack.c.b16 %v1137_v46, %v1134_v61  ;;  %v1144_v16 = vunpack.c.l.b16 %v578_v12  ;;  %v1140_v15 = vunpack.c.h.b16 %v575_v9  ;;  %v1139_v58 = vunpack.c.l.b16 %v575_v9 }
 0x1a6   : > { %v4876_v28 = vpop.permute.xlu0 %836  ;;  %v4878_v37 = vpop.permute.xlu2 %966  ;;  %v1145_v12 = vunpack.c.l.b16 %v579_v60  ;;  %v1148_v9 = vunpack.c.l.b16 %v581_v27 }
 0x1a7   : > { %v1162_v20 = vpack.c.b16 %v1144_v16, %v1141_v59  ;;  %v1161_v61 = vpack.c.b16 %v1143_v55, %v1140_v15  ;;  %v1160_v46 = vpack.c.b16 %v1142_v25, %v1139_v58  ;;  %v690_v55 = vsel %vm7647_vm14, %v4699_v2, %v4695_v42  ;;  %vm7660_vm14 = vmmov %vm7658_vm2 }
 0x1a8   : > { %v1163_v21 = vpack.c.b16 %v1148_v9, %v1145_v12  ;;  %v855_v12 = vsel %vm852_vm11, %v4839_v47, %v4876_v28 }
 0x1ab   : > { %1173 = vrot.lane.b32.xlu1 %v1159_v13, %s4014_s11 }
 0x1ac   : > { %1171 = vrot.lane.b32.xlu0 %v1158_v11, %s4014_s11  ;;  %1169 = vrot.lane.b32.xlu2 %v1157_v7, %s4014_s11  ;;  %v1146_v7 = vunpack.c.h.b16 %v579_v60  ;;  %v688_v60 = vsel %vm7649_vm9, %v4612_v14, %v4676_v52  ;;  %vm905_vm9 = vcmask 908288  }
 0x1ad   : > { %v4895_v36 = vpop.permute.xlu1 %844 }
 0x1ae   : > { %v4897_v6 = vpop.permute.xlu0 %842  ;;  %v4899_v8 = vpop.permute.xlu2 %972  ;;  %v1164_v39 = vpack.c.b16 %v1149_v40, %v1146_v7 }
 0x1b3   : > { %1179 = vrot.lane.b32.xlu1 %v1162_v20, %s4014_s11 }
 0x1b4   : > { %1177 = vrot.lane.b32.xlu0 %v1161_v61, %s4014_s11  ;;  %1175 = vrot.lane.b32.xlu2 %v1160_v46, %s4014_s11  ;;  %v689_v61 = vsel %vm7648_vm12, %v4667_v29, %v4638_v18  ;;  %vm7661_vm12 = vmmov %vm7658_vm2 }
 0x1b5   : > { %v4910_v35 = vpop.permute.xlu1 %850 }
 0x1b6   : > { %v4912_v13 = vpop.permute.xlu0 %848  ;;  %v4914_v11 = vpop.permute.xlu2 %978 }
 0x1b7   : > { %v859_v15 = vsel %vm852_vm11, %v4857_v62, %v4912_v13 }
 0x1bb   : > { %1384 = vrot.lane.b32.xlu1 %v4699_v2, %s4005_s24 }
 0x1bc   : > { %1183 = vrot.lane.b32.xlu0 %v1164_v39, %s4014_s11  ;;  %1181 = vrot.lane.b32.xlu2 %v1163_v21, %s4014_s11  ;;  %v345_v39 = vld [vmem:[%s4298_s27 + $0x78] sm:$0xff]  ;;  %v347_v21 = vld [vmem:[%s4298_s27 + $0x8c] sm:$0xff] }
 0x1bd   : > { %v4920_v31 = vpop.permute.xlu1 %970 }
 0x1be   : > { %v4922_v59 = vpop.permute.xlu0 %968  ;;  %v4924_v16 = vpop.permute.xlu2 %984 }
 0x1c3   : > { %1434 = vrot.lane.b32.xlu1 %v859_v15, %s4005_s24  ;;  %v853_v15 = vsel %vm852_vm11, %v4830_v17, %v4855_v1 }
 0x1c4   : > { %1386 = vrot.lane.b32.xlu2 %v690_v55, %s4005_s24  ;;  %1432 = vrot.lane.b32.xlu0 %v4857_v62, %s4005_s24  ;;  %v583_v55 = vsel %vm4563_vm3, %v4498_v24, 0 }
 0x1c5   : > { %v4936_v58 = vpop.permute.xlu1 %976  ;;  %v1152_v54 = vunpack.c.h.b16 %v583_v55 }
 0x1c6   : > { %v4938_v25 = vpop.permute.xlu0 %974  ;;  %v4940_v20 = vpop.permute.xlu2 %1051 }
 0x1cb   : > { %1426 = vrot.lane.b32.xlu1 %v4848_v3, %s4005_s24 }
 0x1cc   : > { %1378 = vrot.lane.b32.xlu2 %v4667_v29, %s4005_s24  ;;  %1380 = vrot.lane.b32.xlu0 %v689_v61, %s4005_s24  ;;  %v857_v29 = vsel %vm852_vm11, %v4848_v3, %v4897_v6  ;;  %v687_v61 = vsel %vm7652_vm13, %v4642_v4, %v4640_v23  ;;  %vm7663_vm13 = vmmov %vm7658_vm2 }
 0x1cd   : > { %v4950_v2 = vpop.permute.xlu1 %982 }
 0x1ce   : > { %v4952_v62 = vpop.permute.xlu0 %980  ;;  %v4954_v46 = vpop.permute.xlu2 %1057 }
 0x1d3   : > { %1374 = vrot.lane.b32.xlu1 %v688_v60, %s4005_s24  ;;  %v386_v60 = vsel %vm4391_vm1, %v345_v39, 0 }
 0x1d4   : > { %1428 = vrot.lane.b32.xlu2 %v857_v29, %s4005_s24  ;;  %1372 = vrot.lane.b32.xlu0 %v4612_v14, %s4005_s24  ;;  %v388_v29 = vsel %vm4391_vm1, %v347_v21, 0 }
 0x1d5   : > { %v4966_v27 = vpop.permute.xlu1 %988  ;;  %v625_v39 = vunpack.c.h.b16 %v388_v29  ;;  %v624_v30 = vunpack.c.l.b16 %v388_v29 }
 0x1d6   : > { %v4968_v7 = vpop.permute.xlu0 %986  ;;  %v4970_v40 = vpop.permute.xlu2 %1063 }
 0x1db   : > { %1366 = vrot.lane.b32.xlu1 %v4642_v4, %s4005_s24  ;;  %v622_v4 = vunpack.c.h.b16 %v386_v60 }
 0x1dc   : > { %1420 = vrot.lane.b32.xlu2 %v4839_v47, %s4005_s24  ;;  %1422 = vrot.lane.b32.xlu0 %v855_v12, %s4005_s24  ;;  %v585_v47 = vsel %vm4563_vm3, %v4520_v53, 0  ;;  %v1151_v53 = vunpack.c.l.b16 %v583_v55  ;;  %vm767_vm3 = vcmask 1031168  }
 0x1dd   : > { %v4980_v3 = vpop.permute.xlu1 %1055  ;;  %v1154_v44 = vunpack.c.l.b16 %v585_v47  ;;  %v637_v41 = vpack.c.b16 %v625_v39, %v622_v4  ;;  %v1155_v1 = vunpack.c.h.b16 %v585_v47  ;;  %v337_v39 = vld [vmem:[%s4298_s27 + $0x28] sm:$0xff] }
 0x1de   : > { %7650 = vst [vmem:[#allocation71_spill] sm:$0xff] %v4980_v3  ;;  %v4982_v14 = vpop.permute.xlu0 %1053  ;;  %v4984_v9 = vpop.permute.xlu2 %1069  ;;  %v621_v3 = vunpack.c.l.b16 %v386_v60  ;;  %v343_v60 = vld [vmem:[%s4298_s27 + $0x64] sm:$0xff] }
 0x1df   : > { %7651 = vst [vmem:[#allocation72_spill] sm:$0xff] %v4982_v14  ;;  %v1166_v21 = vpack.c.b16 %v1154_v44, %v1151_v53  ;;  %v384_v29 = vsel %vm4391_vm1, %v343_v60, 0 }
 0x1e0   : > { %v618_v4 = vunpack.c.l.b16 %v384_v29 }
 0x1e3   : > { %1416 = vrot.lane.b32.xlu1 %v853_v15, %s4005_s24 }
 0x1e4   : > { %1368 = vrot.lane.b32.xlu2 %v687_v61, %s4005_s24  ;;  %1414 = vrot.lane.b32.xlu0 %v4830_v17, %s4005_s24  ;;  %v636_v61 = vpack.c.b16 %v624_v30, %v621_v3  ;;  %v774_v30 = vsel %vm767_vm3, %v4821_v22, %v4846_v48  ;;  %v382_v3 = vsel %vm4391_vm1, %v341_v0, 0  ;;  %v339_v0 = vld [vmem:[%s4298_s27 + $0x3c] sm:$0xff] }
 0x1e5   : > { %v5008_v24 = vpop.permute.xlu1 %1061  ;;  %v615_v44 = vunpack.c.l.b16 %v382_v3  ;;  %v380_v60 = vsel %vm4391_vm1, %v339_v0, 0  ;;  %v335_v0 = vld [vmem:[%s4298_s27 + $0x14] sm:$0xff] }
 0x1e6   : > { %7653 = vst [vmem:[#allocation73_spill] sm:$0xff] %v5008_v24  ;;  %v5010_v12 = vpop.permute.xlu0 %1059  ;;  %v5012_v15 = vpop.permute.xlu2 %1084 }
 0x1eb   : > { %1187 = vrot.lane.b32.xlu1 %v1166_v21, %s4014_s11 }
 0x1ec   : > { %1362 = vrot.lane.b32.xlu0 %v637_v41, %s4005_s24  ;;  %1360 = vrot.lane.b32.xlu2 %v636_v61, %s4005_s24  ;;  %v1167_v41 = vpack.c.b16 %v1155_v1, %v1152_v54  ;;  %v616_v54 = vunpack.c.h.b16 %v382_v3  ;;  %v619_v1 = vunpack.c.h.b16 %v384_v29  ;;  %v633_v61 = vpack.c.b16 %v618_v4, %v615_v44 }
 0x1ed   : > { %v5017_v17 = vpop.permute.xlu1 %1067  ;;  %v613_v3 = vunpack.c.h.b16 %v380_v60  ;;  %v612_v44 = vunpack.c.l.b16 %v380_v60 }
 0x1ee   : > { %7654 = vst [vmem:[#allocation74_spill] sm:$0xff] %v5017_v17  ;;  %v5019_v24 = vpop.permute.xlu0 %1065  ;;  %v5021_v57 = vpop.permute.xlu2 %1090  ;;  %v634_v21 = vpack.c.b16 %v619_v1, %v616_v54 }
 0x1f3   : > { %1410 = vrot.lane.b32.xlu1 %v774_v30, %s4005_s24 }
 0x1f4   : > { %1408 = vrot.lane.b32.xlu0 %v4821_v22, %s4005_s24  ;;  %1189 = vrot.lane.b32.xlu2 %v1167_v41, %s4014_s11  ;;  %v378_v22 = vsel %vm4391_vm1, %v337_v39, 0  ;;  %v333_v39 = vld [vmem:[%s4298_s27] sm:$0xff] }
 0x1f5   : > { %v5036_v55 = vpop.permute.xlu1 %1073  ;;  %v610_v41 = vunpack.c.h.b16 %v378_v22  ;;  %v609_v1 = vunpack.c.l.b16 %v378_v22  ;;  %v772_v22 = vsel %vm767_vm3, %v4800_v56, %v4837_v5 }
 0x1f6   : > { %7655 = vst [vmem:[#allocation75_spill] sm:$0xff] %v5036_v55  ;;  %v5038_v47 = vpop.permute.xlu0 %1071  ;;  %v5040_v53 = vpop.permute.xlu2 %1096 }
 0x1f7   : > { %v631_v17 = vpack.c.b16 %v613_v3, %v610_v41  ;;  %v630_v55 = vpack.c.b16 %v612_v44, %v609_v1 }
 0x1fb   : > { %1402 = vrot.lane.b32.xlu1 %v4800_v56, %s4005_s24  ;;  %v770_v56 = vsel %vm767_vm3, %v4779_v33, %v4828_v32 }
 0x1fc   : > { %1356 = vrot.lane.b32.xlu0 %v634_v21, %s4005_s24  ;;  %1354 = vrot.lane.b32.xlu2 %v633_v61, %s4005_s24  ;;  %v374_v21 = vsel %vm4391_vm1, %v333_v39, 0  ;;  %v376_v61 = vsel %vm4391_vm1, %v335_v0, 0  ;;  %vm990_vm1 = vcmask 900096  }
 0x1fd   : > { %v1089_v30 = vpop.permute.xlu1 %1088  ;;  %v606_v41 = vunpack.c.l.b16 %v376_v61  ;;  %v604_v0 = vunpack.c.h.b16 %v374_v21 }
 0x1fe   : > { %v5052_v29 = vpop.permute.xlu0 %1086  ;;  %v1103_v54 = vpop.permute.xlu2 %1102 }
 0x1ff   : > { %v5056_v4 = vsel %vm1108_vm10, %v5052_v29, %v1089_v30  ;;  %v603_v30 = vunpack.c.l.b16 %v374_v21 }
 0x201   : > { %v627_v51 = vpack.c.b16 %v606_v41, %v603_v30  ;;  %v768_v30 = vsel %vm767_vm3, %v4758_v50, %v4819_v10 }
 0x203   : > { %1350 = vrot.lane.b32.xlu1 %v631_v17, %s4005_s24 }
 0x204   : > { %1404 = vrot.lane.b32.xlu2 %v772_v22, %s4005_s24  ;;  %1348 = vrot.lane.b32.xlu0 %v630_v55, %s4005_s24  ;;  %v607_v22 = vunpack.c.h.b16 %v376_v61  ;;  %v997_v61 = vsel %vm990_vm1, %v4924_v16, %v4968_v7 }
 0x205   : > { %v1095_v60 = vpop.permute.xlu1 %1094 }
 0x206   : > { %v1093_v3 = vpop.permute.xlu0 %1092  ;;  %v5070_v1 = vpop.permute.xlu2 %1169  ;;  %v628_v41 = vpack.c.b16 %v607_v22, %v604_v0 }
 0x207   : > { %v5073_v44 = vsel %vm1108_vm10, %v1093_v3, %v1095_v60 }
 0x20b   : > { %1342 = vrot.lane.b32.xlu1 %v627_v51, %s4005_s24 }
 0x20c   : > { %1396 = vrot.lane.b32.xlu2 %v4779_v33, %s4005_s24  ;;  %1398 = vrot.lane.b32.xlu0 %v770_v56, %s4005_s24 }
 0x20d   : > { %v1101_v17 = vpop.permute.xlu1 %1100 }
 0x20e   : > { %v1099_v55 = vpop.permute.xlu0 %1098  ;;  %v5082_v39 = vpop.permute.xlu2 %1175 }
 0x20f   : > { %v5085_v60 = vsel %vm1108_vm10, %v1099_v55, %v1101_v17 }
 0x213   : > { %1392 = vrot.lane.b32.xlu1 %v768_v30, %s4005_s24  ;;  %v995_v30 = vsel %vm990_vm1, %v4914_v11, %v4952_v62 }
 0x214   : > { %1390 = vrot.lane.b32.xlu0 %v4758_v50, %s4005_s24  ;;  %1344 = vrot.lane.b32.xlu2 %v628_v41, %s4005_s24 }
 0x215   : > { %v1107_v33 = vpop.permute.xlu1 %1106 }
 0x216   : > { %v1105_v51 = vpop.permute.xlu0 %1104  ;;  %v5094_v56 = vpop.permute.xlu2 %1181 }
 0x217   : > { %v5097_v21 = vsel %vm1108_vm10, %v1105_v51, %v1107_v33  ;;  %v1115_v41 = vsel %vm1108_vm10, %v1103_v54, %v1105_v51 }
 0x21b   : > { %1528 = vrot.lane.b32.xlu1 %v1103_v54, %s4005_s24 }
 0x21c   : > { %1482 = vrot.lane.b32.xlu0 %v997_v61, %s4005_s24  ;;  %1480 = vrot.lane.b32.xlu2 %v4924_v16, %s4005_s24 }
 0x21d   : > { %v1174_v50 = vpop.permute.xlu1 %1173 }
 0x21e   : > { %v5106_v17 = vpop.permute.xlu0 %1171  ;;  %v5108_v0 = vpop.permute.xlu2 %1386 }
 0x21f   : > { %v5112_v22 = vsel %vm1193_vm8, %v5106_v17, %v1174_v50 }
 0x223   : > { %1476 = vrot.lane.b32.xlu1 %v995_v30, %s4005_s24  ;;  %v1113_v30 = vsel %vm1108_vm10, %v5040_v53, %v1099_v55  ;;  %v993_v55 = vsel %vm990_vm1, %v4899_v8, %v4938_v25 }
 0x224   : > { %1474 = vrot.lane.b32.xlu0 %v4914_v11, %s4005_s24  ;;  %1530 = vrot.lane.b32.xlu2 %v1115_v41, %s4005_s24 }
 0x225   : > { %v1180_v16 = vpop.permute.xlu1 %1179 }
 0x226   : > { %v5122_v33 = vpop.permute.xlu0 %1177  ;;  %v1379_v61 = vpop.permute.xlu2 %1378 }
 0x227   : > { %v5126_v50 = vsel %vm1193_vm8, %v5122_v33, %v1180_v16  ;;  %v1111_v16 = vsel %vm1108_vm10, %v5021_v57, %v1093_v3  ;;  %v991_v3 = vsel %vm990_vm1, %v4878_v37, %v4922_v59 }
 0x22b   : > { %1468 = vrot.lane.b32.xlu1 %v4899_v8, %s4005_s24 }
 0x22c   : > { %1524 = vrot.lane.b32.xlu0 %v1113_v30, %s4005_s24  ;;  %1522 = vrot.lane.b32.xlu2 %v5040_v53, %s4005_s24 }
 0x22d   : > { %v1385_v11 = vpop.permute.xlu1 %1384 }
 0x22e   : > { %v5135_v54 = vpop.permute.xlu0 %1183  ;;  %v5137_v51 = vpop.permute.xlu2 %1428  ;;  %v1572_v41 = vsel %vm7657_vm4, %v1385_v11, %v5108_v0  ;;  %vm1075_vm4 = vcmask 785408  }
 0x22f   : > { %7656 = vst [vmem:[#allocation76_spill] sm:$0xff] %v5137_v51  ;;  %1715 = vmatpush.bf16.msra.mxu0 %v1572_v41  ;;  %3864 = vmatpush.bf16.msra.mxu2 %v1572_v41 }
 0x233   : > { %1518 = vrot.lane.b32.xlu1 %v1111_v16, %s4005_s24 }
 0x234   : > { %1516 = vrot.lane.b32.xlu0 %v5021_v57, %s4005_s24  ;;  %1470 = vrot.lane.b32.xlu2 %v993_v55, %s4005_s24 }
 0x235   : > { %v5150_v53 = vpop.permute.xlu1 %1434 }
 0x236   : > { %v1433_v30 = vpop.permute.xlu0 %1432  ;;  %v1421_v11 = vpop.permute.xlu2 %1420 }
 0x237   : > { %v1588_v41 = vsel %vm7658_vm2, %v1433_v30, %v5150_v53 }
 0x238   : > { %1744 = vmatpush.bf16.msra.mxu1 %v1588_v41  ;;  %3872 = vmatpush.bf16.msra.mxu3 %v1588_v41 }
 0x23b   : > { %1464 = vrot.lane.b32.xlu1 %v991_v3, %s4005_s24 }
 0x23c   : > { %1462 = vrot.lane.b32.xlu0 %v4878_v37, %s4005_s24  ;;  %1388 = vrot.lane.b32.xlu2 %v4695_v42, %s4005_s24  ;;  %v1109_v42 = vsel %vm1108_vm10, %v5012_v15, %v5052_v29  ;;  %vm7664_vm10 = vmmov %vm7658_vm2 }
 0x23d   : > { %v1427_v57 = vpop.permute.xlu1 %1426 }
 0x23e   : > { %v5162_v8 = vpop.permute.xlu0 %1380  ;;  %v5164_v16 = vpop.permute.xlu2 %1368  ;;  %v1586_v55 = vsel %vm7659_vm15, %v1427_v57, %v5137_v51  ;;  %vm7667_vm15 = vmmov %vm7658_vm2 }
 0x23f   : > { %1745 = vmatpush.bf16.msra.mxu1 %v1586_v55  ;;  %3873 = vmatpush.bf16.msra.mxu3 %v1586_v55  ;;  %v1570_v30 = vsel %vm7660_vm14, %v1379_v61, %v5162_v8  ;;  %vm7669_vm14 = vmmov %vm7658_vm2 }
 0x240   : > { %1716 = vmatpush.bf16.msra.mxu0 %v1570_v30  ;;  %3865 = vmatpush.bf16.msra.mxu2 %v1570_v30 }
 0x243   : > { %1382 = vrot.lane.b32.xlu1 %v4638_v18, %s4005_s24  ;;  %v912_v18 = vsel %vm905_vm9, %v4737_v45, %v4798_v26 }
 0x244   : > { %1512 = vrot.lane.b32.xlu0 %v1109_v42, %s4005_s24  ;;  %1510 = vrot.lane.b32.xlu2 %v5012_v15, %s4005_s24 }
 0x245   : > { %v5178_v37 = vpop.permute.xlu1 %1374 }
 0x246   : > { %v1373_v41 = vpop.permute.xlu0 %1372  ;;  %v1361_v3 = vpop.permute.xlu2 %1360 }
 0x247   : > { %v1568_v61 = vsel %vm7661_vm12, %v1373_v41, %v5178_v37  ;;  %vm7671_vm12 = vmmov %vm7658_vm2 }
 0x248   : > { %1717 = vmatpush.bf16.msra.mxu0 %v1568_v61  ;;  %3866 = vmatpush.bf16.msra.mxu2 %v1568_v61 }
 0x24b   : > { %1504 = vrot.lane.b32.xlu1 %v4984_v9, %s4005_s24 }
 0x24c   : > { %1458 = vrot.lane.b32.xlu0 %v912_v18, %s4005_s24  ;;  %1456 = vrot.lane.b32.xlu2 %v4737_v45, %s4005_s24  ;;  %v1082_v45 = vsel %vm1075_vm4, %v4984_v9, %v5038_v47  ;;  %v1080_v18 = vsel %vm1075_vm4, %v4970_v40, %v5019_v24 }
 0x24d   : > { %v1367_v15 = vpop.permute.xlu1 %1366 }
 0x24e   : > { %v5190_v29 = vpop.permute.xlu0 %1422  ;;  %v5192_v57 = vpop.permute.xlu2 %1189  ;;  %v1566_v55 = vsel %vm7663_vm13, %v1367_v15, %v5164_v16  ;;  %vm7672_vm13 = vmmov %vm7658_vm2 }
 0x24f   : > { %7662 = vst [vmem:[#allocation77_spill] sm:$0xff] %v5190_v29  ;;  %1718 = vmatpush.bf16.msra.mxu0 %v1566_v55  ;;  %3867 = vmatpush.bf16.msra.mxu2 %v1566_v55  ;;  %v1584_v30 = vsel %vm7664_vm10, %v1421_v11, %v5190_v29  ;;  %vm7674_vm10 = vmmov %vm7658_vm2 }
 0x250   : > { %1746 = vmatpush.bf16.msra.mxu1 %v1584_v30  ;;  %3874 = vmatpush.bf16.msra.mxu3 %v1584_v30 }
 0x253   : > { %1450 = vrot.lane.b32.xlu1 %v4701_v34, %s4005_s24 }
 0x254   : > { %1376 = vrot.lane.b32.xlu0 %v4676_v52, %s4005_s24  ;;  %1506 = vrot.lane.b32.xlu2 %v1082_v45, %s4005_s24  ;;  %v910_v52 = vsel %vm905_vm9, %v4701_v34, %v4775_v38  ;;  %v908_v34 = vsel %vm905_vm9, %v4680_v49, %v4741_v43 }
 0x255   : > { %v5206_v42 = vpop.permute.xlu1 %1416 }
 0x256   : > { %7665 = vst [vmem:[#allocation78_spill] sm:$0xff] %v5206_v42  ;;  %v1415_v41 = vpop.permute.xlu0 %1414  ;;  %v1355_v61 = vpop.permute.xlu2 %1354 }
 0x257   : > { %v1582_v11 = vsel %vm7658_vm2, %v1415_v41, %v5206_v42 }
 0x258   : > { %1747 = vmatpush.bf16.msra.mxu1 %v1582_v11  ;;  %3875 = vmatpush.bf16.msra.mxu3 %v1582_v11  ;;  %v346_v11 = vld [vmem:[%s4298_s27 + $0x80] sm:$0xf] }
 0x25b   : > { %1500 = vrot.lane.b32.xlu1 %v1080_v18, %s4005_s24  ;;  %v348_v18 = vld [vmem:[%s4298_s27 + $0x94] sm:$0xf] }
 0x25c   : > { %1498 = vrot.lane.b32.xlu0 %v4970_v40, %s4005_s24  ;;  %1452 = vrot.lane.b32.xlu2 %v910_v52, %s4005_s24 }
 0x25d   : > { %v1188_v9 = vpop.permute.xlu1 %1187 }
 0x25e   : > { %v5220_v15 = vpop.permute.xlu0 %1362  ;;  %v5222_v55 = vpop.permute.xlu2 %1404 }
 0x25f   : > { %7666 = vst [vmem:[#allocation79_spill] sm:$0xff] %v5222_v55  ;;  %v1564_v30 = vsel %vm7667_vm15, %v1361_v3, %v5220_v15  ;;  %vm7677_vm15 = vmmov %vm7658_vm2 }
 0x260   : > { %1719 = vmatpush.bf16.msra.mxu0 %v1564_v30  ;;  %3868 = vmatpush.bf16.msra.mxu2 %v1564_v30  ;;  %v389_v30 = vsel %vm4387_vm0, %v348_v18, 0  ;;  %v1200_v18 = vsel %vm1193_vm8, %v1188_v9, %v5192_v57 }
 0x261   : > { %v626_v29 = vunpack.c.l.b16 %v389_v30 }
 0x263   : > { %1446 = vrot.lane.b32.xlu1 %v908_v34, %s4005_s24 }
 0x264   : > { %1444 = vrot.lane.b32.xlu0 %v4680_v49, %s4005_s24  ;;  %1370 = vrot.lane.b32.xlu2 %v4640_v23, %s4005_s24  ;;  %v1078_v49 = vsel %vm1075_vm4, %v4954_v46, %v5010_v12  ;;  %v387_v23 = vsel %vm4387_vm0, %v346_v11, 0 }
 0x265   : > { %v5234_v40 = vpop.permute.xlu1 %1410  ;;  %v623_v42 = vunpack.c.l.b16 %v387_v23 }
 0x266   : > { %7668 = vst [vmem:[#allocation80_spill] sm:$0xff] %v5234_v40  ;;  %v1409_v45 = vpop.permute.xlu0 %1408  ;;  %v1397_v41 = vpop.permute.xlu2 %1396 }
 0x267   : > { %v1580_v3 = vsel %vm7669_vm14, %v1409_v45, %v5234_v40  ;;  %vm7678_vm14 = vmmov %vm7658_vm2 }
 0x268   : > { %1748 = vmatpush.bf16.msra.mxu1 %v1580_v3  ;;  %3876 = vmatpush.bf16.msra.mxu3 %v1580_v3 }
 0x26b   : > { %1552 = vrot.lane.b32.xlu1 %v1188_v9, %s4005_s24 }
 0x26c   : > { %1494 = vrot.lane.b32.xlu0 %v1078_v49, %s4005_s24  ;;  %1492 = vrot.lane.b32.xlu2 %v4954_v46, %s4005_s24  ;;  %v638_v46 = vpack.c.b16 %v626_v29, %v623_v42  ;;  %v7673_v49 = vld [vmem:[#allocation59_spill] sm:$0xff]  ;;  %v1076_v29 = vsel %vm1075_vm4, %v4940_v20, %v4982_v14 }
 0x26d   : > { %v1403_v34 = vpop.permute.xlu1 %1402  ;;  %v340_v14 = vld [vmem:[%s4298_s27 + $0x44] sm:$0xf] }
 0x26e   : > { %v5251_v45 = vpop.permute.xlu0 %1356  ;;  %v5253_v3 = vpop.permute.xlu2 %1344  ;;  %v1578_v40 = vsel %vm7671_vm12, %v1403_v34, %v5222_v55  ;;  %v342_v34 = vld [vmem:[%s4298_s27 + $0x58] sm:$0xf] }
 0x26f   : > { %1749 = vmatpush.bf16.msra.mxu1 %v1578_v40  ;;  %3877 = vmatpush.bf16.msra.mxu3 %v1578_v40  ;;  %v1562_v11 = vsel %vm7672_vm13, %v1355_v61, %v5251_v45  ;;  %v383_v42 = vsel %vm4387_vm0, %v342_v34, 0 }
 0x270   : > { %1720 = vmatpush.bf16.msra.mxu0 %v1562_v11  ;;  %3869 = vmatpush.bf16.msra.mxu2 %v1562_v11  ;;  %v344_v11 = vld [vmem:[%s4298_s27 + $0x6c] sm:$0xf] }
 0x271   : > { %v385_v9 = vsel %vm4387_vm0, %v344_v11, 0 }
 0x272   : > { %v620_v55 = vunpack.c.l.b16 %v385_v9  ;;  %v381_v9 = vsel %vm4387_vm0, %v340_v14, 0 }
 0x273   : > { %1438 = vrot.lane.b32.xlu1 %v7673_v49, %s4005_s24 }
 0x274   : > { %1364 = vrot.lane.b32.xlu0 %v638_v46, %s4005_s24  ;;  %1554 = vrot.lane.b32.xlu2 %v1200_v18, %s4005_s24  ;;  %v7675_v46 = vld [vmem:[#allocation61_spill] sm:$0xff] }
 0x275   : > { %v5265_v23 = vpop.permute.xlu1 %1350  ;;  %v906_v18 = vsel %vm905_vm9, %v7673_v49, %v7675_v46 }
 0x276   : > { %v1349_v30 = vpop.permute.xlu0 %1348  ;;  %v1481_v40 = vpop.permute.xlu2 %1480 }
 0x277   : > { %v1560_v61 = vsel %vm7674_vm10, %v1349_v30, %v5265_v23 }
 0x278   : > { %1721 = vmatpush.bf16.msra.mxu0 %v1560_v61  ;;  %3870 = vmatpush.bf16.msra.mxu2 %v1560_v61  ;;  %v617_v61 = vunpack.c.l.b16 %v383_v42 }
 0x27b   : > { %1488 = vrot.lane.b32.xlu1 %v1076_v29, %s4005_s24  ;;  %v338_v29 = vld [vmem:[%s4298_s27 + $0x30] sm:$0xf] }
 0x27c   : > { %1486 = vrot.lane.b32.xlu0 %v4940_v20, %s4005_s24  ;;  %1440 = vrot.lane.b32.xlu2 %v906_v18, %s4005_s24  ;;  %v635_v20 = vpack.c.b16 %v620_v55, %v617_v61  ;;  %v379_v42 = vsel %vm4387_vm0, %v338_v29, 0  ;;  %v1198_v18 = vsel %vm1193_vm8, %v5094_v56, %v5135_v54  ;;  %v336_v29 = vld [vmem:[%s4298_s27 + $0x1c] sm:$0xf] }
 0x27d   : > { %v1343_v30 = vpop.permute.xlu1 %1342  ;;  %v611_v55 = vunpack.c.l.b16 %v379_v42  ;;  %v1196_v42 = vsel %vm1193_vm8, %v5082_v39, %v5122_v33 }
 0x27e   : > { %v5285_v51 = vpop.permute.xlu0 %1398  ;;  %v5287_v34 = vpop.permute.xlu2 %1530  ;;  %v1558_v11 = vsel %vm7658_vm2, %v1343_v30, %v5253_v3  ;;  %v614_v30 = vunpack.c.l.b16 %v381_v9 }
 0x27f   : > { %7676 = vst [vmem:[#allocation58_spill] sm:$0xff] %v5285_v51  ;;  %1722 = vmatpush.bf16.msra.mxu0 %v1558_v11  ;;  %3871 = vmatpush.bf16.msra.mxu2 %v1558_v11  ;;  %v1576_v49 = vsel %vm7677_vm15, %v1397_v41, %v5285_v51 }
 0x280   : > { %1750 = vmatpush.bf16.msra.mxu1 %v1576_v49  ;;  %3878 = vmatpush.bf16.msra.mxu3 %v1576_v49  ;;  %v334_v49 = vld [vmem:[%s4298_s27 + $0x8] sm:$0xf]  ;;  %v632_v51 = vpack.c.b16 %v614_v30, %v611_v55 }
 0x283   : > { %1358 = vrot.lane.b32.xlu1 %v635_v20, %s4005_s24  ;;  %v375_v20 = vsel %vm4387_vm0, %v334_v49, 0  ;;  %v1194_v49 = vsel %vm1193_vm8, %v5070_v1, %v5106_v17 }
 0x284   : > { %1548 = vrot.lane.b32.xlu0 %v1198_v18, %s4005_s24  ;;  %1546 = vrot.lane.b32.xlu2 %v5094_v56, %s4005_s24  ;;  %v377_v56 = vsel %vm4387_vm0, %v336_v29, 0  ;;  %v605_v18 = vunpack.c.l.b16 %v375_v20  ;;  %vm7679_vm0 = vmmov %vm7658_vm2  ;;  %v3955_v29 = vld [vmem:[%s4298_s27 + $0x70] sm:$0xf] }
 0x285   : > { %v5306_v41 = vpop.permute.xlu1 %1392  ;;  %v608_v55 = vunpack.c.l.b16 %v377_v56  ;;  %vm7680_vm12 = vmmov %vm7679_vm0  ;;  %v582_v20 = vsel %vm4572_vm7, %v3955_v29, 0  ;;  %v3956_v56 = vld [vmem:[%s4298_s27 + $0x84] sm:$0xf] }
 0x286   : > { %v1391_v61 = vpop.permute.xlu0 %1390  ;;  %v1523_v11 = vpop.permute.xlu2 %1522  ;;  %vm7681_vm13 = vmmov %vm7679_vm0 }
 0x287   : > { %v1574_v14 = vsel %vm7678_vm14, %v1391_v61, %v5306_v41  ;;  %v629_v61 = vpack.c.b16 %v608_v55, %v605_v18  ;;  %vm7682_vm10 = vmmov %vm7679_vm0 }
 0x288   : > { %1751 = vmatpush.bf16.msra.mxu1 %v1574_v14  ;;  %3879 = vmatpush.bf16.msra.mxu3 %v1574_v14  ;;  %v3954_v14 = vld [vmem:[%s4298_s27 + $0x5c] sm:$0xf]  ;;  %vm7684_vm2 = vmmov %vm7679_vm0 }
 0x289   : > { %vm7685_vm15 = vmmov %vm7679_vm0 }
 0x28a   : > { %vm7686_vm14 = vmmov %vm7679_vm0 }
 0x28b   : > { %1352 = vrot.lane.b32.xlu1 %v632_v51, %s4005_s24 }
 0x28c   : > { %1542 = vrot.lane.b32.xlu0 %v1196_v42, %s4005_s24  ;;  %1540 = vrot.lane.b32.xlu2 %v5082_v39, %s4005_s24  ;;  %v580_v39 = vsel %vm4572_vm7, %v3954_v14, 0  ;;  %v3957_v42 = vld [vmem:[%s4298_s27 + $0x98] sm:$0xf] }
 0x28d   : > { %v1529_v9 = vpop.permute.xlu1 %1528 }
 0x28e   : > { %v5323_v52 = vpop.permute.xlu0 %1482  ;;  %v5325_v30 = vpop.permute.xlu2 %1470  ;;  %v1620_v33 = vsel %vm7679_vm0, %v1529_v9, %v5287_v34  ;;  %v586_v9 = vsel %vm4572_vm7, %v3957_v42, 0 }
 0x28f   : > { %1802 = vmatpush.bf16.msrb.mxu3 %v1620_v33  ;;  %v1604_v51 = vsel %vm7680_vm12, %v1481_v40, %v5323_v52  ;;  %v584_v40 = vsel %vm4572_vm7, %v3956_v56, 0  ;;  %v1147_v33 = vunpack.c.l.b16 %v580_v39  ;;  %v1156_v14 = vunpack.c.l.b16 %v586_v9  ;;  %vm7683_vm7 = vmmov %vm7679_vm0 }
 0x290   : > { %1773 = vmatpush.bf16.msrb.mxu2 %v1604_v51  ;;  %v1150_v51 = vunpack.c.l.b16 %v582_v20  ;;  %v998_v9 = vsel %vm990_vm1, %v4968_v7, %v4966_v27  ;;  %vm7689_vm12 = vmmov %vm7679_vm0 }
 0x293   : > { %1346 = vrot.lane.b32.xlu1 %v629_v61, %s4005_s24  ;;  %v1153_v61 = vunpack.c.l.b16 %v584_v40 }
 0x294   : > { %1536 = vrot.lane.b32.xlu0 %v1194_v49, %s4005_s24  ;;  %1534 = vrot.lane.b32.xlu2 %v5070_v1, %s4005_s24  ;;  %v860_v1 = vsel %vm852_vm11, %v4912_v13, %v4910_v35  ;;  %v1165_v49 = vpack.c.b16 %v1150_v51, %v1147_v33  ;;  %v996_v35 = vsel %vm990_vm1, %v4952_v62, %v4950_v2 }
 0x295   : > { %v5350_v17 = vpop.permute.xlu1 %1476  ;;  %v1168_v56 = vpack.c.b16 %v1156_v14, %v1153_v61  ;;  %v858_v13 = vsel %vm852_vm11, %v4897_v6, %v4895_v36  ;;  %v994_v36 = vsel %vm990_vm1, %v4938_v25, %v4936_v58  ;;  %v856_v6 = vsel %vm852_vm11, %v4876_v28, %v4874_v63  ;;  %v7687_v28 = vld [vmem:[#allocation69_spill] sm:$0xff]  ;;  %v7688_v58 = vld [vmem:[#allocation70_spill] sm:$0xff] }
 0x296   : > { %v1475_v18 = vpop.permute.xlu0 %1474  ;;  %v1389_v55 = vpop.permute.xlu2 %1388  ;;  %v992_v63 = vsel %vm990_vm1, %v4922_v59, %v4920_v31  ;;  %v854_v25 = vsel %vm852_vm11, %v7688_v58, %v7687_v28  ;;  %v7690_v59 = vld [vmem:[#allocation64_spill] sm:$0xff]  ;;  %vm7692_vm11 = vmmov %vm7679_vm0 }
 0x297   : > { %v1602_v29 = vsel %vm7681_vm13, %v1475_v18, %v5350_v17  ;;  %v1573_v19 = vsel %vm7682_vm10, %v5108_v0, %v1389_v55  ;;  %v913_v14 = vsel %vm905_vm9, %v4798_v26, %v7690_v59  ;;  %vm7693_vm1 = vmmov %vm7679_vm0 }
 0x298   : > { %1774 = vmatpush.bf16.msrb.mxu2 %v1602_v29  ;;  %1860 = vmatpush.bf16.msrb.mxu1 %v1573_v19  ;;  %v7691_v29 = vld [vmem:[#allocation68_spill] sm:$0xff]  ;;  %vm7696_vm13 = vmmov %vm7679_vm0 }
 0x299   : > { %v775_v19 = vsel %vm767_vm3, %v4846_v48, %v7691_v29  ;;  %vm7697_vm10 = vmmov %vm7679_vm0 }
 0x29b   : > { %1436 = vrot.lane.b32.xlu1 %v860_v1, %s4005_s24 }
 0x29c   : > { %1185 = vrot.lane.b32.xlu0 %v1165_v49, %s4014_s11  ;;  %1191 = vrot.lane.b32.xlu2 %v1168_v56, %s4014_s11 }
 0x29d   : > { %v1469_v39 = vpop.permute.xlu1 %1468 }
 0x29e   : > { %v5362_v20 = vpop.permute.xlu0 %1524  ;;  %v1511_v40 = vpop.permute.xlu2 %1510  ;;  %v1600_v0 = vsel %vm7683_vm7, %v1469_v39, %v5325_v30  ;;  %v7695_v39 = vld [vmem:[#allocation67_spill] sm:$0xff]  ;;  %vm7701_vm7 = vmmov %vm7679_vm0 }
 0x29f   : > { %1775 = vmatpush.bf16.msrb.mxu2 %v1600_v0  ;;  %v1618_v42 = vsel %vm7684_vm2, %v1523_v11, %v5362_v20  ;;  %vm7702_vm2 = vmmov %vm7679_vm0 }
 0x2a0   : > { %1803 = vmatpush.bf16.msrb.mxu3 %v1618_v42 }
 0x2a3   : > { %1478 = vrot.lane.b32.xlu1 %v996_v35, %s4005_s24 }
 0x2a4   : > { %1430 = vrot.lane.b32.xlu0 %v858_v13, %s4005_s24  ;;  %1484 = vrot.lane.b32.xlu2 %v998_v9, %s4005_s24 }
 0x2a5   : > { %v5380_v11 = vpop.permute.xlu1 %1518 }
 0x2a6   : > { %v1517_v18 = vpop.permute.xlu0 %1516  ;;  %v1457_v55 = vpop.permute.xlu2 %1456 }
 0x2a7   : > { %v1616_v2 = vsel %vm7685_vm15, %v1517_v18, %v5380_v11  ;;  %vm7705_vm15 = vmmov %vm7679_vm0 }
 0x2a8   : > { %1804 = vmatpush.bf16.msrb.mxu3 %v1616_v2 }
 0x2ab   : > { %1532 = vrot.lane.b32.xlu1 %v5097_v21, %s4005_s24 }
 0x2ac   : > { %1472 = vrot.lane.b32.xlu0 %v994_v36, %s4005_s24  ;;  %1424 = vrot.lane.b32.xlu2 %v856_v6, %s4005_s24 }
 0x2ad   : > { %v5394_v62 = vpop.permute.xlu1 %1464 }
 0x2ae   : > { %v1463_v27 = vpop.permute.xlu0 %1462  ;;  %v5396_v7 = vpop.permute.xlu2 %1506 }
 0x2af   : > { %v1598_v21 = vsel %vm7686_vm14, %v1463_v27, %v5394_v62  ;;  %v7703_v27 = vld [vmem:[#allocation60_spill] sm:$0xff]  ;;  %vm7714_vm14 = vmmov %vm7679_vm0 }
 0x2b0   : > { %1776 = vmatpush.bf16.msrb.mxu2 %v1598_v21  ;;  %v7704_v21 = vld [vmem:[#allocation65_spill] sm:$0xff] }
 0x2b3   : > { %1526 = vrot.lane.b32.xlu1 %v5085_v60, %s4005_s24 }
 0x2b4   : > { %1466 = vrot.lane.b32.xlu0 %v992_v63, %s4005_s24  ;;  %1418 = vrot.lane.b32.xlu2 %v854_v25, %s4005_s24 }
 0x2b5   : > { %v1383_v33 = vpop.permute.xlu1 %1382 }
 0x2b6   : > { %v5410_v51 = vpop.permute.xlu0 %1512  ;;  %v5412_v61 = vpop.permute.xlu2 %1452  ;;  %v1571_v60 = vsel %vm7679_vm0, %v5162_v8, %v1383_v33  ;;  %v7706_v33 = vld [vmem:[#allocation73_spill] sm:$0xff] }
 0x2b7   : > { %1861 = vmatpush.bf16.msrb.mxu1 %v1571_v60  ;;  %v1614_v31 = vsel %vm7689_vm12, %v1511_v40, %v5410_v51  ;;  %v773_v40 = vsel %vm767_vm3, %v4837_v5, %v7695_v39  ;;  %v7699_v5 = vld [vmem:[#allocation62_spill] sm:$0xff]  ;;  %vm7717_vm12 = vmmov %vm7679_vm0 }
 0x2b8   : > { %1805 = vmatpush.bf16.msrb.mxu3 %v1614_v31  ;;  %v909_v18 = vsel %vm905_vm9, %v4741_v43, %v7699_v5  ;;  %v7707_v60 = vld [vmem:[#allocation74_spill] sm:$0xff] }
 0x2bb   : > { %1520 = vrot.lane.b32.xlu1 %v5073_v44, %s4005_s24  ;;  %v7694_v44 = vld [vmem:[#allocation63_spill] sm:$0xff] }
 0x2bc   : > { %1460 = vrot.lane.b32.xlu0 %v913_v14, %s4005_s24  ;;  %1412 = vrot.lane.b32.xlu2 %v775_v19, %s4005_s24  ;;  %v911_v48 = vsel %vm905_vm9, %v4775_v38, %v7694_v44 }
 0x2bd   : > { %v1505_v8 = vpop.permute.xlu1 %1504 }
 0x2be   : > { %v5428_v1 = vpop.permute.xlu0 %1458  ;;  %v1371_v49 = vpop.permute.xlu2 %1370  ;;  %v1612_v56 = vsel %vm7692_vm11, %v1505_v8, %v5396_v7  ;;  %v7711_v8 = vld [vmem:[#allocation29_spill] sm:$0xff]  ;;  %vm7724_vm11 = vmmov %vm7679_vm0 }
 0x2bf   : > { %1806 = vmatpush.bf16.msrb.mxu3 %v1612_v56  ;;  %v1596_v26 = vsel %vm7693_vm1, %v1457_v55, %v5428_v1  ;;  %v7700_v55 = vld [vmem:[#allocation66_spill] sm:$0xff]  ;;  %vm7727_vm1 = vmmov %vm7679_vm0 }
 0x2c0   : > { %1777 = vmatpush.bf16.msrb.mxu2 %v1596_v26  ;;  %v771_v2 = vsel %vm767_vm3, %v4828_v32, %v7700_v55  ;;  %v907_v32 = vsel %vm905_vm9, %v7675_v46, %v7703_v27  ;;  %v1079_v46 = vsel %vm1075_vm4, %v5010_v12, %v7706_v33  ;;  %vm7709_vm9 = vmmov %vm7679_vm0  ;;  %v7710_v12 = vld [vmem:[#allocation34_spill] sm:$0xff]  ;;  %v7721_v55 = vld [vmem:[#allocation45_spill] sm:$0xff] }
 0x2c1   : > { %v7712_v56 = vld [vmem:[#allocation30_spill] sm:$0xff] }
 0x2c3   : > { %1514 = vrot.lane.b32.xlu1 %v5056_v4, %s4005_s24  ;;  %v7698_v4 = vld [vmem:[#allocation75_spill] sm:$0xff] }
 0x2c4   : > { %1454 = vrot.lane.b32.xlu0 %v911_v48, %s4005_s24  ;;  %1406 = vrot.lane.b32.xlu2 %v773_v40, %s4005_s24  ;;  %v1083_v9 = vsel %vm1075_vm4, %v5038_v47, %v7698_v4  ;;  %v7718_v4 = vld [vmem:[#allocation8_spill] sm:$0xff] }
 0x2c5   : > { %v1451_v0 = vpop.permute.xlu1 %1450 }
 0x2c6   : > { %v1377_v42 = vpop.permute.xlu0 %1376  ;;  %v1493_v35 = vpop.permute.xlu2 %1492  ;;  %v1594_v13 = vsel %vm7696_vm13, %v1451_v0, %v5412_v61  ;;  %vm7730_vm13 = vmmov %vm7679_vm0 }
 0x2c7   : > { %1778 = vmatpush.bf16.msrb.mxu2 %v1594_v13  ;;  %v1569_v38 = vsel %vm7697_vm10, %v5178_v37, %v1377_v42  ;;  %v1567_v37 = vsel %vm7701_vm7, %v5164_v16, %v1371_v49  ;;  %v769_v16 = vsel %vm767_vm3, %v4819_v10, %v7704_v21  ;;  %v1081_v10 = vsel %vm1075_vm4, %v5019_v24, %v7707_v60  ;;  %vm7708_vm3 = vmmov %vm7679_vm0  ;;  %v7713_v24 = vld [vmem:[#allocation35_spill] sm:$0xff]  ;;  %v7715_v42 = vld [vmem:[#allocation5_spill] sm:$0xff] }
 0x2c8   : > { %1862 = vmatpush.bf16.msrb.mxu1 %v1569_v38  ;;  %v5498_v49 = vor.u32 %v7711_v8, %v7710_v12  ;;  %v5502_v26 = vor.u32 %v7713_v24, %v7712_v56  ;;  %v7725_v21 = vld [vmem:[#allocation44_spill] sm:$0xff]  ;;  %v7729_v60 = vld [vmem:[#allocation51_spill] sm:$0xff]  ;;  %vm7733_vm10 = vmmov %vm7679_vm0 }
 0x2c9   : > { %vm7734_vm7 = vmmov %vm7679_vm0  ;;  %v7735_v56 = vld [vmem:[#allocation11_spill] sm:$0xff]  ;;  %v7736_v24 = vld [vmem:[#allocation17_spill] sm:$0xff] }
 0x2ca   : > { %1762 = vmatmul.bf16.vlgmr.msra.gmra.mxu3 %v5498_v49  ;;  %1733 = vmatmul.bf16.vlgmr.msra.gmra.mxu2 %v5502_v26 }
 0x2cb   : > { %1508 = vrot.lane.b32.xlu1 %v1083_v9, %s4005_s24  ;;  %v7719_v9 = vld [vmem:[#allocation15_spill] sm:$0xff] }
 0x2cc   : > { %1448 = vrot.lane.b32.xlu0 %v909_v18, %s4005_s24  ;;  %1400 = vrot.lane.b32.xlu2 %v771_v2, %s4005_s24  ;;  %v5522_v5 = vor.u32 %v7719_v9, %v7718_v4  ;;  %v7720_v18 = vld [vmem:[#allocation40_spill] sm:$0xff]  ;;  %v7722_v2 = vld [vmem:[#allocation50_spill] sm:$0xff] }
 0x2cd   : > { %1863 = vmatpush.bf16.msrb.mxu1 %v1567_v37  ;;  %v5462_v36 = vpop.permute.xlu1 %1500  ;;  %v7723_v37 = vld [vmem:[#allocation49_spill] sm:$0xff] }
 0x2ce   : > { %v1499_v47 = vpop.permute.xlu0 %1498  ;;  %v5464_v6 = vpop.permute.xlu2 %1554  ;;  %1723 = vmatmul.bf16.vlgmr.msra.gmra.mxu0 %v5522_v5 }
 0x2cf   : > { %v1610_v43 = vsel %vm7702_vm2, %v1499_v47, %v5462_v36  ;;  %vm7737_vm2 = vmmov %vm7679_vm0 }
 0x2d0   : > { %1807 = vmatpush.bf16.msrb.mxu3 %v1610_v43 }
 0x2d3   : > { %1442 = vrot.lane.b32.xlu1 %v907_v32, %s4005_s24 }
 0x2d4   : > { %1394 = vrot.lane.b32.xlu2 %v769_v16, %s4005_s24  ;;  %v7726_v16 = vld [vmem:[#allocation39_spill] sm:$0xff] }
 0x2d5   : > { %v5476_v63 = vpop.permute.xlu1 %1446 }
 0x2d6   : > { %v1445_v28 = vpop.permute.xlu0 %1444  ;;  %v5478_v58 = vpop.permute.xlu2 %1440 }
 0x2d7   : > { %v1592_v25 = vsel %vm7705_vm15, %v1445_v28, %v5476_v63  ;;  %v5538_v28 = vor.u32 %v7726_v16, %v7725_v21  ;;  %vm7740_vm15 = vmmov %vm7679_vm0 }
 0x2d8   : > { %1779 = vmatpush.bf16.msrb.mxu2 %v1592_v25 }
 0x2da   : > { %1767 = vmatmul.bf16.gmra.mxu3 %v5538_v28 }
 0x2db   : > { %1496 = vrot.lane.b32.xlu1 %v1079_v46, %s4005_s24  ;;  %v7728_v46 = vld [vmem:[#allocation53_spill] sm:$0xff] }
 0x2dc   : > { %1502 = vrot.lane.b32.xlu2 %v1081_v10, %s4005_s24 }
 0x2dd   : > { %v1553_v31 = vpop.permute.xlu1 %1552 }
 0x2de   : > { %v5490_v59 = vpop.permute.xlu0 %1494  ;;  %v1547_v14 = vpop.permute.xlu2 %1546  ;;  %v1628_v29 = vsel %vm7708_vm3, %v1553_v31, %v5464_v6  ;;  %vm7741_vm3 = vmmov %vm7679_vm0 }
 0x2df   : > { %1835 = vmatpush.bf16.msrb.mxu0 %v1628_v29  ;;  %v1608_v19 = vsel %vm7709_vm9, %v1493_v35, %v5490_v59  ;;  %v7716_v35 = vld [vmem:[#allocation3_spill] sm:$0xff]  ;;  %v7731_v29 = vld [vmem:[#allocation20_spill] sm:$0xff]  ;;  %vm1702_vm9 = vcmask 523264  }
 0x2e0   : > { %1808 = vmatpush.bf16.msrb.mxu3 %v1608_v19  ;;  %v7732_v19 = vld [vmem:[#allocation25_spill] sm:$0xff] }
 0x2e1   : > { %v5554_v12 = vor.u32 %v7732_v19, %v7731_v29  ;;  %v7753_v29 = vld [vmem:[#allocation76_spill] sm:$0xff] }
 0x2e3   : > { %1538 = vrot.lane.b32.xlu1 %v5112_v22, %s4005_s24  ;;  %1728 = vmatmul.bf16.gmra.mxu0 %v5554_v12 }
 0x2e4   : > { %1544 = vrot.lane.b32.xlu2 %v5126_v50, %s4005_s24 }
 0x2e5   : > { %v1439_v44 = vpop.permute.xlu1 %1438 }
 0x2e6   : > { %v1365_v48 = vpop.permute.xlu0 %1364  ;;  %v1541_v39 = vpop.permute.xlu2 %1540  ;;  %v1590_v40 = vsel %vm7714_vm14, %v1439_v44, %v5478_v58  ;;  %v5562_v44 = vor.u32 %v7736_v24, %v7735_v56  ;;  %vm7754_vm14 = vmmov %vm7679_vm0 }
 0x2e7   : > { %1780 = vmatpush.bf16.msrb.mxu2 %v1590_v40  ;;  %v1565_v0 = vsel %vm7679_vm0, %v5220_v15, %v1365_v48  ;;  %v5526_v15 = vor.u32 %v7721_v55, %v7720_v18  ;;  %v7742_v18 = vld [vmem:[#allocation13_spill] sm:$0xff]  ;;  %v7743_v55 = vld [vmem:[#allocation18_spill] sm:$0xff] }
 0x2e8   : > { %1864 = vmatpush.bf16.msrb.mxu1 %v1565_v0  ;;  %v7738_v0 = vld [vmem:[#allocation16_spill] sm:$0xff] }
 0x2e9   : > { %1738 = vmatmul.bf16.gmra.mxu2 %v5526_v15 }
 0x2eb   : > { %1214 = vperm.xlu1 %3953, %v7715_v42   ;;  %v7739_v42 = vld [vmem:[#allocation10_spill] sm:$0xff] }
 0x2ec   : > { %1204 = vperm.xlu2 %3951, %v7716_v35  }
 0x2ed   : > { %v5516_v13 = vpop.permute.xlu1 %1488 }
 0x2ee   : > { %v1487_v22 = vpop.permute.xlu0 %1486  ;;  %v1535_v38 = vpop.permute.xlu2 %1534 }
 0x2ef   : > { %v1606_v50 = vsel %vm7717_vm12, %v1487_v22, %v5516_v13  ;;  %vm7756_vm12 = vmmov %vm7679_vm0 }
 0x2f0   : > { %1809 = vmatpush.bf16.msrb.mxu3 %v1606_v50 }
 0x2f3   : > { %1224 = vperm.xlu1 %3953, %v7722_v2  }
 0x2f4   : > { %1219 = vperm.xlu2 %3951, %v7723_v37   ;;  %v7745_v37 = vld [vmem:[#allocation7_spill] sm:$0xff] }
 0x2f5   : > { %v1359_v47 = vpop.permute.xlu1 %1358 }
 0x2f6   : > { %v5532_v43 = vpop.permute.xlu0 %1548  ;;  %v1192_v27 = vpop.permute.xlu2 %1191  ;;  %v1563_v32 = vsel %vm7724_vm11, %v5251_v45, %v1359_v47  ;;  %vm7761_vm11 = vmmov %vm7679_vm0 }
 0x2f7   : > { %v1201_v25 = vsel %vm1193_vm8, %v5192_v57, %v1192_v27  ;;  %1865 = vmatpush.bf16.msrb.mxu1 %v1563_v32  ;;  %v1626_v33 = vsel %vm7727_vm1, %v1547_v14, %v5532_v43  ;;  %v7746_v27 = vld [vmem:[#allocation22_spill] sm:$0xff]  ;;  %v7747_v32 = vld [vmem:[#allocation27_spill] sm:$0xff]  ;;  %vm7766_vm1 = vmmov %vm7679_vm0 }
 0x2f8   : > { %1556 = vrot.lane.b32.xlu0 %v1201_v25, %s4005_s24  ;;  %1836 = vmatpush.bf16.msrb.mxu0 %v1626_v33  ;;  %v7749_v33 = vld [vmem:[#allocation26_spill] sm:$0xff] }
 0x2f9   : > { %1781 = vmatmul.bf16.vlgmr.msrb.gmra.mxu2 %v5562_v44 }
 0x2fb   : > { %1239 = vperm.xlu1 %3953, %v7728_v46   ;;  %v7750_v46 = vld [vmem:[#allocation21_spill] sm:$0xff] }
 0x2fc   : > { %1229 = vperm.xlu2 %3951, %v7729_v60   ;;  %v5602_v60 = vor.u32 %v7750_v46, %v7749_v33  ;;  %v7772_v46 = vld [vmem:[#allocation79_spill] sm:$0xff] }
 0x2fd   : > { %v1353_v45 = vpop.permute.xlu1 %1352 }
 0x2fe   : > { %v5548_v10 = vpop.permute.xlu0 %1542  ;;  %v1485_v31 = vpop.permute.xlu2 %1484  ;;  %v1561_v57 = vsel %vm7730_vm13, %v5265_v23, %v1353_v45  ;;  %v7751_v45 = vld [vmem:[#allocation71_spill] sm:$0xff]  ;;  %vm7771_vm13 = vmmov %vm7679_vm0 }
 0x2ff   : > { %v1605_v14 = vsel %vm7733_vm10, %v5323_v52, %v1485_v31  ;;  %1866 = vmatpush.bf16.msrb.mxu1 %v1561_v57  ;;  %v1624_v8 = vsel %vm7734_vm7, %v1541_v39, %v5548_v10  ;;  %v5572_v39 = vor.u32 %v7739_v42, %v7738_v0  ;;  %v7752_v31 = vld [vmem:[#allocation72_spill] sm:$0xff]  ;;  %vm7773_vm10 = vmmov %vm7679_vm0 }
 0x300   : > { %1837 = vmatpush.bf16.msrb.mxu0 %v1624_v8  ;;  %1918 = vmatpush.bf16.msra.mxu3 %v1605_v14  ;;  %v1077_v57 = vsel %vm1075_vm4, %v7752_v31, %v7751_v45  ;;  %v7755_v14 = vld [vmem:[#allocation77_spill] sm:$0xff]  ;;  %v7758_v0 = vld [vmem:[#allocation28_spill] sm:$0xff]  ;;  %vm7760_vm4 = vmmov %vm7679_vm0 }
 0x301   : > { %1810 = vmatmul.bf16.vlgmr.msrb.gmra.mxu3 %v5572_v39  ;;  %vm7774_vm7 = vmmov %vm7679_vm0  ;;  %v7775_v31 = vld [vmem:[#allocation52_spill] sm:$0xff] }
 0x305   : > { %v1347_v23 = vpop.permute.xlu1 %1346 }
 0x306   : > { %v5566_v48 = vpop.permute.xlu0 %1536  ;;  %v1425_v40 = vpop.permute.xlu2 %1424  ;;  %v1559_v52 = vsel %vm7737_vm2, %v5253_v3, %v1347_v23  ;;  %v5581_v3 = vor.u32 %v7743_v55, %v7742_v18  ;;  %v7765_v55 = vld [vmem:[#allocation80_spill] sm:$0xff]  ;;  %vm7777_vm2 = vmmov %vm7679_vm0 }
 0x307   : > { %1867 = vmatpush.bf16.msrb.mxu1 %v1559_v52  ;;  %v1622_v35 = vsel %vm7740_vm15, %v1535_v38, %v5566_v48  ;;  %v7744_v38 = vld [vmem:[#allocation14_spill] sm:$0xff]  ;;  %v7757_v52 = vld [vmem:[#allocation23_spill] sm:$0xff]  ;;  %vm7780_vm15 = vmmov %vm7679_vm0 }
 0x308   : > { %1838 = vmatpush.bf16.msrb.mxu0 %v1622_v35  ;;  %v5588_v47 = vor.u32 %v7745_v37, %v7744_v38  ;;  %v5617_v42 = vor.u32 %v7758_v0, %v7757_v52  ;;  %v7759_v35 = vld [vmem:[#allocation78_spill] sm:$0xff]  ;;  %v7768_v38 = vld [vmem:[#allocation37_spill] sm:$0xff]  ;;  %v7784_v0 = vld [vmem:[#allocation47_spill] sm:$0xff] }
 0x309   : > { %v7783_v52 = vld [vmem:[#allocation42_spill] sm:$0xff] }
 0x30a   : > { %1752 = vmatmul.bf16.vlgmr.msra.gmra.mxu1 %v5588_v47 }
 0x30b   : > { %3752 = vmatmul.msk.bf16.vlgmr.msrb.gmra.mxu0 %vm1702_vm9, %v5581_v3 }
 0x30d   : > { %v1437_v22 = vpop.permute.xlu1 %1436 }
 0x30e   : > { %v1589_v50 = vsel %vm7741_vm3, %v5150_v53, %v1437_v22  ;;  %v1186_v4 = vpop.permute.xlu0 %1185  ;;  %v1419_v9 = vpop.permute.xlu2 %1418  ;;  %v5592_v53 = vor.u32 %v7747_v32, %v7746_v27  ;;  %v7769_v27 = vld [vmem:[#allocation36_spill] sm:$0xff]  ;;  %v7770_v32 = vld [vmem:[#allocation31_spill] sm:$0xff]  ;;  %vm7781_vm3 = vmmov %vm7679_vm0 }
 0x30f   : > { %v1199_v2 = vsel %vm1193_vm8, %v5135_v54, %v1186_v4  ;;  %1889 = vmatpush.bf16.msra.mxu2 %v1589_v50  ;;  %vm7748_vm8 = vmmov %vm7679_vm0  ;;  %v1583_v22 = vsel %vm7760_vm4, %v7759_v35, %v1419_v9  ;;  %v7763_v4 = vld [vmem:[#allocation19_spill] sm:$0xff]  ;;  %v7767_v9 = vld [vmem:[#allocation32_spill] sm:$0xff]  ;;  %v3743_v35 = vor.u32 %v7784_v0, %v7783_v52 }
 0x310   : > { %1550 = vrot.lane.b32.xlu0 %v1199_v2, %s4005_s24  ;;  %1786 = vmatmul.bf16.gmra.mxu2 %v5592_v53  ;;  %v5635_v37 = vor.u32 %v7768_v38, %v7767_v9  ;;  %vm7791_vm4 = vmmov %vm7679_vm0 }
 0x311   : > { %1815 = vmatmul.bf16.gmra.mxu3 %v5602_v60 }
 0x315   : > { %v1479_v21 = vpop.permute.xlu1 %1478 }
 0x316   : > { %v1431_v54 = vpop.permute.xlu0 %1430  ;;  %v1413_v16 = vpop.permute.xlu2 %1412  ;;  %v1603_v25 = vsel %vm7748_vm8, %v5350_v17, %v1479_v21  ;;  %v1585_v17 = vsel %vm7679_vm0, %v7755_v14, %v1425_v40  ;;  %v7762_v40 = vld [vmem:[#allocation24_spill] sm:$0xff]  ;;  %v5640_v21 = vor.u32 %v7770_v32, %v7769_v27  ;;  %v7778_v14 = vld [vmem:[#allocation33_spill] sm:$0xff]  ;;  %vm7782_vm8 = vmmov %vm7679_vm0 }
 0x317   : > { %1919 = vmatpush.bf16.msra.mxu3 %v1603_v25  ;;  %v1587_v19 = vsel %vm7754_vm14, %v7753_v29, %v1431_v54  ;;  %v5625_v18 = vor.u32 %v7763_v4, %v7762_v40  ;;  %v1581_v2 = vsel %vm7766_vm1, %v7765_v55, %v1413_v16  ;;  %vm7787_vm14 = vmmov %vm7679_vm0  ;;  %v7788_v55 = vld [vmem:[#allocation43_spill] sm:$0xff] }
 0x318   : > { %1490 = vrot.lane.b32.xlu0 %v1077_v57, %s4005_s24  ;;  %1890 = vmatpush.bf16.msra.mxu2 %v1587_v19  ;;  %v7776_v57 = vld [vmem:[#allocation58_spill] sm:$0xff]  ;;  %vm7793_vm1 = vmmov %vm7679_vm0 }
 0x31a   : > { %1757 = vmatmul.bf16.gmra.mxu1 %v5625_v18 }
 0x31b   : > { %3753 = vmatmul.msk.bf16.gmra.mxu0 %vm1702_vm9, %v5617_v42 }
 0x31c   : > { %1891 = vmatpush.bf16.msra.mxu2 %v1585_v17 }
 0x31d   : > { %v1533_v8 = vpop.permute.xlu1 %1532 }
 0x31e   : > { %v1621_v56 = vsel %vm7756_vm12, %v5287_v34, %v1533_v8  ;;  %v1473_v24 = vpop.permute.xlu0 %1472  ;;  %v1407_v23 = vpop.permute.xlu2 %1406  ;;  %v7764_v34 = vld [vmem:[#allocation4_spill] sm:$0xff]  ;;  %vm7790_vm12 = vmmov %vm7679_vm0 }
 0x31f   : > { %1947 = vmatpush.bf16.msra.mxu0 %v1621_v56  ;;  %v1601_v50 = vsel %vm7761_vm11, %v5325_v30, %v1473_v24  ;;  %v1579_v16 = vsel %vm7773_vm10, %v7772_v46, %v1407_v23  ;;  %vm7792_vm11 = vmmov %vm7679_vm0 }
 0x320   : > { %1892 = vmatpush.bf16.msra.mxu2 %v1583_v22  ;;  %1920 = vmatpush.bf16.msra.mxu3 %v1601_v50  ;;  %v7786_v50 = vld [vmem:[#allocation41_spill] sm:$0xff]  ;;  %vm7795_vm10 = vmmov %vm7679_vm0 }
 0x321   : > { %1209 = vperm.xlu0 %3952, %v7764_v34   ;;  %1791 = vmatmul.bf16.gmra.mxu2 %v5635_v37 }
 0x322   : > { %1820 = vmatmul.bf16.gmra.mxu3 %v5640_v21 }
 0x324   : > { %1893 = vmatpush.bf16.msra.mxu2 %v1581_v2 }
 0x325   : > { %v1527_v30 = vpop.permute.xlu1 %1526 }
 0x326   : > { %v1467_v54 = vpop.permute.xlu0 %1466  ;;  %v1401_v25 = vpop.permute.xlu2 %1400  ;;  %v1619_v33 = vsel %vm7771_vm13, %v5362_v20, %v1527_v30  ;;  %v7779_v20 = vld [vmem:[#allocation38_spill] sm:$0xff]  ;;  %vm7794_vm13 = vmmov %vm7679_vm0 }
 0x327   : > { %1948 = vmatpush.bf16.msra.mxu0 %v1619_v33  ;;  %v1599_v45 = vsel %vm7774_vm7, %v5394_v62, %v1467_v54  ;;  %v1577_v29 = vsel %vm7777_vm2, %v7776_v57, %v1401_v25  ;;  %v5654_v17 = vor.u32 %v7779_v20, %v7778_v14  ;;  %vm7796_vm7 = vmmov %vm7679_vm0 }
 0x328   : > { %1894 = vmatpush.bf16.msra.mxu2 %v1579_v16  ;;  %1921 = vmatpush.bf16.msra.mxu3 %v1599_v45  ;;  %vm7797_vm2 = vmmov %vm7679_vm0 }
 0x329   : > { %1234 = vperm.xlu0 %3952, %v7775_v31  }
 0x32a   : > { %1868 = vmatmul.bf16.vlgmr.msrb.gmra.mxu1 %v5522_v5  ;;  %v7789_v5 = vld [vmem:[#allocation48_spill] sm:$0xff] }
 0x32b   : > { %3754 = vmatmul.msk.bf16.gmra.mxu0 %vm1702_vm9, %v5654_v17  ;;  %v5678_v2 = vor.u32 %v7789_v5, %v7788_v55 }
 0x32c   : > { %1895 = vmatpush.bf16.msra.mxu2 %v1577_v29 }
 0x32d   : > { %v1521_v19 = vpop.permute.xlu1 %1520 }
 0x32e   : > { %v1461_v8 = vpop.permute.xlu0 %1460  ;;  %v1395_v56 = vpop.permute.xlu2 %1394  ;;  %v1617_v62 = vsel %vm7780_vm15, %v5380_v11, %v1521_v19  ;;  %v7785_v11 = vld [vmem:[#allocation46_spill] sm:$0xff]  ;;  %vm7798_vm15 = vmmov %vm7679_vm0 }
 0x32f   : > { %1949 = vmatpush.bf16.msra.mxu0 %v1617_v62  ;;  %v1575_v24 = vsel %vm7781_vm3, %v5306_v41, %v1395_v56  ;;  %v1597_v23 = vsel %vm7782_vm8, %v5428_v1, %v1461_v8  ;;  %v5669_v40 = vor.u32 %v7786_v50, %v7785_v11  ;;  %vm7799_vm3 = vmmov %vm7679_vm0  ;;  %vm2090_vm8 = vcmask 1047556  }
 0x330   : > { %1896 = vmatpush.bf16.msra.mxu2 %v1575_v24  ;;  %1922 = vmatpush.bf16.msra.mxu3 %v1597_v23 }
 0x331   : > { %1796 = vmatmul.bf16.gmra.mxu2 %v3743_v35 }
 0x332   : > { %1825 = vmatmul.bf16.gmra.mxu3 %v5669_v40 }
 0x335   : > { %v1515_v22 = vpop.permute.xlu1 %1514 }
 0x336   : > { %v1455_v41 = vpop.permute.xlu0 %1454  ;;  %v1615_v1 = vsel %vm7787_vm14, %v5410_v51, %v1515_v22  ;;  %v1503_v30 = vpop.permute.xlu2 %1502  ;;  %vm2061_vm14 = vcmask 130048  }
 0x337   : > { %1950 = vmatpush.bf16.msra.mxu0 %v1615_v1  ;;  %v1595_v4 = vsel %vm7679_vm0, %v5412_v61, %v1455_v41  ;;  %v1611_v61 = vsel %vm7792_vm11, %v5462_v36, %v1503_v30  ;;  %vm2093_vm0 = vcmask 125952  }
 0x338   : > { %1923 = vmatpush.bf16.msra.mxu3 %v1595_v4 }
 0x33a   : > { %1873 = vmatmul.bf16.gmra.mxu1 %v5554_v12 }
 0x33b   : > { %3755 = vmatmul.msk.bf16.gmra.mxu0 %vm1702_vm9, %v5678_v2 }
 0x33d   : > { %v1509_v34 = vpop.permute.xlu1 %1508 }
 0x33e   : > { %v1449_v9 = vpop.permute.xlu0 %1448  ;;  %v1613_v38 = vsel %vm7790_vm12, %v5396_v7, %v1509_v34  ;;  %v1545_v25 = vpop.permute.xlu2 %1544 }
 0x33f   : > { %1951 = vmatpush.bf16.msra.mxu0 %v1613_v38  ;;  %v1593_v51 = vsel %vm7791_vm4, %v5476_v63, %v1449_v9 }
 0x340   : > { %1924 = vmatpush.bf16.msra.mxu3 %v1593_v51 }
 0x341   : > { %1897 = vmatmul.bf16.vlgmr.msra.gmra.mxu2 %v5588_v47 }
 0x343   : > { %1952 = vmatpush.bf16.msra.mxu0 %v1611_v61 }
 0x345   : > { %v1443_v27 = vpop.permute.xlu1 %1442 }
 0x346   : > { %v1591_v7 = vsel %vm7793_vm1, %v5478_v58, %v1443_v27  ;;  %v5733_v20 = vpop.permute.xlu2 %1204 }
 0x347   : > { %1925 = vmatpush.bf16.msra.mxu3 %v1591_v7 }
 0x34a   : > { %1926 = vmatmul.bf16.vlgmr.msra.gmra.mxu3 %v5562_v44  ;;  %1878 = vmatmul.bf16.gmra.mxu1 %v5502_v26 }
 0x34b   : > { %v1724_v44 = vpop.f32.mrf.mxu0 }
 0x34d   : > { %v1497_v63 = vpop.permute.xlu1 %1496  ;;  %v5699_v36 = vpop.f32.mrf.mxu2 }
 0x34e   : > { %v1609_v32 = vsel %vm7794_vm13, %v5490_v59, %v1497_v63  ;;  %v5702_v58 = vpop.f32.mrf.mxu3 }
 0x34f   : > { %1953 = vmatpush.bf16.msra.mxu0 %v1609_v32 }
 0x351   : > { %1902 = vmatmul.bf16.gmra.mxu2 %v5625_v18 }
 0x355   : > { %v1736_v26 = vpop.f32.mrf.mxu2  ;;  %v1539_v45 = vpop.permute.xlu1 %1538 }
 0x356   : > { %v5707_v47 = vpop.f32.mrf.mxu3  ;;  %v1623_v29 = vsel %vm7799_vm3, %v5566_v48, %v1539_v45 }
 0x35a   : > { %1931 = vmatmul.bf16.gmra.mxu3 %v5592_v53  ;;  %1883 = vmatmul.bf16.gmra.mxu1 %v5526_v15  ;;  %v1726_v15 = vpop.f32.mrf.mxu0 }
 0x35d   : > { %v5751_v22 = vpop.permute.xlu1 %1214 }
 0x361   : > { %1907 = vmatmul.bf16.gmra.mxu2 %v5498_v49  ;;  %v5712_v49 = vpop.f32.mrf.mxu3 }
 0x362   : > { %v1729_v54 = vpop.f32.mrf.mxu0 }
 0x363   : > { %v1730_v50 = vadd.f32 %v1729_v54, %v5751_v22 }
 0x365   : > { %v5761_v27 = vpop.permute.xlu1 %1224 }
 0x366   : > { %v1735_v7 = vadd.f32 %v5699_v36, %v5761_v27 }
 0x369   : > { %v5718_v33 = vpop.f32.mrf.mxu3 }
 0x36a   : > { %v1557_v12 = vpop.permute.xlu0 %1556  ;;  %1936 = vmatmul.bf16.gmra.mxu3 %v5635_v37  ;;  %v1731_v16 = vpop.f32.mrf.mxu0 }
 0x36b   : > { %v1629_v59 = vsel %vm7795_vm10, %v5464_v6, %v1557_v12 }
 0x36c   : > { %1980 = vmatpush.bf16.msra.mxu1 %v1629_v59  ;;  %v5709_v53 = vpop.f32.mrf.mxu2 }
 0x371   : > { %1912 = vmatmul.bf16.gmra.mxu2 %v5538_v28  ;;  %v1625_v28 = vsel %vm7797_vm2, %v5548_v10, %v1545_v25  ;;  %v5775_v25 = vpop.permute.xlu1 %1239 }
 0x374   : > { %v5714_v18 = vpop.f32.mrf.mxu2 }
 0x37a   : > { %1941 = vmatmul.bf16.gmra.mxu3 %v3743_v35  ;;  %v5749_v35 = vpop.permute.xlu2 %1219 }
 0x37b   : > { %v1732_v55 = vadd.f32 %v1731_v16, %v5749_v35 }
 0x37c   : > { %v1782_v46 = vpop.f32.mrf.mxu2 }
 0x382   : > { %v1551_v37 = vpop.permute.xlu0 %1550  ;;  %v5758_v38 = vpop.permute.xlu2 %1229 }
 0x383   : > { %v1627_v6 = vsel %vm7796_vm7, %v5532_v43, %v1551_v37  ;;  %v1737_v61 = vadd.f32 %v1736_v26, %v5758_v38 }
 0x384   : > { %1981 = vmatpush.bf16.msra.mxu1 %v1627_v6  ;;  %v5726_v43 = vpop.f32.mrf.mxu3  ;;  %v1784_v19 = vpop.f32.mrf.mxu2 }
 0x385   : > { %v1766_v12 = vadd.f32 %v5707_v47, %v1737_v61 }
 0x387   : > { %v1753_v10 = vpop.f32.mrf.mxu1 }
 0x388   : > { %1982 = vmatpush.bf16.msra.mxu1 %v1625_v28  ;;  %v5728_v14 = vpop.f32.mrf.mxu0 }
 0x38a   : > { %v1491_v31 = vpop.permute.xlu0 %1490 }
 0x38b   : > { %v1607_v57 = vsel %vm7798_vm15, %v5516_v13, %v1491_v31  ;;  %v1725_v13 = vadd.f32 %v1724_v44, %v5733_v20  ;;  %v1764_v44 = vadd.f32 %v5702_v58, %v1735_v7 }
 0x38c   : > { %1954 = vmatpush.bf16.msra.mxu0 %v1607_v57  ;;  %1983 = vmatpush.bf16.msra.mxu1 %v1623_v29  ;;  %v5736_v56 = vpop.f32.mrf.mxu3 }
 0x38d   : > { %v1754_v8 = vadd.f32 %v1753_v10, %v1725_v13 }
 0x38f   : > { %1955 = vmatmul.bf16.vlgmr.msra.gmra.mxu0 %v5572_v39  ;;  %3756 = vmatmul.msk.bf16.vlgmr.msra.gmra.mxu1 %vm1702_vm9, %v5581_v3  ;;  %v5738_v48 = vadd.f32 %v1782_v46, %v1754_v8  ;;  %v1755_v23 = vpop.f32.mrf.mxu1 }
 0x390   : > { %v5740_v24 = vpop.f32.mrf.mxu0 }
 0x393   : > { %v1787_v62 = vpop.f32.mrf.mxu2  ;;  %v5753_v11 = vpop.permute.xlu0 %1209 }
 0x394   : > { %v5742_v52 = vpop.f32.mrf.mxu3  ;;  %v1727_v41 = vadd.f32 %v1726_v15, %v5753_v11 }
 0x396   : > { %v1756_v4 = vadd.f32 %v1755_v23, %v1727_v41 }
 0x397   : > { %v1758_v3 = vpop.f32.mrf.mxu1 }
 0x398   : > { %v5744_v39 = vpop.f32.mrf.mxu0  ;;  %v1759_v1 = vadd.f32 %v1758_v3, %v1730_v50  ;;  %v1785_v5 = vadd.f32 %v1784_v19, %v1756_v4 }
 0x39b   : > { %v1789_v0 = vpop.f32.mrf.mxu2  ;;  %v5765_v63 = vpop.permute.xlu0 %1234 }
 0x39c   : > { %v1818_v34 = vpop.f32.mrf.mxu3  ;;  %v1740_v59 = vadd.f32 %v5709_v53, %v5765_v63  ;;  %v1742_v53 = vadd.f32 %v5714_v18, %v5775_v25 }
 0x39e   : > { %v1769_v37 = vadd.f32 %v5712_v49, %v1740_v59  ;;  %v1771_v58 = vadd.f32 %v5718_v33, %v1742_v53 }
 0x39f   : > { %1960 = vmatmul.bf16.gmra.mxu0 %v5602_v60  ;;  %3757 = vmatmul.msk.bf16.gmra.mxu1 %vm1702_vm9, %v5617_v42  ;;  %v1788_v60 = vadd.f32 %v1787_v62, %v1759_v1  ;;  %v1760_v42 = vpop.f32.mrf.mxu1 }
 0x3a0   : > { %v1847_v9 = vpop.f32.mrf.mxu0  ;;  %v1761_v30 = vadd.f32 %v1760_v42, %v1732_v55 }
 0x3a1   : > { %v1817_v61 = vadd.f32 %v5742_v52, %v1788_v60 }
 0x3a2   : > { %v1790_v32 = vadd.f32 %v1789_v0, %v1761_v30 }
 0x3a3   : > { %v1846_v7 = vadd.f32 %v5744_v39, %v1817_v61 }
 0x3a4   : > { %v1792_v51 = vpop.f32.mrf.mxu2  ;;  %v1819_v15 = vadd.f32 %v1818_v34, %v1790_v32 }
 0x3a5   : > { %v1821_v54 = vpop.f32.mrf.mxu3  ;;  %v1793_v26 = vadd.f32 %v1792_v51, %v1764_v44 }
 0x3a6   : > { %v1848_v32 = vadd.f32 %v1847_v9, %v1819_v15 }
 0x3a7   : > { %v1869_v29 = vpop.f32.mrf.mxu1  ;;  %v1822_v41 = vadd.f32 %v1821_v54, %v1793_v26 }
 0x3a8   : > { %v1850_v6 = vpop.f32.mrf.mxu0 }
 0x3a9   : > { %v5789_v1 = vadd.f32 %v1850_v6, %v1822_v41 }
 0x3ac   : > { %v1794_v36 = vpop.f32.mrf.mxu2 }
 0x3ad   : > { %v1795_v47 = vadd.f32 %v1794_v36, %v1766_v12  ;;  %v1823_v46 = vpop.f32.mrf.mxu3 }
 0x3af   : > { %1965 = vmatmul.bf16.gmra.mxu0 %v5640_v21  ;;  %3758 = vmatmul.msk.bf16.gmra.mxu1 %vm1702_vm9, %v5654_v17  ;;  %v1824_v16 = vadd.f32 %v1823_v46, %v1795_v47  ;;  %v1871_v23 = vpop.f32.mrf.mxu1 }
 0x3b0   : > { %v1852_v28 = vpop.f32.mrf.mxu0  ;;  %v1872_v54 = vadd.f32 %v1871_v23, %v5753_v11 }
 0x3b1   : > { %v5780_v49 = vadd.f32 %v1852_v28, %v1824_v16 }
 0x3b4   : > { %v1797_v45 = vpop.f32.mrf.mxu2 }
 0x3b5   : > { %v1798_v31 = vadd.f32 %v1797_v45, %v1769_v37  ;;  %v1826_v21 = vpop.f32.mrf.mxu3 }
 0x3b7   : > { %v1827_v57 = vadd.f32 %v1826_v21, %v1798_v31  ;;  %v1874_v0 = vpop.f32.mrf.mxu1 }
 0x3b8   : > { %v1855_v17 = vpop.f32.mrf.mxu0  ;;  %v1875_v9 = vadd.f32 %v1874_v0, %v5751_v22 }
 0x3b9   : > { %v5785_v19 = vadd.f32 %v1855_v17, %v1827_v57 }
 0x3bc   : > { %v1799_v18 = vpop.f32.mrf.mxu2 }
 0x3bd   : > { %v1800_v33 = vadd.f32 %v1799_v18, %v1771_v58  ;;  %v1828_v10 = vpop.f32.mrf.mxu3 }
 0x3bf   : > { %1970 = vmatmul.bf16.gmra.mxu0 %v5669_v40  ;;  %3759 = vmatmul.msk.bf16.gmra.mxu1 %vm1702_vm9, %v5678_v2  ;;  %v1829_v13 = vadd.f32 %v1828_v10, %v1800_v33  ;;  %v1876_v3 = vpop.f32.mrf.mxu1  ;;  %v1812_v40 = vadd.f32 %v5726_v43, %v5738_v48  ;;  %v1814_v2 = vadd.f32 %v5736_v56, %v1785_v5  ;;  %vm2089_vm9 = vcmask 1043584  }
 0x3c0   : > { %v1857_v8 = vpop.f32.mrf.mxu0  ;;  %v1870_v43 = vadd.f32 %v1869_v29, %v5733_v20  ;;  %v1877_v22 = vadd.f32 %v1876_v3, %v5749_v35  ;;  %vm5829_vm12 = vmor %vm2090_vm8, %vm2089_vm9 }
 0x3c1   : > { %v5787_v62 = vadd.f32 %v1857_v8, %v1829_v13  ;;  %v1841_v4 = vadd.f32 %v5728_v14, %v1812_v40  ;;  %v1843_v34 = vadd.f32 %v5740_v24, %v1814_v2  ;;  %v2009_v8 = vmax.f32 %v1846_v7, 0.0 }
 0x3c3   : > { %v2005_v60 = vmax.f32 %v1841_v4, 0.0  ;;  %v2007_v28 = vmax.f32 %v1843_v34, 0.0 }
 0x3c4   : > { %v1898_v42 = vpop.f32.mrf.mxu2 }
 0x3c5   : > { %v1899_v14 = vadd.f32 %v1898_v42, %v1870_v43 }
 0x3c7   : > { %v1879_v50 = vpop.f32.mrf.mxu1 }
 0x3c8   : > { %v1880_v0 = vadd.f32 %v1879_v50, %v5761_v27 }
 0x3cc   : > { %v1900_v12 = vpop.f32.mrf.mxu2 }
 0x3cd   : > { %v1927_v30 = vpop.f32.mrf.mxu3  ;;  %v1901_v52 = vadd.f32 %v1900_v12, %v1872_v54 }
 0x3ce   : > { %v1928_v5 = vadd.f32 %v1927_v30, %v1899_v14  ;;  %v2011_v30 = vmax.f32 %v1848_v32, 0.0 }
 0x3cf   : > { %v5796_v55 = vpop.f32.mrf.mxu1 }
 0x3d0   : > { %v1882_v27 = vadd.f32 %v5796_v55, %v5758_v38 }
 0x3d4   : > { %v1903_v24 = vpop.f32.mrf.mxu2 }
 0x3d5   : > { %v1929_v48 = vpop.f32.mrf.mxu3  ;;  %v1904_v46 = vadd.f32 %v1903_v24, %v1875_v9  ;;  %v2015_v9 = vmax.f32 %v5780_v49, 0.0 }
 0x3d6   : > { %v1930_v15 = vadd.f32 %v1929_v48, %v1901_v52 }
 0x3d7   : > { %v5798_v51 = vpop.f32.mrf.mxu1 }
 0x3d8   : > { %v1885_v32 = vadd.f32 %v5798_v51, %v5765_v63 }
 0x3dc   : > { %v1905_v53 = vpop.f32.mrf.mxu2 }
 0x3dd   : > { %v1932_v37 = vpop.f32.mrf.mxu3  ;;  %v1906_v10 = vadd.f32 %v1905_v53, %v1877_v22 }
 0x3de   : > { %v1933_v31 = vadd.f32 %v1932_v37, %v1904_v46 }
 0x3df   : > { %v5803_v56 = vpop.f32.mrf.mxu1 }
 0x3e0   : > { %v1887_v63 = vadd.f32 %v5803_v56, %v5775_v25  ;;  %v2019_v25 = vmax.f32 %v5787_v62, 0.0 }
 0x3e4   : > { %v1908_v18 = vpop.f32.mrf.mxu2 }
 0x3e5   : > { %v1934_v16 = vpop.f32.mrf.mxu3  ;;  %v1909_v42 = vadd.f32 %v1908_v18, %v1880_v0 }
 0x3e6   : > { %v1935_v41 = vadd.f32 %v1934_v16, %v1906_v10  ;;  %v2017_v16 = vmax.f32 %v5785_v19, 0.0 }
 0x3ec   : > { %v1910_v3 = vpop.f32.mrf.mxu2 }
 0x3ed   : > { %v1937_v13 = vpop.f32.mrf.mxu3  ;;  %v1911_v24 = vadd.f32 %v1910_v3, %v1882_v27 }
 0x3ee   : > { %v1938_v12 = vadd.f32 %v1937_v13, %v1909_v42 }
 0x3f4   : > { %v1913_v37 = vpop.f32.mrf.mxu2 }
 0x3f5   : > { %v1939_v43 = vpop.f32.mrf.mxu3  ;;  %v1914_v55 = vadd.f32 %v1913_v37, %v1885_v32 }
 0x3f6   : > { %v1940_v54 = vadd.f32 %v1939_v43, %v1911_v24 }
 0x3fc   : > { %v1915_v53 = vpop.f32.mrf.mxu2 }
 0x3fd   : > { %v1942_v38 = vpop.f32.mrf.mxu3 }
 0x405   : > { %v1944_v46 = vpop.f32.mrf.mxu3 }
 0x40c   : > { %v1956_v59 = vpop.f32.mrf.mxu0  ;;  %v1985_v44 = vpop.f32.mrf.mxu1 }
 0x40d   : > { %v1957_v26 = vadd.f32 %v1956_v59, %v1928_v5  ;;  %v2013_v59 = vmax.f32 %v5789_v1, 0.0 }
 0x40f   : > { %v1986_v6 = vadd.f32 %v1985_v44, %v1957_v26 }
 0x411   : > { %v2006_v39 = vmax.f32 %v1986_v6, 0.0 }
 0x413   : > { %v2021_v20 = vpack.c.bf16 %v2006_v39, %v2005_v60 }
 0x414   : > { %v1958_v36 = vpop.f32.mrf.mxu0  ;;  %v1987_v47 = vpop.f32.mrf.mxu1 }
 0x415   : > { %v1959_v58 = vadd.f32 %v1958_v36, %v1930_v15  ;;  %2037 = vrot.lane.b32.xlu2 %v2021_v20, %s4015_s13  ;;  %v1943_v20 = vadd.f32 %v1942_v38, %v1914_v55 }
 0x417   : > { %v1988_v11 = vadd.f32 %v1987_v47, %v1959_v58 }
 0x419   : > { %v2008_v45 = vmax.f32 %v1988_v11, 0.0  ;;  %v1916_v11 = vadd.f32 %v1915_v53, %v1887_v63 }
 0x41b   : > { %v2022_v21 = vpack.c.bf16 %v2008_v45, %v2007_v28  ;;  %v1945_v49 = vadd.f32 %v1944_v46, %v1916_v11 }
 0x41c   : > { %v1961_v57 = vpop.f32.mrf.mxu0  ;;  %v1990_v29 = vpop.f32.mrf.mxu1 }
 0x41d   : > { %v1962_v17 = vadd.f32 %v1961_v57, %v1933_v31  ;;  %2039 = vrot.lane.b32.xlu0 %v2022_v21, %s4015_s13 }
 0x41f   : > { %v1991_v33 = vadd.f32 %v1990_v29, %v1962_v17 }
 0x421   : > { %v2010_v23 = vmax.f32 %v1991_v33, 0.0 }
 0x423   : > { %v2023_v40 = vpack.c.bf16 %v2010_v23, %v2009_v8 }
 0x424   : > { %v1963_v2 = vpop.f32.mrf.mxu0  ;;  %v1992_v4 = vpop.f32.mrf.mxu1 }
 0x425   : > { %v1964_v34 = vadd.f32 %v1963_v2, %v1935_v41  ;;  %2041 = vrot.lane.b32.xlu1 %v2023_v40, %s4015_s13 }
 0x427   : > { %v1993_v35 = vadd.f32 %v1992_v4, %v1964_v34 }
 0x429   : > { %v2012_v61 = vmax.f32 %v1993_v35, 0.0 }
 0x42b   : > { %v2024_v48 = vpack.c.bf16 %v2012_v61, %v2011_v30 }
 0x42c   : > { %v1966_v14 = vpop.f32.mrf.mxu0  ;;  %v1995_v7 = vpop.f32.mrf.mxu1 }
 0x42d   : > { %v1967_v50 = vadd.f32 %v1966_v14, %v1938_v12  ;;  %2043 = vrot.lane.b32.xlu2 %v2024_v48, %s4015_s13 }
 0x42f   : > { %v1996_v5 = vadd.f32 %v1995_v7, %v1967_v50 }
 0x431   : > { %v2014_v44 = vmax.f32 %v1996_v5, 0.0 }
 0x433   : > { %v2025_v26 = vpack.c.bf16 %v2014_v44, %v2013_v59 }
 0x434   : > { %v1968_v6 = vpop.f32.mrf.mxu0  ;;  %v1997_v52 = vpop.f32.mrf.mxu1 }
 0x435   : > { %v1969_v60 = vadd.f32 %v1968_v6, %v1940_v54  ;;  %2045 = vrot.lane.b32.xlu0 %v2025_v26, %s4015_s13 }
 0x437   : > { %v1998_v39 = vadd.f32 %v1997_v52, %v1969_v60 }
 0x439   : > { %v2016_v15 = vmax.f32 %v1998_v39, 0.0 }
 0x43b   : > { %v2026_v1 = vpack.c.bf16 %v2016_v15, %v2015_v9 }
 0x43c   : > { %v1971_v36 = vpop.f32.mrf.mxu0  ;;  %v2000_v47 = vpop.f32.mrf.mxu1 }
 0x43d   : > { %v1972_v51 = vadd.f32 %v1971_v36, %v1943_v20  ;;  %2047 = vrot.lane.b32.xlu1 %v2026_v1, %s4015_s13 }
 0x43f   : > { %v2001_v58 = vadd.f32 %v2000_v47, %v1972_v51 }
 0x441   : > { %v2018_v28 = vmax.f32 %v2001_v58, 0.0 }
 0x443   : > { %v2027_v45 = vpack.c.bf16 %v2018_v28, %v2017_v16 }
 0x444   : > { %v1973_v31 = vpop.f32.mrf.mxu0  ;;  %v2002_v57 = vpop.f32.mrf.mxu1 }
 0x445   : > { %v1974_v21 = vadd.f32 %v1973_v31, %v1945_v49  ;;  %2049 = vrot.lane.b32.xlu2 %v2027_v45, %s4015_s13 }
 0x447   : > { %v2003_v29 = vadd.f32 %v2002_v57, %v1974_v21 }
 0x449   : > { %v2020_v56 = vmax.f32 %v2003_v29, 0.0 }
 0x44b   : > { %v2028_v22 = vpack.c.bf16 %v2020_v56, %v2019_v25 }
 0x44d   : > { %2051 = vrot.lane.b32.xlu0 %v2028_v22, %s4015_s13 }
 0x46f   : > { %v2038_v19 = vpop.permute.xlu2 %2037 }
 0x470   : > { %v2053_v18 = vrot.slane %v2038_v19, 4 }
 0x472   : > { %v2062_v33 = vsel %vm2061_vm14, %v2053_v18, %v2038_v19  ;;  %2094 = vst.msk [vmem:[%s5834_s20 + $0xc] sm:$0xf] %vm2093_vm0, %v2053_v18 }
 0x473   : > { %2092 = vst.msk [vmem:[%s5834_s20 + $0x4] sm:$0xff] %vm5829_vm12, %v2062_v33 }
 0x487   : > { %v2044_v62 = vpop.permute.xlu2 %2043 }
 0x488   : > { %v2056_v10 = vrot.slane %v2044_v62, 4 }
 0x48a   : > { %v2065_v13 = vsel %vm2061_vm14, %v2056_v10, %v2044_v62  ;;  %2100 = vst.msk [vmem:[%s5834_s20 + $0x48] sm:$0xf] %vm2093_vm0, %v2056_v10 }
 0x48b   : > { %2099 = vst.msk [vmem:[%s5834_s20 + $0x40] sm:$0xff] %vm5829_vm12, %v2065_v13 }
 0x48f   : > { %v2040_v8 = vpop.permute.xlu0 %2039 }
 0x490   : > { %v2054_v23 = vrot.slane %v2040_v8, 4 }
 0x492   : > { %v2063_v0 = vsel %vm2061_vm14, %v2054_v23, %v2040_v8  ;;  %2096 = vst.msk [vmem:[%s5834_s20 + $0x20] sm:$0xf] %vm2093_vm0, %v2054_v23 }
 0x493   : > { %2095 = vst.msk [vmem:[%s5834_s20 + $0x18] sm:$0xff] %vm5829_vm12, %v2063_v0 }
 0x497   : > { %v2042_v41 = vpop.permute.xlu1 %2041 }
 0x498   : > { %v2055_v40 = vrot.slane %v2042_v41, 4 }
 0x49a   : > { %v2064_v2 = vsel %vm2061_vm14, %v2055_v40, %v2042_v41  ;;  %2098 = vst.msk [vmem:[%s5834_s20 + $0x34] sm:$0xf] %vm2093_vm0, %v2055_v40 }
 0x49b   : > { %2097 = vst.msk [vmem:[%s5834_s20 + $0x2c] sm:$0xff] %vm5829_vm12, %v2064_v2 }
 0x49f   : > { %v2050_v4 = vpop.permute.xlu2 %2049 }
 0x4a0   : > { %v2059_v34 = vrot.slane %v2050_v4, 4 }
 0x4a2   : > { %v2068_v42 = vsel %vm2061_vm14, %v2059_v34, %v2050_v4  ;;  %2106 = vst.msk [vmem:[%s5834_s20 + $0x84] sm:$0xf] %vm2093_vm0, %v2059_v34 }
 0x4a3   : > { %2105 = vst.msk [vmem:[%s5834_s20 + $0x7c] sm:$0xff] %vm5829_vm12, %v2068_v42 }
 0x4a7   : > { %v2046_v35 = vpop.permute.xlu0 %2045 }
 0x4a8   : > { %v2057_v3 = vrot.slane %v2046_v35, 4 }
 0x4aa   : > { %v2066_v30 = vsel %vm2061_vm14, %v2057_v3, %v2046_v35  ;;  %2102 = vst.msk [vmem:[%s5834_s20 + $0x5c] sm:$0xf] %vm2093_vm0, %v2057_v3 }
 0x4ab   : > { %2101 = vst.msk [vmem:[%s5834_s20 + $0x54] sm:$0xff] %vm5829_vm12, %v2066_v30 }
 0x4af   : > { %v2048_v61 = vpop.permute.xlu1 %2047 }
 0x4b0   : > { %v2058_v12 = vrot.slane %v2048_v61, 4 }
 0x4b2   : > { %v2067_v43 = vsel %vm2061_vm14, %v2058_v12, %v2048_v61  ;;  %2104 = vst.msk [vmem:[%s5834_s20 + $0x70] sm:$0xf] %vm2093_vm0, %v2058_v12 }
 0x4b3   : > { %2103 = vst.msk [vmem:[%s5834_s20 + $0x68] sm:$0xff] %vm5829_vm12, %v2067_v43 }
 0x4bf   : > { %v2052_v48 = vpop.permute.xlu0 %2051 }
 0x4c0   : > { %v2060_v14 = vrot.slane %v2052_v48, 4 }
 0x4c2   : > { %v2069_v7 = vsel %vm2061_vm14, %v2060_v14, %v2052_v48  ;;  %2108 = vst.msk [vmem:[%s5834_s20 + $0x98] sm:$0xf] %vm2093_vm0, %v2060_v14 }
 0x4c3   : > { %2107 = vst.msk [vmem:[%s5834_s20 + $0x90] sm:$0xff] %vm5829_vm12, %v2069_v7 }
 0x4c4 PF: > { %p3761_p10 = scmp.ne.s32.totalorder %s3982_s12, 19 }
 0x4c6   : > { %2112 = sbr.rel (%p3761_p10) target bundleno = 2099 (0x833), region = 44 }
 0x4cb   : > { %vm2136_vm4 = vmpackc.low %vm4269_vm6, %vm4265_vm5  ;;  %v4016_v5 = vmov 0   ;;  %s4017_s5 = smov 127   ;;  %s4018_s21 = smov 15   ;;  %v7804_v59 = vld [vmem:[#allocation56_spill] sm:$0xff]  ;;  %v7806_v44 = vld [vmem:[#allocation57_spill] sm:$0xff]  ;;  %vm2141_vm6 = vcmask 1039360  }
 0x4cc   : > { %v2137_v24 = vsel %vm2136_vm4, 65537, %v4016_v5  ;;  %3958 = vset.pattern.permute.xlu2 %v4016_v5  ;;  %3959 = vset.pattern.permute.xlu0 %v4016_v5  ;;  %s4019_s12 = smov 31   ;;  %s3851_s22 = smul.u32 160, %s7945_s4  ;;  %vm7805_vm11 = vnez %v7804_v59  ;;  %vm7807_vm1 = vnez %v7806_v44  ;;  %v5978_v10 = vunpack.c.l.b16 %v4016_v5 }
 0x4cd   : > { %2138 = vrot.lane.b32.xlu0 %v2137_v24, %s4017_s5  ;;  %2230 = vrot.lane.b32.xlu1 %v2137_v24, %s4018_s21  ;;  %vm2193_vm5 = vmpackc.low %vm7807_vm1, %vm7805_vm11  ;;  %s4020_s23 = smov 1   ;;  %s4021_s24 = smov 17   ;;  %v5981_v13 = vunpack.c.h.b16 %v4016_v5  ;;  %v7819_v4 = vmov 0  ;;  %v7822_v34 = vmov 0  ;;  %vm2198_vm9 = vcmask 7168  }
 0x4ce   : > { %2300 = vrot.lane.b32.xlu2 %v2137_v24, %s4019_s12  ;;  %v2194_v32 = vsel %vm2193_vm5, 65537, %v4016_v5  ;;  %s5899_s26 = scalar_lea.vmem [#allocation2], %s3851_s22  ;;  %s4022_s4 = smov 33   ;;  %vm2233_vm1 = vcmask 121856   ;;  %vm2303_vm5 = vcmask 252928  }
 0x4cf   : > { %v3765_v54 = vld [vmem:[%s5899_s26 + $0x4] sm:$0xf]  ;;  %v3853_v37 = vld [vmem:[%s5899_s26 + $0x14] sm:$0xf0]  ;;  %v3852_v26 = vld [vmem:[%s5899_s26 + $0x8] sm:$0xf] }
 0x4d0   : > { %v3767_v6 = vld [vmem:[%s5899_s26 + $0x18] sm:$0xf0]  ;;  %v3773_v52 = vld [vmem:[%s5899_s26 + $0x2c] sm:$0xf]  ;;  %v3855_v60 = vld [vmem:[%s5899_s26 + $0x3c] sm:$0xf0]  ;;  %v5907_v38 = vor.u32 %v3853_v37, %v3765_v54 }
 0x4d1   : > { %v5909_v55 = vor.u32 %v3852_v26, %v3767_v6  ;;  %v5911_v39 = vor.u32 %v3855_v60, %v3773_v52  ;;  %v3854_v9 = vld [vmem:[%s5899_s26 + $0x30] sm:$0xf]  ;;  %v3775_v15 = vld [vmem:[%s5899_s26 + $0x40] sm:$0xf0]  ;;  %v3781_v20 = vld [vmem:[%s5899_s26 + $0x54] sm:$0xf] }
 0x4d2   : > { %7808 = vst [vmem:[#allocation81_spill] sm:$0xff] %v5907_v38  ;;  %v3857_v1 = vld [vmem:[%s5899_s26 + $0x64] sm:$0xf0]  ;;  %v3856_v36 = vld [vmem:[%s5899_s26 + $0x58] sm:$0xf]  ;;  %v5925_v63 = vor.u32 %v3854_v9, %v3775_v15  ;;  %s4023_s27 = smov 111  }
 0x4d3   : > { %7809 = vst [vmem:[#allocation82_spill] sm:$0xff] %v5909_v55  ;;  %v3783_v47 = vld [vmem:[%s5899_s26 + $0x68] sm:$0xf0]  ;;  %v5927_v51 = vor.u32 %v3857_v1, %v3781_v20  ;;  %v3789_v58 = vld [vmem:[%s5899_s26 + $0x7c] sm:$0xf]  ;;  %v6006_v27 = vld [vmem:[%s5899_s26 + $0x4] sm:$0xff] }
 0x4d4   : > { %7810 = vst [vmem:[#allocation83_spill] sm:$0xff] %v5911_v39  ;;  %v5929_v53 = vor.u32 %v3856_v36, %v3783_v47  ;;  %v3859_v46 = vld [vmem:[%s5899_s26 + $0x8c] sm:$0xf0]  ;;  %v3858_v16 = vld [vmem:[%s5899_s26 + $0x80] sm:$0xf]  ;;  %v6009_v50 = vld [vmem:[%s5899_s26 + $0x18] sm:$0xff] }
 0x4d5   : > { %2195 = vrot.lane.b32.xlu0 %v2194_v32, %s4020_s23  ;;  %2265 = vrot.lane.b32.xlu1 %v2194_v32, %s4021_s24  ;;  %7811 = vst [vmem:[#allocation84_spill] sm:$0xff] %v5925_v63  ;;  %v3791_v11 = vld [vmem:[%s5899_s26 + $0x90] sm:$0xf0]  ;;  %v5941_v28 = vor.u32 %v3859_v46, %v3789_v58  ;;  %v3797_v45 = vld [vmem:[%s5899_s26 + $0xc] sm:$0xf]  ;;  %s4024_s28 = smov 126  }
 0x4d6   : > { %2335 = vrot.lane.b32.xlu2 %v2194_v32, %s4022_s4  ;;  %7812 = vst [vmem:[#allocation85_spill] sm:$0xff] %v5927_v51  ;;  %v5943_v49 = vor.u32 %v3858_v16, %v3791_v11  ;;  %v3860_v31 = vld [vmem:[%s5899_s26 + $0x1c] sm:$0xf0]  ;;  %v3801_v57 = vld [vmem:[%s5899_s26 + $0x34] sm:$0xf]  ;;  %v6040_v9 = vld [vmem:[%s5899_s26 + $0x2c] sm:$0xff] }
 0x4d7   : > { %7813 = vst [vmem:[#allocation86_spill] sm:$0xff] %v5929_v53  ;;  %v5952_v21 = vor.u32 %v3860_v31, %v3797_v45  ;;  %v3861_v29 = vld [vmem:[%s5899_s26 + $0x44] sm:$0xf0]  ;;  %v3805_v56 = vld [vmem:[%s5899_s26 + $0x5c] sm:$0xf]  ;;  %v6043_v15 = vld [vmem:[%s5899_s26 + $0x40] sm:$0xff] }
 0x4d8   : > { %7814 = vst [vmem:[#allocation87_spill] sm:$0xff] %v5941_v28  ;;  %v5959_v25 = vor.u32 %v3861_v29, %v3801_v57  ;;  %v3862_v22 = vld [vmem:[%s5899_s26 + $0x6c] sm:$0xf0]  ;;  %v3809_v17 = vld [vmem:[%s5899_s26 + $0x84] sm:$0xf]  ;;  %s4025_s30 = smov 112  }
 0x4d9   : > { %7815 = vst [vmem:[#allocation88_spill] sm:$0xff] %v5943_v49  ;;  %v5969_v19 = vor.u32 %v3862_v22, %v3805_v56  ;;  %v3863_v18 = vld [vmem:[%s5899_s26 + $0x94] sm:$0xf0]  ;;  %v5998_v48 = vld [vmem:[%s5899_s26 + $0xc] sm:$0xf]  ;;  %s4026_s6 = smov 110  }
 0x4da   : > { %7816 = vst [vmem:[#allocation89_spill] sm:$0xff] %v5959_v25  ;;  %v5974_v33 = vor.u32 %v3863_v18, %v3809_v17  ;;  %v6001_v14 = vld [vmem:[%s5899_s26 + $0x20] sm:$0xf]  ;;  %v6018_v24 = vld [vmem:[%s5899_s26 + $0x34] sm:$0xf]  ;;  %s4027_s7 = smov 96  }
 0x4db   : > { %7817 = vst [vmem:[#allocation90_spill] sm:$0xff] %v5969_v19  ;;  %v6031_v54 = vld [vmem:[%s5899_s26 + $0x48] sm:$0xf]  ;;  %v6059_v29 = vld [vmem:[%s5899_s26 + $0x5c] sm:$0xf]  ;;  %s4028_s8 = smov 95  }
 0x4dc   : > { %7818 = vst [vmem:[#allocation91_spill] sm:$0xff] %v5974_v33  ;;  %v6062_v56 = vld [vmem:[%s5899_s26 + $0x70] sm:$0xf]  ;;  %s4029_s9 = smov 94  }
 0x4dd   : > { %2454 = vrot.lane.b32.xlu0 %v5907_v38, %s4017_s5  ;;  %2456 = vrot.lane.b32.xlu1 %v5909_v55, %s4017_s5 }
 0x4de   : > { %2458 = vrot.lane.b32.xlu2 %v5911_v39, %s4017_s5 }
 0x4e5   : > { %2460 = vrot.lane.b32.xlu0 %v5925_v63, %s4017_s5  ;;  %2462 = vrot.lane.b32.xlu1 %v5927_v51, %s4017_s5 }
 0x4e6   : > { %2464 = vrot.lane.b32.xlu2 %v5929_v53, %s4017_s5 }
 0x4ed   : > { %2466 = vrot.lane.b32.xlu0 %v5941_v28, %s4017_s5  ;;  %2468 = vrot.lane.b32.xlu1 %v5943_v49, %s4017_s5 }
 0x4ee   : > { %2664 = vrot.lane.b32.xlu2 %v5907_v38, %s4023_s27 }
 0x4f5   : > { %2666 = vrot.lane.b32.xlu0 %v5909_v55, %s4023_s27  ;;  %2668 = vrot.lane.b32.xlu1 %v5952_v21, %s4023_s27 }
 0x4f6   : > { %2670 = vrot.lane.b32.xlu2 %v5911_v39, %s4023_s27 }
 0x4fd   : > { %2672 = vrot.lane.b32.xlu0 %v5925_v63, %s4023_s27  ;;  %2674 = vrot.lane.b32.xlu1 %v5959_v25, %s4023_s27 }
 0x4fe   : > { %2676 = vrot.lane.b32.xlu2 %v5927_v51, %s4023_s27 }
 0x505   : > { %2678 = vrot.lane.b32.xlu0 %v5929_v53, %s4023_s27  ;;  %2680 = vrot.lane.b32.xlu1 %v5969_v19, %s4023_s27 }
 0x506   : > { %2682 = vrot.lane.b32.xlu2 %v5941_v28, %s4023_s27 }
 0x50d   : > { %2684 = vrot.lane.b32.xlu0 %v5943_v49, %s4023_s27  ;;  %2686 = vrot.lane.b32.xlu1 %v5974_v33, %s4023_s27 }
 0x528   : > { %v2301_v18 = vpop.permute.xlu2 %2300 }
 0x53f   : > { %v2139_v62 = vpop.permute.xlu0 %2138  ;;  %v2231_v7 = vpop.permute.xlu1 %2230 }
 0x540   : > { %v2140_v8 = vrot.slane %v2139_v62, 4  ;;  %v2232_v37 = vrot.slane %v2231_v7, 4 }
 0x542   : > { %v2142_v23 = vsel %vm2141_vm6, %v2140_v8, %v2139_v62  ;;  %v2150_v0 = vunpack.c.l.b16 %v2140_v8  ;;  %v2151_v41 = vunpack.c.h.b16 %v2140_v8  ;;  %v2234_v22 = vsel %vm2233_vm1, %v2232_v37, %v2231_v7 }
 0x543   : > { %v2143_v40 = vunpack.c.l.b16 %v2142_v23  ;;  %v2144_v2 = vunpack.c.h.b16 %v2142_v23  ;;  %v2242_v17 = vunpack.c.l.b16 %v2232_v37  ;;  %v6068_v23 = vld [vmem:[%s5899_s26 + $0x54] sm:$0xff]  ;;  %v2235_v7 = vunpack.c.l.b16 %v2234_v22 }
 0x544   : > { %vm2154_vm13 = vcmp.ne.s32.totalorder %v2150_v0, %v5978_v10  ;;  %vm2155_vm10 = vcmp.ne.s32.totalorder %v2151_v41, %v5981_v13  ;;  %v6071_v0 = vld [vmem:[%s5899_s26 + $0x68] sm:$0xff]  ;;  %v2243_v41 = vunpack.c.h.b16 %v2232_v37 }
 0x545   : > { %vm2147_vm7 = vcmp.ne.s32.totalorder %v2143_v40, %v5978_v10  ;;  %vm2148_vm2 = vcmp.ne.s32.totalorder %v2144_v2, %v5981_v13  ;;  %vm5988_vm15 = vmpackc.low %vm2155_vm10, %vm2154_vm13  ;;  %v2302_v40 = vrot.slane %v2301_v18, 4  ;;  %vm6086_vm13 = vcmp.ne.s32.totalorder %v2242_v17, %v5978_v10 }
 0x546   : > { %v7820_v4 = vsel %vm5988_vm15, 4294967295, %v7819_v4  ;;  %vm5992_vm3 = vmpackc.low %vm2148_vm2, %vm2147_vm7  ;;  %vm2247_vm10 = vcmp.ne.s32.totalorder %v2243_v41, %v5981_v13 }
 0x547   : > { %7821 = vst [vmem:[#allocation92_spill] sm:$0xff] %v7820_v4  ;;  %v7823_v34 = vsel %vm5992_vm3, 4294967295, %v7822_v34  ;;  %v2196_v42 = vpop.permute.xlu0 %2195  ;;  %vm6103_vm7 = vmpackc.low %vm2247_vm10, %vm6086_vm13  ;;  %v2313_v17 = vunpack.c.h.b16 %v2302_v40  ;;  %vm2338_vm13 = vcmask 269312  }
 0x548   : > { %7824 = vst [vmem:[#allocation93_spill] sm:$0xff] %v7823_v34  ;;  %v2197_v35 = vrot.slane %v2196_v42, 4 }
 0x54a   : > { %v2199_v3 = vsel %vm2198_vm9, %v2197_v35, %v2196_v42  ;;  %v2207_v30 = vunpack.c.l.b16 %v2197_v35  ;;  %v2208_v61 = vunpack.c.h.b16 %v2197_v35 }
 0x54b   : > { %v2200_v12 = vunpack.c.l.b16 %v2199_v3  ;;  %v2201_v43 = vunpack.c.h.b16 %v2199_v3 }
 0x54c   : > { %vm2211_vm8 = vcmp.ne.s32.totalorder %v2207_v30, %v5978_v10  ;;  %vm2212_vm14 = vcmp.ne.s32.totalorder %v2208_v61, %v5981_v13 }
 0x54d   : > { %vm2204_vm0 = vcmp.ne.s32.totalorder %v2200_v12, %v5978_v10  ;;  %vm2205_vm12 = vcmp.ne.s32.totalorder %v2201_v43, %v5981_v13  ;;  %vm6013_vm4 = vmpackc.low %vm2212_vm14, %vm2211_vm8 }
 0x54e   : > { %vm6020_vm11 = vmpackc.low %vm2205_vm12, %vm2204_vm0  ;;  %v2215_v44 = vsel %vm6013_vm4, %v5998_v48, 0  ;;  %v2217_v32 = vsel %vm6013_vm4, %v6001_v14, 0  ;;  %v2219_v46 = vsel %vm6013_vm4, %v6018_v24, 0  ;;  %v2221_v16 = vsel %vm6013_vm4, %v6031_v54, 0 }
 0x54f   : > { %v2492_v26 = vunpack.c.l.b16 %v2215_v44  ;;  %v2495_v6 = vunpack.c.l.b16 %v2217_v32  ;;  %v2214_v52 = vsel %vm6020_vm11, %v6006_v27, 0  ;;  %v2216_v60 = vsel %vm6020_vm11, %v6009_v50, 0 }
 0x550   : > { %v2491_v20 = vunpack.c.h.b16 %v2214_v52  ;;  %v2494_v1 = vunpack.c.h.b16 %v2216_v60  ;;  %v2490_v36 = vunpack.c.l.b16 %v2214_v52  ;;  %v2493_v47 = vunpack.c.l.b16 %v2216_v60  ;;  %v6092_v60 = vld [vmem:[%s5899_s26 + $0x84] sm:$0xf] }
 0x551   : > { %v2516_v58 = vpack.c.b16 %v2495_v6, %v2492_v26  ;;  %v2218_v31 = vsel %vm6020_vm11, %v6040_v9, 0  ;;  %v2220_v57 = vsel %vm6020_vm11, %v6043_v15, 0  ;;  %v2498_v62 = vunpack.c.l.b16 %v2219_v46  ;;  %v6098_v46 = vld [vmem:[%s5899_s26 + $0x7c] sm:$0xff] }
 0x552   : > { %v2515_v11 = vpack.c.b16 %v2494_v1, %v2491_v20  ;;  %v2514_v45 = vpack.c.b16 %v2493_v47, %v2490_v36  ;;  %v2501_v8 = vunpack.c.l.b16 %v2221_v16  ;;  %v2497_v2 = vunpack.c.h.b16 %v2218_v31  ;;  %v6095_v20 = vld [vmem:[%s5899_s26 + $0x98] sm:$0xf] }
 0x553   : > { %2530 = vrot.lane.b32.xlu1 %v2516_v58, %s4024_s28  ;;  %v2500_v42 = vunpack.c.h.b16 %v2220_v57  ;;  %v2496_v35 = vunpack.c.l.b16 %v2218_v31  ;;  %v2499_v3 = vunpack.c.l.b16 %v2220_v57  ;;  %v2223_v30 = vsel %vm6013_vm4, %v6059_v29, 0  ;;  %v6108_v31 = vld [vmem:[%s5899_s26 + $0x90] sm:$0xff] }
 0x554   : > { %2528 = vrot.lane.b32.xlu0 %v2515_v11, %s4024_s28  ;;  %2526 = vrot.lane.b32.xlu2 %v2514_v45, %s4024_s28  ;;  %v2225_v61 = vsel %vm6013_vm4, %v6062_v56, 0  ;;  %v2222_v12 = vsel %vm6020_vm11, %v6068_v23, 0  ;;  %v2224_v43 = vsel %vm6020_vm11, %v6071_v0, 0  ;;  %v2519_v44 = vpack.c.b16 %v2501_v8, %v2498_v62 }
 0x555   : > { %v2236_v32 = vunpack.c.h.b16 %v2234_v22  ;;  %v2518_v26 = vpack.c.b16 %v2500_v42, %v2497_v2  ;;  %v2517_v6 = vpack.c.b16 %v2499_v3, %v2496_v35  ;;  %v2504_v52 = vunpack.c.l.b16 %v2223_v30  ;;  %v2336_v35 = vpop.permute.xlu2 %2335 }
 0x556   : > { %v2304_v1 = vsel %vm2303_vm5, %v2302_v40, %v2301_v18  ;;  %v2507_v36 = vunpack.c.l.b16 %v2225_v61  ;;  %v2503_v47 = vunpack.c.h.b16 %v2222_v12  ;;  %v2506_v58 = vunpack.c.h.b16 %v2224_v43 }
 0x557   : > { %v2305_v16 = vunpack.c.l.b16 %v2304_v1  ;;  %v2502_v11 = vunpack.c.l.b16 %v2222_v12  ;;  %v2306_v57 = vunpack.c.h.b16 %v2304_v1  ;;  %v2312_v22 = vunpack.c.l.b16 %v2302_v40 }
 0x558   : > { %v2505_v18 = vunpack.c.l.b16 %v2224_v43  ;;  %v2227_v62 = vsel %vm6013_vm4, %v6092_v60, 0  ;;  %v2229_v8 = vsel %vm6013_vm4, %v6095_v20, 0  ;;  %v2226_v41 = vsel %vm6020_vm11, %v6098_v46, 0 }
 0x559   : > { %vm2309_vm2 = vcmp.ne.s32.totalorder %v2305_v16, %v5978_v10  ;;  %vm2310_vm8 = vcmp.ne.s32.totalorder %v2306_v57, %v5981_v13  ;;  %vm2316_vm14 = vcmp.ne.s32.totalorder %v2312_v22, %v5978_v10  ;;  %vm2317_vm0 = vcmp.ne.s32.totalorder %v2313_v17, %v5981_v13 }
 0x55a   : > { %vm6126_vm12 = vcmp.ne.s32.totalorder %v2235_v7, %v5978_v10  ;;  %vm2240_vm1 = vcmp.ne.s32.totalorder %v2236_v32, %v5981_v13  ;;  %v2228_v5 = vsel %vm6020_vm11, %v6108_v31, 0  ;;  %vm6134_vm4 = vmpackc.low %vm2310_vm8, %vm2309_vm2  ;;  %v2250_v42 = vsel %vm6103_vm7, %v5998_v48, 0 }
 0x55b   : > { %2536 = vrot.lane.b32.xlu1 %v2519_v44, %s4024_s28  ;;  %v2522_v3 = vpack.c.b16 %v2507_v36, %v2504_v52  ;;  %v2521_v30 = vpack.c.b16 %v2506_v58, %v2503_v47  ;;  %vm6141_vm5 = vmpackc.low %vm2317_vm0, %vm2316_vm14  ;;  %v2337_v12 = vrot.slane %v2336_v35, 4  ;;  %v2520_v43 = vpack.c.b16 %v2505_v18, %v2502_v11  ;;  %v2266_v11 = vpop.permute.xlu1 %2265 }
 0x55c   : > { %2534 = vrot.lane.b32.xlu0 %v2518_v26, %s4024_s28  ;;  %2532 = vrot.lane.b32.xlu2 %v2517_v6, %s4024_s28  ;;  %v2510_v59 = vunpack.c.l.b16 %v2227_v62  ;;  %v2513_v7 = vunpack.c.l.b16 %v2229_v8  ;;  %v2509_v44 = vunpack.c.h.b16 %v2226_v41  ;;  %vm6147_vm11 = vmpackc.low %vm2240_vm1, %vm6126_vm12  ;;  %v2512_v37 = vunpack.c.h.b16 %v2228_v5 }
 0x55d   : > { %v2508_v26 = vunpack.c.l.b16 %v2226_v41  ;;  %v2339_v6 = vsel %vm2338_vm13, %v2337_v12, %v2336_v35  ;;  %v2347_v52 = vunpack.c.l.b16 %v2337_v12  ;;  %v2511_v1 = vunpack.c.l.b16 %v2228_v5 }
 0x55e   : > { %v2340_v36 = vunpack.c.l.b16 %v2339_v6  ;;  %v2341_v47 = vunpack.c.h.b16 %v2339_v6  ;;  %v2348_v58 = vunpack.c.h.b16 %v2337_v12  ;;  %v2252_v16 = vsel %vm6103_vm7, %v6001_v14, 0 }
 0x55f   : > { %vm2351_vm10 = vcmp.ne.s32.totalorder %v2347_v52, %v5978_v10  ;;  %v2249_v57 = vsel %vm6147_vm11, %v6006_v27, 0  ;;  %v2525_v22 = vpack.c.b16 %v2513_v7, %v2510_v59  ;;  %v2524_v17 = vpack.c.b16 %v2512_v37, %v2509_v44 }
 0x560   : > { %vm2344_vm2 = vcmp.ne.s32.totalorder %v2340_v36, %v5978_v10  ;;  %vm2345_vm8 = vcmp.ne.s32.totalorder %v2341_v47, %v5981_v13  ;;  %vm2352_vm14 = vcmp.ne.s32.totalorder %v2348_v58, %v5981_v13  ;;  %v2577_v18 = vunpack.c.l.b16 %v2250_v42 }
 0x561   : > { %vm6164_vm0 = vmpackc.low %vm2345_vm8, %vm2344_vm2  ;;  %v2523_v8 = vpack.c.b16 %v2511_v1, %v2508_v26  ;;  %v2580_v41 = vunpack.c.l.b16 %v2252_v16  ;;  %vm2268_vm1 = vcmask 138240   ;;  %v2267_v5 = vrot.slane %v2266_v11, 4 }
 0x562   : > { %vm6168_vm12 = vmpackc.low %vm2352_vm14, %vm2351_vm10  ;;  %v2251_v35 = vsel %vm6147_vm11, %v6009_v50, 0  ;;  %v2254_v42 = vsel %vm6103_vm7, %v6018_v24, 0  ;;  %v2256_v12 = vsel %vm6103_vm7, %v6031_v54, 0  ;;  %v2253_v44 = vsel %vm6147_vm11, %v6040_v9, 0 }
 0x563   : > { %2542 = vrot.lane.b32.xlu1 %v2522_v3, %s4024_s28  ;;  %v2576_v3 = vunpack.c.h.b16 %v2249_v57  ;;  %v2277_v59 = vunpack.c.l.b16 %v2267_v5  ;;  %v2278_v7 = vunpack.c.h.b16 %v2267_v5  ;;  %v2255_v37 = vsel %vm6147_vm11, %v6043_v15, 0  ;;  %v6345_v19 = vpop.permute.xlu1 %2456 }
 0x564   : > { %2540 = vrot.lane.b32.xlu0 %v2521_v30, %s4024_s28  ;;  %2538 = vrot.lane.b32.xlu2 %v2520_v43, %s4024_s28  ;;  %v2575_v30 = vunpack.c.l.b16 %v2249_v57  ;;  %v2269_v43 = vsel %vm2268_vm1, %v2267_v5, %v2266_v11  ;;  %v2258_v52 = vsel %vm6103_vm7, %v6059_v29, 0  ;;  %v2260_v1 = vsel %vm6103_vm7, %v6062_v56, 0  ;;  %7851 = vst [vmem:[#allocation96_spill] sm:$0xff] %v6345_v19 }
 0x565   : > { %v2270_v26 = vunpack.c.l.b16 %v2269_v43  ;;  %v2271_v6 = vunpack.c.h.b16 %v2269_v43  ;;  %vm2281_vm13 = vcmp.ne.s32.totalorder %v2277_v59, %v5978_v10  ;;  %vm2282_vm10 = vcmp.ne.s32.totalorder %v2278_v7, %v5981_v13 }
 0x566   : > { %v2579_v36 = vunpack.c.h.b16 %v2251_v35  ;;  %v2578_v47 = vunpack.c.l.b16 %v2251_v35  ;;  %vm6198_vm14 = vmpackc.low %vm2282_vm10, %vm2281_vm13  ;;  %v6204_v16 = vunpack.c.l.b16 %v2254_v42  ;;  %v6206_v11 = vunpack.c.l.b16 %v2256_v12 }
 0x567   : > { %vm2274_vm2 = vcmp.ne.s32.totalorder %v2270_v26, %v5978_v10  ;;  %vm2275_vm8 = vcmp.ne.s32.totalorder %v2271_v6, %v5981_v13  ;;  %v2582_v57 = vunpack.c.h.b16 %v2253_v44  ;;  %v2581_v10 = vunpack.c.l.b16 %v2253_v44 }
 0x568   : > { %vm6208_vm1 = vmpackc.low %vm2275_vm8, %vm2274_vm2  ;;  %v2584_v13 = vunpack.c.l.b16 %v2255_v37  ;;  %v6212_v35 = vunpack.c.l.b16 %v2258_v52  ;;  %v6214_v43 = vunpack.c.l.b16 %v2260_v1  ;;  %v2601_v59 = vpack.c.b16 %v2580_v41, %v2577_v18 }
 0x569   : > { %v2287_v42 = vsel %vm6198_vm14, %v6001_v14, 0  ;;  %v2600_v12 = vpack.c.b16 %v2579_v36, %v2576_v3  ;;  %v6230_v7 = vsel %vm6147_vm11, %v6071_v0, 0  ;;  %v2599_v44 = vpack.c.b16 %v2578_v47, %v2575_v30 }
 0x56a   : > { %v6234_v41 = vunpack.c.l.b16 %v2287_v42  ;;  %v2262_v6 = vsel %vm6103_vm7, %v6092_v60, 0  ;;  %v2602_v52 = vpack.c.b16 %v2584_v13, %v2581_v10  ;;  %v2284_v10 = vsel %vm6208_vm1, %v6006_v27, 0 }
 0x56b   : > { %2548 = vrot.lane.b32.xlu1 %v2525_v22, %s4024_s28  ;;  %v2585_v22 = vunpack.c.h.b16 %v2255_v37  ;;  %v2604_v37 = vpack.c.b16 %v6206_v11, %v6204_v16  ;;  %v2264_v11 = vsel %vm6103_vm7, %v6095_v20, 0  ;;  %v2286_v13 = vsel %vm6208_vm1, %v6009_v50, 0 }
 0x56c   : > { %2546 = vrot.lane.b32.xlu0 %v2524_v17, %s4024_s28  ;;  %2544 = vrot.lane.b32.xlu2 %v2523_v8, %s4024_s28  ;;  %v6219_v17 = vsel %vm6147_vm11, %v6068_v23, 0  ;;  %v2285_v8 = vsel %vm6198_vm14, %v5998_v48, 0  ;;  %v2714_v45 = vunpack.c.h.b16 %v2284_v10  ;;  %v2713_v42 = vunpack.c.l.b16 %v2284_v10 }
 0x56d   : > { %v6232_v18 = vunpack.c.l.b16 %v2285_v8  ;;  %v2603_v26 = vpack.c.b16 %v2585_v22, %v2582_v57  ;;  %v6246_v8 = vpop.permute.xlu2 %2458  ;;  %v6255_v57 = vunpack.c.l.b16 %v2262_v6  ;;  %v6260_v22 = vsel %vm6147_vm11, %v6098_v46, 0 }
 0x56e   : > { %7849 = vst [vmem:[#allocation94_spill] sm:$0xff] %v6246_v8  ;;  %v2716_v6 = vunpack.c.l.b16 %v2286_v13  ;;  %v6270_v36 = vunpack.c.l.b16 %v2264_v11  ;;  %v6275_v3 = vsel %vm6147_vm11, %v6108_v31, 0  ;;  %v6280_v16 = vsel %vm6134_vm4, %v6006_v27, 0 }
 0x56f   : > { %v2288_v32 = vsel %vm6208_vm1, %v6040_v9, 0  ;;  %v2290_v47 = vsel %vm6208_vm1, %v6043_v15, 0  ;;  %v2293_v30 = vsel %vm6198_vm14, %v6059_v29, 0  ;;  %v2295_v10 = vsel %vm6198_vm14, %v6062_v56, 0 }
 0x570   : > { %v6304_v1 = vunpack.c.l.b16 %v2293_v30  ;;  %v6306_v8 = vunpack.c.l.b16 %v2295_v10  ;;  %v2292_v4 = vsel %vm6208_vm1, %v6068_v23, 0  ;;  %v2294_v28 = vsel %vm6208_vm1, %v6071_v0, 0 }
 0x571   : > { %v2726_v49 = vunpack.c.h.b16 %v2292_v4  ;;  %v2725_v33 = vunpack.c.l.b16 %v2292_v4  ;;  %v2728_v10 = vunpack.c.l.b16 %v2294_v28  ;;  %v2299_v4 = vsel %vm6198_vm14, %v6095_v20, 0 }
 0x572   : > { %v2799_v5 = vunpack.c.h.b16 %v6280_v16  ;;  %v2798_v19 = vunpack.c.l.b16 %v6280_v16  ;;  %v7852_v25 = vunpack.c.h.b16 %v6219_v17  ;;  %v7853_v38 = vunpack.c.h.b16 %v6230_v7 }
 0x573   : > { %2615 = vrot.lane.b32.xlu1 %v2601_v59, %s4025_s30  ;;  %v2717_v59 = vunpack.c.h.b16 %v2286_v13  ;;  %v6289_v13 = vpack.c.b16 %v2716_v6, %v2713_v42  ;;  %v2723_v42 = vunpack.c.h.b16 %v2290_v47  ;;  %v2719_v6 = vunpack.c.l.b16 %v2288_v32 }
 0x574   : > { %2613 = vrot.lane.b32.xlu0 %v2600_v12, %s4025_s30  ;;  %2611 = vrot.lane.b32.xlu2 %v2599_v44, %s4025_s30  ;;  %v2321_v12 = vsel %vm6134_vm4, %v6009_v50, 0  ;;  %v2722_v44 = vunpack.c.l.b16 %v2290_v47  ;;  %v2729_v47 = vunpack.c.h.b16 %v2294_v28  ;;  %v2298_v28 = vsel %vm6208_vm1, %v6108_v31, 0 }
 0x575   : > { %v6287_v11 = vpack.c.b16 %v2717_v59, %v2714_v45  ;;  %v2597_v45 = vunpack.c.h.b16 %v6275_v3  ;;  %v2720_v59 = vunpack.c.h.b16 %v2288_v32  ;;  %v2734_v53 = vunpack.c.l.b16 %v2298_v28 }
 0x576   : > { %v6317_v32 = vpack.c.b16 %v2722_v44, %v2719_v6  ;;  %v6343_v6 = vunpack.c.l.b16 %v2299_v4  ;;  %v2802_v39 = vunpack.c.h.b16 %v2321_v12  ;;  %v2801_v63 = vunpack.c.l.b16 %v2321_v12 }
 0x577   : > { %v6311_v34 = vpack.c.b16 %v2723_v42, %v2720_v59  ;;  %v6323_v59 = vpop.permute.xlu2 %2464  ;;  %v2297_v42 = vsel %vm6198_vm14, %v6092_v60, 0  ;;  %v2606_v55 = vpack.c.b16 %v7853_v38, %v7852_v25  ;;  %v7856_v16 = vpack.c.b16 %v6214_v43, %v6212_v35 }
 0x578   : > { %7850 = vst [vmem:[#allocation95_spill] sm:$0xff] %v6323_v59  ;;  %v6341_v44 = vunpack.c.l.b16 %v2297_v42  ;;  %v2735_v59 = vunpack.c.h.b16 %v2298_v28  ;;  %v2596_v28 = vunpack.c.l.b16 %v6275_v3  ;;  %v2323_v3 = vsel %vm6134_vm4, %v6040_v9, 0 }
 0x579   : > { %v6385_v12 = vpack.c.b16 %v2802_v39, %v2799_v5  ;;  %v6387_v38 = vpack.c.b16 %v2801_v63, %v2798_v19  ;;  %v2325_v25 = vsel %vm6134_vm4, %v6043_v15, 0  ;;  %v7857_v35 = vunpack.c.h.b16 %v6260_v22 }
 0x57a   : > { %v7858_v63 = vunpack.c.l.b16 %v6260_v22  ;;  %v2807_v43 = vunpack.c.l.b16 %v2325_v25  ;;  %v2328_v5 = vsel %vm6141_vm5, %v6059_v29, 0  ;;  %v2327_v22 = vsel %vm6134_vm4, %v6068_v23, 0 }
 0x57b   : > { %2621 = vrot.lane.b32.xlu1 %v2604_v37, %s4025_s30  ;;  %v2296_v37 = vsel %vm6208_vm1, %v6098_v46, 0  ;;  %v2609_v39 = vpack.c.b16 %v2597_v45, %v7857_v35  ;;  %v2334_v35 = vsel %vm6141_vm5, %v6095_v20, 0  ;;  %v2357_v2 = vsel %vm6168_vm12, %v6001_v14, 0 }
 0x57c   : > { %2619 = vrot.lane.b32.xlu0 %v2603_v26, %s4025_s30  ;;  %2617 = vrot.lane.b32.xlu2 %v2602_v52, %s4025_s30  ;;  %v6337_v26 = vpack.c.b16 %v2729_v47, %v2726_v49  ;;  %v6339_v52 = vpack.c.b16 %v2728_v10, %v2725_v33  ;;  %v2732_v30 = vunpack.c.h.b16 %v2296_v37  ;;  %v2731_v51 = vunpack.c.l.b16 %v2296_v37  ;;  %v6356_v47 = vpop.permute.xlu0 %2454 }
 0x57d   : > { %v2320_v49 = vsel %vm6141_vm5, %v5998_v48, 0  ;;  %v2322_v33 = vsel %vm6141_vm5, %v6001_v14, 0  ;;  %v2608_v19 = vpack.c.b16 %v2596_v28, %v7858_v63  ;;  %v2360_v58 = vsel %vm6164_vm0, %v6043_v15, 0 }
 0x57e   : > { %v6358_v10 = vpack.c.b16 %v2735_v59, %v2732_v30  ;;  %v6360_v42 = vpack.c.b16 %v2734_v53, %v2731_v51  ;;  %v6362_v4 = vunpack.c.l.b16 %v2320_v49  ;;  %v6364_v37 = vunpack.c.l.b16 %v2322_v33 }
 0x57f   : > { %v7854_v30 = vunpack.c.l.b16 %v6219_v17  ;;  %v7855_v51 = vunpack.c.l.b16 %v6230_v7  ;;  %v2610_v17 = vpack.c.b16 %v6270_v36, %v6255_v57  ;;  %v2805_v7 = vunpack.c.h.b16 %v2323_v3 }
 0x580   : > { %v2808_v49 = vunpack.c.h.b16 %v2325_v25  ;;  %v2804_v33 = vunpack.c.l.b16 %v2323_v3  ;;  %v2330_v36 = vsel %vm6141_vm5, %v6062_v56, 0  ;;  %v6410_v57 = vunpack.c.l.b16 %v2328_v5 }
 0x581   : > { %v2605_v53 = vpack.c.b16 %v7855_v51, %v7854_v30  ;;  %v6417_v28 = vunpack.c.l.b16 %v2330_v36  ;;  %v2329_v51 = vsel %vm6134_vm4, %v6071_v0, 0  ;;  %v2365_v15 = vsel %vm6168_vm12, %v6062_v56, 0 }
 0x582   : > { %v6405_v30 = vpack.c.b16 %v2808_v49, %v2805_v7  ;;  %v6415_v45 = vpack.c.b16 %v2807_v43, %v2804_v33  ;;  %v2814_v3 = vunpack.c.h.b16 %v2329_v51  ;;  %v2813_v25 = vunpack.c.l.b16 %v2329_v51  ;;  %v6425_v49 = vpop.permute.xlu1 %2462 }
 0x583   : > { %2627 = vrot.lane.b32.xlu1 %v7856_v16, %s4025_s30  ;;  %v2810_v16 = vunpack.c.l.b16 %v2327_v22  ;;  %v2332_v7 = vsel %vm6141_vm5, %v6092_v60, 0  ;;  %7860 = vst [vmem:[#allocation98_spill] sm:$0xff] %v6425_v49  ;;  %v2331_v43 = vsel %vm6134_vm4, %v6098_v46, 0  ;;  %v6443_v51 = vunpack.c.l.b16 %v2334_v35 }
 0x584   : > { %2625 = vrot.lane.b32.xlu0 %v2606_v55, %s4025_s30  ;;  %2623 = vrot.lane.b32.xlu2 %v2605_v53, %s4025_s30  ;;  %v6403_v55 = vpop.permute.xlu2 %2664  ;;  %v2811_v53 = vunpack.c.h.b16 %v2327_v22  ;;  %v6432_v63 = vunpack.c.l.b16 %v2332_v7  ;;  %v6437_v5 = vpop.permute.xlu0 %2460  ;;  %v2333_v33 = vsel %vm6134_vm4, %v6108_v31, 0  ;;  %v2817_v7 = vunpack.c.h.b16 %v2331_v43 }
 0x585   : > { %7859 = vst [vmem:[#allocation97_spill] sm:$0xff] %v6403_v55  ;;  %v6441_v22 = vpack.c.b16 %v2813_v25, %v2810_v16  ;;  %v2820_v59 = vunpack.c.h.b16 %v2333_v33  ;;  %v2816_v55 = vunpack.c.l.b16 %v2331_v43  ;;  %v2819_v49 = vunpack.c.l.b16 %v2333_v33 }
 0x586   : > { %v6439_v36 = vpack.c.b16 %v2814_v3, %v2811_v53  ;;  %v2355_v3 = vsel %vm6168_vm12, %v5998_v48, 0  ;;  %v6471_v33 = vunpack.c.l.b16 %v2357_v2  ;;  %v2356_v48 = vsel %vm6164_vm0, %v6009_v50, 0 }
 0x587   : > { %v6467_v16 = vpack.c.b16 %v2819_v49, %v2816_v55  ;;  %v6469_v25 = vunpack.c.l.b16 %v2355_v3  ;;  %v2920_v43 = vunpack.c.h.b16 %v2356_v48  ;;  %v2919_v53 = vunpack.c.l.b16 %v2356_v48 }
 0x588   : > { %v2926_v48 = vunpack.c.h.b16 %v2360_v58  ;;  %v7862_v49 = vpack.c.b16 %v6234_v41, %v6232_v18  ;;  %vm2858_vm7 = vcmask 785408   ;;  %vm2635_vm4 = vcmask 916480  }
 0x589   : > { %vm2688_vm11 = vcmask 908288  }
 0x58b   : > { %2633 = vrot.lane.b32.xlu1 %v2610_v17, %s4025_s30  ;;  %v2354_v17 = vsel %vm6164_vm0, %v6006_v27, 0  ;;  %v2291_v27 = vsel %vm6198_vm14, %v6031_v54, 0 }
 0x58c   : > { %2631 = vrot.lane.b32.xlu0 %v2609_v39, %s4025_s30  ;;  %2629 = vrot.lane.b32.xlu2 %v2608_v19, %s4025_s30  ;;  %v2289_v39 = vsel %vm6198_vm14, %v6018_v24, 0  ;;  %v6465_v19 = vpack.c.b16 %v2820_v59, %v2817_v7  ;;  %v2917_v14 = vunpack.c.h.b16 %v2354_v17  ;;  %v2916_v35 = vunpack.c.l.b16 %v2354_v17  ;;  %v6479_v59 = vpop.permute.xlu2 %2670  ;;  %v6515_v18 = vpop.permute.xlu0 %2466 }
 0x58d   : > { %7861 = vst [vmem:[#allocation99_spill] sm:$0xff] %v6479_v59  ;;  %v2721_v55 = vunpack.c.l.b16 %v2289_v39  ;;  %v2358_v7 = vsel %vm6164_vm0, %v6040_v9, 0  ;;  %v2724_v17 = vunpack.c.l.b16 %v2291_v27  ;;  %v2925_v39 = vunpack.c.l.b16 %v2360_v58  ;;  %v6497_v9 = vpop.permute.xlu1 %2468 }
 0x58e   : > { %v6486_v3 = vpack.c.b16 %v2920_v43, %v2917_v14  ;;  %v6488_v50 = vpack.c.b16 %v2919_v53, %v2916_v35  ;;  %v2923_v2 = vunpack.c.h.b16 %v2358_v7  ;;  %v2922_v59 = vunpack.c.l.b16 %v2358_v7 }
 0x58f   : > { %v2363_v53 = vsel %vm6168_vm12, %v6059_v29, 0  ;;  %v2362_v14 = vsel %vm6164_vm0, %v6068_v23, 0  ;;  %v2364_v35 = vsel %vm6164_vm0, %v6071_v0, 0  ;;  %v6523_v27 = vunpack.c.l.b16 %v2365_v15 }
 0x590   : > { %v6517_v29 = vpack.c.b16 %v2926_v48, %v2923_v2  ;;  %v6519_v41 = vpack.c.b16 %v2925_v39, %v2922_v59  ;;  %v6521_v56 = vunpack.c.l.b16 %v2363_v53  ;;  %v2929_v23 = vunpack.c.h.b16 %v2362_v14 }
 0x591   : > { %v2932_v43 = vunpack.c.h.b16 %v2364_v35  ;;  %v2931_v0 = vunpack.c.l.b16 %v2364_v35  ;;  %v2369_v59 = vsel %vm6168_vm12, %v6095_v20, 0  ;;  %v2742_v39 = vpack.c.b16 %v2724_v17, %v2721_v55 }
 0x592   : > { %v6539_v48 = vunpack.c.l.b16 %v2369_v59  ;;  %v2366_v53 = vsel %vm6164_vm0, %v6098_v46, 0  ;;  %v7865_v17 = vpack.c.b16 %v6306_v8, %v6304_v1 }
 0x593   : > { %2753 = vrot.lane.b32.xlu1 %v7862_v49, %s4026_s6  ;;  %v2928_v49 = vunpack.c.l.b16 %v2362_v14  ;;  %v6533_v7 = vpack.c.b16 %v2932_v43, %v2929_v23  ;;  %v2935_v15 = vunpack.c.h.b16 %v2366_v53  ;;  %v2934_v35 = vunpack.c.l.b16 %v2366_v53 }
 0x594   : > { %2751 = vrot.lane.b32.xlu0 %v6287_v11, %s4026_s6  ;;  %2749 = vrot.lane.b32.xlu2 %v6289_v13, %s4026_s6  ;;  %v2948_v11 = vpack.c.b16 %v6523_v27, %v6521_v56  ;;  %v2367_v13 = vsel %vm6168_vm12, %v6092_v60, 0  ;;  %v2368_v60 = vsel %vm6164_vm0, %v6108_v31, 0  ;;  %v6549_v23 = vpop.permute.xlu2 %2676  ;;  %v6562_v62 = vpop.permute.xlu0 %2666  ;;  %vm3367_vm0 = vcmask 523264  }
 0x595   : > { %v6535_v58 = vpack.c.b16 %v2931_v0, %v2928_v49  ;;  %v6537_v2 = vunpack.c.l.b16 %v2367_v13  ;;  %v2938_v14 = vunpack.c.h.b16 %v2368_v60  ;;  %v2937_v43 = vunpack.c.l.b16 %v2368_v60  ;;  %v6560_v31 = vpop.permute.xlu1 %2668  ;;  %7864 = vst [vmem:[#allocation101_spill] sm:$0xff] %v6562_v62 }
 0x596   : > { %7863 = vst [vmem:[#allocation100_spill] sm:$0xff] %v6560_v31  ;;  %v7867_v0 = vpack.c.b16 %v6343_v6, %v6341_v44  ;;  %v2326_v44 = vsel %vm6141_vm5, %v6031_v54, 0  ;;  %v7869_v6 = vpack.c.b16 %v6364_v37, %v6362_v4  ;;  %v7871_v4 = vpack.c.b16 %v6417_v28, %v6410_v57 }
 0x597   : > { %v2951_v20 = vpack.c.b16 %v6539_v48, %v6537_v2  ;;  %v6552_v55 = vpack.c.b16 %v2938_v14, %v2935_v15  ;;  %v6558_v46 = vpack.c.b16 %v2937_v43, %v2934_v35  ;;  %v7877_v15 = vld [vmem:[#allocation83_spill] sm:$0xff]  ;;  %v7879_v43 = vld [vmem:[#allocation90_spill] sm:$0xff] }
 0x59b   : > { %2759 = vrot.lane.b32.xlu1 %v2742_v39, %s4026_s6 }
 0x59c   : > { %2757 = vrot.lane.b32.xlu0 %v6311_v34, %s4026_s6  ;;  %2755 = vrot.lane.b32.xlu2 %v6317_v32, %s4026_s6  ;;  %v6572_v34 = vpop.permute.xlu2 %2682  ;;  %v6576_v49 = vpop.permute.xlu0 %2672 }
 0x59d   : > { %v6574_v32 = vpop.permute.xlu1 %2674 }
 0x59e   : > { %7866 = vst [vmem:[#allocation102_spill] sm:$0xff] %v6574_v32  ;;  %v2124_v32 = vld [vmem:[%s5899_s26 + $0x50] sm:$0xff] }
 0x5a3   : > { %2765 = vrot.lane.b32.xlu1 %v7865_v17, %s4026_s6  ;;  %v7880_v17 = vld [vmem:[#allocation86_spill] sm:$0xff] }
 0x5a4   : > { %2763 = vrot.lane.b32.xlu0 %v6337_v26, %s4026_s6  ;;  %2761 = vrot.lane.b32.xlu2 %v6339_v52, %s4026_s6  ;;  %v6590_v26 = vpop.permute.xlu0 %2678  ;;  %v2324_v52 = vsel %vm6141_vm5, %v6018_v24, 0  ;;  %vm2773_vm5 = vcmask 900096  }
 0x5a5   : > { %v6588_v8 = vpop.permute.xlu1 %2680 }
 0x5a6   : > { %7868 = vst [vmem:[#allocation103_spill] sm:$0xff] %v6588_v8  ;;  %v2126_v8 = vld [vmem:[%s5899_s26 + $0x64] sm:$0xff] }
 0x5ab   : > { %2771 = vrot.lane.b32.xlu1 %v7867_v0, %s4026_s6  ;;  %v7881_v0 = vld [vmem:[#allocation85_spill] sm:$0xff] }
 0x5ac   : > { %2769 = vrot.lane.b32.xlu0 %v6358_v10, %s4026_s6  ;;  %2767 = vrot.lane.b32.xlu2 %v6360_v42, %s4026_s6  ;;  %v2806_v10 = vunpack.c.l.b16 %v2324_v52  ;;  %v2809_v42 = vunpack.c.l.b16 %v2326_v44  ;;  %v6607_v53 = vpop.permute.xlu0 %2684 }
 0x5ad   : > { %v6605_v39 = vpop.permute.xlu1 %2686 }
 0x5ae   : > { %v6586_v1 = vpop.permute.xlu2 %2526  ;;  %v2827_v59 = vpack.c.b16 %v2809_v42, %v2806_v10  ;;  %7870 = vst [vmem:[#allocation104_spill] sm:$0xff] %v6605_v39  ;;  %v7883_v10 = vld [vmem:[#allocation91_spill] sm:$0xff]  ;;  %v7884_v42 = vld [vmem:[#allocation88_spill] sm:$0xff] }
 0x5b3   : > { %2838 = vrot.lane.b32.xlu1 %v7869_v6, %s4027_s7 }
 0x5b4   : > { %2836 = vrot.lane.b32.xlu0 %v6385_v12, %s4027_s7  ;;  %2834 = vrot.lane.b32.xlu2 %v6387_v38, %s4027_s7 }
 0x5b6   : > { %v6603_v13 = vpop.permute.xlu2 %2532 }
 0x5bb   : > { %2844 = vrot.lane.b32.xlu1 %v2827_v59, %s4027_s7  ;;  %v7885_v59 = vld [vmem:[#allocation87_spill] sm:$0xff] }
 0x5bc   : > { %2842 = vrot.lane.b32.xlu0 %v6405_v30, %s4027_s7  ;;  %2840 = vrot.lane.b32.xlu2 %v6415_v45, %s4027_s7  ;;  %v7872_v30 = vpack.c.b16 %v6443_v51, %v6432_v63 }
 0x5be   : > { %v6611_v61 = vpop.permute.xlu2 %2538 }
 0x5c3   : > { %2850 = vrot.lane.b32.xlu1 %v7871_v4, %s4027_s7 }
 0x5c4   : > { %2848 = vrot.lane.b32.xlu0 %v6439_v36, %s4027_s7  ;;  %2846 = vrot.lane.b32.xlu2 %v6441_v22, %s4027_s7  ;;  %v7873_v36 = vld [vmem:[#allocation82_spill] sm:$0xff]  ;;  %v7874_v22 = vld [vmem:[#allocation81_spill] sm:$0xff] }
 0x5c5   : > { %v6618_v37 = vpop.permute.xlu1 %2530 }
 0x5c6   : > { %v6620_v12 = vpop.permute.xlu0 %2528  ;;  %v6622_v38 = vpop.permute.xlu2 %2544 }
 0x5cb   : > { %2856 = vrot.lane.b32.xlu1 %v7872_v30, %s4027_s7 }
 0x5cc   : > { %2854 = vrot.lane.b32.xlu0 %v6465_v19, %s4027_s7  ;;  %2852 = vrot.lane.b32.xlu2 %v6467_v16, %s4027_s7  ;;  %v7875_v19 = vld [vmem:[#allocation89_spill] sm:$0xff]  ;;  %v7876_v16 = vld [vmem:[#allocation84_spill] sm:$0xff] }
 0x5cd   : > { %v6629_v57 = vpop.permute.xlu1 %2536 }
 0x5ce   : > { %v6631_v45 = vpop.permute.xlu0 %2534  ;;  %v6633_v28 = vpop.permute.xlu2 %2611 }
 0x5d3   : > { %2871 = vrot.lane.b32.xlu1 %v5952_v21, %s4028_s8 }
 0x5d4   : > { %2869 = vrot.lane.b32.xlu0 %v7873_v36, %s4028_s8  ;;  %2867 = vrot.lane.b32.xlu2 %v7874_v22, %s4028_s8  ;;  %v2359_v22 = vsel %vm6168_vm12, %v6018_v24, 0 }
 0x5d5   : > { %v6638_v60 = vpop.permute.xlu1 %2542 }
 0x5d6   : > { %v6640_v63 = vpop.permute.xlu0 %2540  ;;  %v6642_v51 = vpop.permute.xlu2 %2617 }
 0x5db   : > { %2877 = vrot.lane.b32.xlu1 %v7875_v19, %s4028_s8  ;;  %v2361_v19 = vsel %vm6168_vm12, %v6031_v54, 0 }
 0x5dc   : > { %2875 = vrot.lane.b32.xlu0 %v7876_v16, %s4028_s8  ;;  %2873 = vrot.lane.b32.xlu2 %v7877_v15, %s4028_s8  ;;  %v7886_v16 = vpack.c.b16 %v6471_v33, %v6469_v25 }
 0x5dd   : > { %v6647_v14 = vpop.permute.xlu1 %2548 }
 0x5de   : > { %7878 = vst [vmem:[#allocation82_spill] sm:$0xff] %v6647_v14  ;;  %v6649_v35 = vpop.permute.xlu0 %2546  ;;  %v6651_v21 = vpop.permute.xlu2 %2623  ;;  %v2121_v14 = vld [vmem:[%s5899_s26 + $0x30] sm:$0xf] }
 0x5e3   : > { %2883 = vrot.lane.b32.xlu1 %v7879_v43, %s4028_s8  ;;  %v2924_v43 = vunpack.c.l.b16 %v2359_v22 }
 0x5e4   : > { %2881 = vrot.lane.b32.xlu0 %v7880_v17, %s4028_s8  ;;  %2879 = vrot.lane.b32.xlu2 %v7881_v0, %s4028_s8  ;;  %v2927_v17 = vunpack.c.l.b16 %v2361_v19 }
 0x5e5   : > { %v6656_v52 = vpop.permute.xlu1 %2615 }
 0x5e6   : > { %7882 = vst [vmem:[#allocation81_spill] sm:$0xff] %v6656_v52  ;;  %v6658_v44 = vpop.permute.xlu0 %2613  ;;  %v6660_v6 = vpop.permute.xlu2 %2629  ;;  %v2945_v54 = vpack.c.b16 %v2927_v17, %v2924_v43  ;;  %v2120_v43 = vld [vmem:[%s5899_s26 + $0x28] sm:$0xff]  ;;  %v2122_v17 = vld [vmem:[%s5899_s26 + $0x3c] sm:$0xff] }
 0x5eb   : > { %2889 = vrot.lane.b32.xlu1 %v7883_v10, %s4028_s8  ;;  %v2118_v10 = vld [vmem:[%s5899_s26 + $0x14] sm:$0xff] }
 0x5ec   : > { %2887 = vrot.lane.b32.xlu0 %v7884_v42, %s4028_s8  ;;  %2885 = vrot.lane.b32.xlu2 %v7885_v59, %s4028_s8  ;;  %v2159_v27 = vsel %vm5992_vm3, %v2118_v10, 0 }
 0x5ed   : > { %v6665_v4 = vpop.permute.xlu1 %2621 }
 0x5ee   : > { %v6667_v30 = vpop.permute.xlu0 %2619  ;;  %v6669_v36 = vpop.permute.xlu2 %2749 }
 0x5f3   : > { %2956 = vrot.lane.b32.xlu1 %v7886_v16, %s4029_s9  ;;  %v2389_v16 = vunpack.c.l.b16 %v2159_v27 }
 0x5f4   : > { %2954 = vrot.lane.b32.xlu0 %v6486_v3, %s4029_s9  ;;  %2952 = vrot.lane.b32.xlu2 %v6488_v50, %s4029_s9 }
 0x5f5   : > { %v6682_v15 = vpop.permute.xlu1 %2627 }
 0x5f6   : > { %v6684_v0 = vpop.permute.xlu0 %2625  ;;  %v6686_v24 = vpop.permute.xlu2 %2755 }
 0x5fb   : > { %2962 = vrot.lane.b32.xlu1 %v2945_v54, %s4029_s9  ;;  %v2117_v54 = vld [vmem:[%s5899_s26 + $0x8] sm:$0xf] }
 0x5fc   : > { %2960 = vrot.lane.b32.xlu0 %v6517_v29, %s4029_s9  ;;  %2958 = vrot.lane.b32.xlu2 %v6519_v41, %s4029_s9  ;;  %v2116_v41 = vld [vmem:[%s5899_s26] sm:$0xff]  ;;  %v2158_v10 = vsel %vm5988_vm15, %v2117_v54, 0 }
 0x5fd   : > { %v6690_v40 = vpop.permute.xlu1 %2633  ;;  %v2157_v56 = vsel %vm5992_vm3, %v2116_v41, 0  ;;  %v2119_v41 = vld [vmem:[%s5899_s26 + $0x1c] sm:$0xf] }
 0x5fe   : > { %v6692_v25 = vpop.permute.xlu0 %2631  ;;  %v6694_v33 = vpop.permute.xlu2 %2761  ;;  %v2386_v19 = vunpack.c.l.b16 %v2157_v56 }
 0x600   : > { %v2410_v48 = vpack.c.b16 %v2389_v16, %v2386_v19 }
 0x603   : > { %2968 = vrot.lane.b32.xlu1 %v2948_v11, %s4029_s9 }
 0x604   : > { %2966 = vrot.lane.b32.xlu0 %v6533_v7, %s4029_s9  ;;  %2964 = vrot.lane.b32.xlu2 %v6535_v58, %s4029_s9  ;;  %v2387_v7 = vunpack.c.h.b16 %v2157_v56  ;;  %v2390_v58 = vunpack.c.h.b16 %v2159_v27  ;;  %v2160_v56 = vsel %vm5988_vm15, %v2119_v41, 0  ;;  %v7892_v27 = vld [vmem:[#allocation3_spill] sm:$0xff] }
 0x605   : > { %v6701_v3 = vpop.permute.xlu1 %2753  ;;  %v2123_v41 = vld [vmem:[%s5899_s26 + $0x44] sm:$0xf] }
 0x606   : > { %7887 = vst [vmem:[#allocation89_spill] sm:$0xff] %v6701_v3  ;;  %v6703_v50 = vpop.permute.xlu0 %2751  ;;  %v6705_v29 = vpop.permute.xlu2 %2767  ;;  %v2411_v2 = vpack.c.b16 %v2390_v58, %v2387_v7 }
 0x60b   : > { %2974 = vrot.lane.b32.xlu1 %v2951_v20, %s4029_s9  ;;  %v2161_v20 = vsel %vm5992_vm3, %v2120_v43, 0 }
 0x60c   : > { %2972 = vrot.lane.b32.xlu0 %v6552_v55, %s4029_s9  ;;  %2970 = vrot.lane.b32.xlu2 %v6558_v46, %s4029_s9  ;;  %v2163_v55 = vsel %vm5992_vm3, %v2122_v17, 0  ;;  %v2393_v58 = vunpack.c.h.b16 %v2161_v20  ;;  %v2388_v17 = vunpack.c.l.b16 %v2158_v10  ;;  %v2392_v31 = vunpack.c.l.b16 %v2161_v20 }
 0x60d   : > { %v6718_v11 = vpop.permute.xlu1 %2759  ;;  %v2396_v19 = vunpack.c.h.b16 %v2163_v55  ;;  %v2395_v54 = vunpack.c.l.b16 %v2163_v55  ;;  %v2162_v20 = vsel %vm5988_vm15, %v2121_v14, 0  ;;  %v2164_v55 = vsel %vm5988_vm15, %v2123_v41, 0  ;;  %v2127_v41 = vld [vmem:[%s5899_s26 + $0x6c] sm:$0xf] }
 0x60e   : > { %7889 = vst [vmem:[#allocation84_spill] sm:$0xff] %v6718_v11  ;;  %v6720_v59 = vpop.permute.xlu0 %2757  ;;  %v6722_v22 = vpop.permute.xlu2 %2834 }
 0x60f   : > { %7890 = vst [vmem:[#allocation83_spill] sm:$0xff] %v6722_v22  ;;  %v2414_v39 = vpack.c.b16 %v2396_v19, %v2393_v58  ;;  %v2413_v3 = vpack.c.b16 %v2395_v54, %v2392_v31  ;;  %v2167_v22 = vsel %vm5992_vm3, %v2126_v8, 0  ;;  %v2397_v58 = vunpack.c.l.b16 %v2164_v55  ;;  %v2125_v54 = vld [vmem:[%s5899_s26 + $0x58] sm:$0xf] }
 0x610   : > { %v2402_v10 = vunpack.c.h.b16 %v2167_v22  ;;  %v2401_v14 = vunpack.c.l.b16 %v2167_v22  ;;  %v2168_v22 = vsel %vm5988_vm15, %v2127_v41, 0 }
 0x613   : > { %3009 = vrot.lane.b32.xlu1 %v2411_v2, %s4020_s23  ;;  %v2391_v2 = vunpack.c.l.b16 %v2160_v56 }
 0x614   : > { %2987 = vperm.xlu2 %3958, %v7892_v27   ;;  %3007 = vrot.lane.b32.xlu0 %v2410_v48, %s4020_s23  ;;  %v2165_v48 = vsel %vm5992_vm3, %v2124_v32, 0 }
 0x615   : > { %v6739_v7 = vpop.permute.xlu1 %2765  ;;  %v2412_v27 = vpack.c.b16 %v2391_v2, %v2388_v17  ;;  %v2399_v32 = vunpack.c.h.b16 %v2165_v48  ;;  %v2398_v19 = vunpack.c.l.b16 %v2165_v48  ;;  %v2128_v17 = vld [vmem:[%s5899_s26 + $0x78] sm:$0xff]  ;;  %v2130_v2 = vld [vmem:[%s5899_s26 + $0x8c] sm:$0xff]  ;;  %v2166_v48 = vsel %vm5988_vm15, %v2125_v54, 0 }
 0x616   : > { %v6741_v16 = vpop.permute.xlu0 %2763  ;;  %v6743_v43 = vpop.permute.xlu2 %2840  ;;  %v2171_v11 = vsel %vm5992_vm3, %v2130_v2, 0  ;;  %v2131_v2 = vld [vmem:[%s5899_s26 + $0x94] sm:$0xf] }
 0x617   : > { %v2417_v52 = vpack.c.b16 %v2402_v10, %v2399_v32  ;;  %v2416_v62 = vpack.c.b16 %v2401_v14, %v2398_v19  ;;  %v2408_v32 = vunpack.c.h.b16 %v2171_v11  ;;  %v2407_v19 = vunpack.c.l.b16 %v2171_v11 }
 0x61b   : > { %3015 = vrot.lane.b32.xlu1 %v2414_v39, %s4020_s23  ;;  %v2394_v39 = vunpack.c.l.b16 %v2162_v20 }
 0x61c   : > { %3011 = vrot.lane.b32.xlu2 %v2412_v27, %s4020_s23  ;;  %3013 = vrot.lane.b32.xlu0 %v2413_v3, %s4020_s23  ;;  %v2169_v3 = vsel %vm5992_vm3, %v2128_v17, 0  ;;  %v2129_v17 = vld [vmem:[%s5899_s26 + $0x80] sm:$0xf]  ;;  %vm2550_vm3 = vcmask 1031168  }
 0x61d   : > { %v6760_v31 = vpop.permute.xlu1 %2771  ;;  %v2415_v27 = vpack.c.b16 %v2397_v58, %v2394_v39  ;;  %v2405_v55 = vunpack.c.h.b16 %v2169_v3  ;;  %v2403_v39 = vunpack.c.l.b16 %v2168_v22  ;;  %v2404_v58 = vunpack.c.l.b16 %v2169_v3 }
 0x61e   : > { %v6762_v8 = vpop.permute.xlu0 %2769  ;;  %v6764_v56 = vpop.permute.xlu2 %2846 }
 0x61f   : > { %v2420_v54 = vpack.c.b16 %v2408_v32, %v2405_v55  ;;  %v2419_v41 = vpack.c.b16 %v2407_v19, %v2404_v58 }
 0x623   : > { %3021 = vrot.lane.b32.xlu1 %v2417_v52, %s4020_s23  ;;  %v2400_v52 = vunpack.c.l.b16 %v2166_v48  ;;  %v2172_v48 = vsel %vm5988_vm15, %v2131_v2, 0 }
 0x624   : > { %3017 = vrot.lane.b32.xlu2 %v2415_v27, %s4020_s23  ;;  %3019 = vrot.lane.b32.xlu0 %v2416_v62, %s4020_s23  ;;  %v2170_v27 = vsel %vm5988_vm15, %v2129_v17, 0  ;;  %v2409_v55 = vunpack.c.l.b16 %v2172_v48  ;;  %vm2891_vm15 = vcmask 777216  }
 0x625   : > { %v2839_v20 = vpop.permute.xlu1 %2838  ;;  %v2418_v62 = vpack.c.b16 %v2403_v39, %v2400_v52  ;;  %v7894_v52 = vld [vmem:[#allocation96_spill] sm:$0xff] }
 0x626   : > { %v6781_v42 = vpop.permute.xlu0 %2836  ;;  %v6783_v10 = vpop.permute.xlu2 %2852  ;;  %v2470_v46 = vsel %vm2141_vm6, %v6356_v47, %v7894_v52 }
 0x627   : > { %v6787_v14 = vsel %vm2858_vm7, %v6781_v42, %v2839_v20  ;;  %v2406_v20 = vunpack.c.l.b16 %v2170_v27 }
 0x629   : > { %v2421_v39 = vpack.c.b16 %v2409_v55, %v2406_v20  ;;  %v7897_v20 = vld [vmem:[#allocation98_spill] sm:$0xff] }
 0x62b   : > { %3027 = vrot.lane.b32.xlu1 %v2420_v54, %s4020_s23  ;;  %v7895_v54 = vld [vmem:[#allocation94_spill] sm:$0xff] }
 0x62c   : > { %3023 = vrot.lane.b32.xlu2 %v2418_v62, %s4020_s23  ;;  %3025 = vrot.lane.b32.xlu0 %v2419_v41, %s4020_s23  ;;  %v2471_v62 = vsel %vm2141_vm6, %v7895_v54, %v6437_v5 }
 0x62d   : > { %v2845_v11 = vpop.permute.xlu1 %2844 }
 0x62e   : > { %v6798_v3 = vpop.permute.xlu0 %2842  ;;  %v6800_v22 = vpop.permute.xlu2 %2867 }
 0x62f   : > { %v6804_v32 = vsel %vm2858_vm7, %v6798_v3, %v2845_v11  ;;  %v7896_v11 = vld [vmem:[#allocation95_spill] sm:$0xff] }
 0x630   : > { %7893 = vst [vmem:[#allocation90_spill] sm:$0xff] %v6804_v32  ;;  %v2472_v55 = vsel %vm2141_vm6, %v7897_v20, %v7896_v11 }
 0x633   : > { %3033 = vrot.lane.b32.xlu1 %v2470_v46, %s4020_s23 }
 0x634   : > { %3029 = vrot.lane.b32.xlu2 %v2421_v39, %s4020_s23  ;;  %3031 = vrot.lane.b32.xlu0 %v6356_v47, %s4020_s23 }
 0x635   : > { %v2851_v58 = vpop.permute.xlu1 %2850 }
 0x636   : > { %v6813_v19 = vpop.permute.xlu0 %2848  ;;  %v6815_v17 = vpop.permute.xlu2 %2873 }
 0x637   : > { %v6819_v2 = vsel %vm2858_vm7, %v6813_v19, %v2851_v58 }
 0x63b   : > { %3039 = vrot.lane.b32.xlu1 %v2471_v62, %s4020_s23 }
 0x63c   : > { %3035 = vrot.lane.b32.xlu2 %v7894_v52, %s4020_s23  ;;  %3037 = vrot.lane.b32.xlu0 %v7895_v54, %s4020_s23  ;;  %v2473_v54 = vsel %vm2141_vm6, %v6515_v18, %v6497_v9  ;;  %vm2976_vm6 = vcmask 769024  }
 0x63d   : > { %v2857_v47 = vpop.permute.xlu1 %2856 }
 0x63e   : > { %v6829_v41 = vpop.permute.xlu0 %2854  ;;  %v6831_v27 = vpop.permute.xlu2 %2879 }
 0x63f   : > { %v6835_v48 = vsel %vm2858_vm7, %v6829_v41, %v2857_v47 }
 0x643   : > { %3045 = vrot.lane.b32.xlu1 %v2472_v55, %s4020_s23  ;;  %v2551_v55 = vsel %vm2550_vm3, %v6586_v1, %v6620_v12 }
 0x644   : > { %3041 = vrot.lane.b32.xlu2 %v6437_v5, %s4020_s23  ;;  %3043 = vrot.lane.b32.xlu0 %v7897_v20, %s4020_s23 }
 0x645   : > { %v2872_v52 = vpop.permute.xlu1 %2871 }
 0x646   : > { %v6845_v46 = vpop.permute.xlu0 %2869  ;;  %v2886_v39 = vpop.permute.xlu2 %2885 }
 0x647   : > { %v6849_v58 = vsel %vm2891_vm15, %v6845_v46, %v2872_v52 }
 0x64b   : > { %3051 = vrot.lane.b32.xlu1 %v2473_v54, %s4020_s23 }
 0x64c   : > { %3047 = vrot.lane.b32.xlu2 %v7896_v11, %s4020_s23  ;;  %3049 = vrot.lane.b32.xlu0 %v6515_v18, %s4020_s23 }
 0x64d   : > { %v2878_v5 = vpop.permute.xlu1 %2877 }
 0x64e   : > { %v6859_v62 = vpop.permute.xlu0 %2875  ;;  %v6861_v47 = vpop.permute.xlu2 %2952 }
 0x64f   : > { %v6865_v20 = vsel %vm2891_vm15, %v6859_v62, %v2878_v5  ;;  %v2553_v5 = vsel %vm2550_vm3, %v6603_v13, %v6631_v45 }
 0x653   : > { %3057 = vrot.lane.b32.xlu1 %v2551_v55, %s4020_s23 }
 0x654   : > { %3053 = vrot.lane.b32.xlu2 %v6497_v9, %s4020_s23  ;;  %3055 = vrot.lane.b32.xlu0 %v6586_v1, %s4020_s23  ;;  %v2552_v9 = vsel %vm2550_vm3, %v6620_v12, %v6618_v37  ;;  %v2554_v37 = vsel %vm2550_vm3, %v6631_v45, %v6629_v57  ;;  %v2642_v57 = vsel %vm2635_vm4, %v6660_v6, %v6692_v25 }
 0x655   : > { %v2884_v18 = vpop.permute.xlu1 %2883 }
 0x656   : > { %v2882_v11 = vpop.permute.xlu0 %2881  ;;  %v6875_v52 = vpop.permute.xlu2 %2958 }
 0x657   : > { %v6878_v54 = vsel %vm2891_vm15, %v2882_v11, %v2884_v18 }
 0x65b   : > { %3063 = vrot.lane.b32.xlu1 %v2553_v5, %s4020_s23  ;;  %v2555_v5 = vsel %vm2550_vm3, %v6611_v61, %v6640_v63 }
 0x65c   : > { %3059 = vrot.lane.b32.xlu2 %v2552_v9, %s4020_s23  ;;  %3061 = vrot.lane.b32.xlu0 %v6603_v13, %s4020_s23 }
 0x65d   : > { %v2890_v1 = vpop.permute.xlu1 %2889 }
 0x65e   : > { %v2888_v55 = vpop.permute.xlu0 %2887  ;;  %v6890_v32 = vpop.permute.xlu2 %2964 }
 0x65f   : > { %v6893_v18 = vsel %vm2891_vm15, %v2888_v55, %v2890_v1 }
 0x663   : > { %3069 = vrot.lane.b32.xlu1 %v2555_v5, %s4020_s23 }
 0x664   : > { %3065 = vrot.lane.b32.xlu2 %v2554_v37, %s4020_s23  ;;  %3067 = vrot.lane.b32.xlu0 %v6611_v61, %s4020_s23  ;;  %v2556_v61 = vsel %vm2550_vm3, %v6640_v63, %v6638_v60  ;;  %v2640_v60 = vsel %vm2635_vm4, %v6651_v21, %v6684_v0 }
 0x665   : > { %v2957_v13 = vpop.permute.xlu1 %2956 }
 0x666   : > { %v6905_v12 = vpop.permute.xlu0 %2954  ;;  %v6907_v9 = vpop.permute.xlu2 %2970 }
 0x667   : > { %v6911_v1 = vsel %vm2976_vm6, %v6905_v12, %v2957_v13 }
 0x668   : > { %7898 = vst [vmem:[#allocation86_spill] sm:$0xff] %v6911_v1  ;;  %v2774_v1 = vsel %vm2773_vm5, %v6669_v36, %v6703_v50 }
 0x66b   : > { %3099 = vrot.lane.b32.xlu1 %v2642_v57, %s4020_s23 }
 0x66c   : > { %3071 = vrot.lane.b32.xlu2 %v2556_v61, %s4020_s23  ;;  %3097 = vrot.lane.b32.xlu0 %v6660_v6, %s4020_s23 }
 0x66d   : > { %v2963_v45 = vpop.permute.xlu1 %2962 }
 0x66e   : > { %v6923_v5 = vpop.permute.xlu0 %2960  ;;  %v6925_v37 = vpop.permute.xlu2 %2987 }
 0x66f   : > { %7899 = vst [vmem:[#allocation85_spill] sm:$0xff] %v6925_v37  ;;  %v6929_v13 = vsel %vm2976_vm6, %v6923_v5, %v2963_v45  ;;  %v2898_v45 = vsel %vm2891_vm15, %v2886_v39, %v2888_v55 }
 0x673   : > { %3145 = vrot.lane.b32.xlu1 %v6705_v29, %s4020_s23 }
 0x674   : > { %3091 = vrot.lane.b32.xlu2 %v6651_v21, %s4020_s23  ;;  %3093 = vrot.lane.b32.xlu0 %v2640_v60, %s4020_s23  ;;  %v2780_v21 = vsel %vm2773_vm5, %v6705_v29, %v6762_v8  ;;  %v2638_v29 = vsel %vm2635_vm4, %v6642_v51, %v6667_v30 }
 0x675   : > { %v2969_v63 = vpop.permute.xlu1 %2968 }
 0x676   : > { %v6939_v6 = vpop.permute.xlu0 %2966  ;;  %v6941_v57 = vpop.permute.xlu2 %3011 }
 0x677   : > { %7900 = vst [vmem:[#allocation91_spill] sm:$0xff] %v6941_v57  ;;  %v6945_v61 = vsel %vm2976_vm6, %v6939_v6, %v2969_v63 }
 0x67b   : > { %3195 = vrot.lane.b32.xlu1 %v2898_v45, %s4020_s23 }
 0x67c   : > { %3147 = vrot.lane.b32.xlu2 %v2780_v21, %s4020_s23  ;;  %3193 = vrot.lane.b32.xlu0 %v2886_v39, %s4020_s23  ;;  %v2896_v21 = vsel %vm2891_vm15, %v6831_v27, %v2882_v11  ;;  %v2636_v11 = vsel %vm2635_vm4, %v6633_v28, %v6658_v44 }
 0x67d   : > { %v2975_v60 = vpop.permute.xlu1 %2974 }
 0x67e   : > { %v6954_v37 = vpop.permute.xlu0 %2972  ;;  %v6956_v57 = vpop.permute.xlu2 %3017 }
 0x67f   : > { %7901 = vst [vmem:[#allocation88_spill] sm:$0xff] %v6956_v57  ;;  %v6960_v63 = vsel %vm2976_vm6, %v6954_v37, %v2975_v60  ;;  %v2778_v60 = vsel %vm2773_vm5, %v6694_v33, %v6741_v16 }
 0x683   : > { %3139 = vrot.lane.b32.xlu1 %v6694_v33, %s4020_s23 }
 0x684   : > { %3085 = vrot.lane.b32.xlu2 %v6642_v51, %s4020_s23  ;;  %3087 = vrot.lane.b32.xlu0 %v2638_v29, %s4020_s23 }
 0x685   : > { %v6970_v39 = vpop.permute.xlu1 %3009 }
 0x686   : > { %v6972_v55 = vpop.permute.xlu2 %3023  ;;  %v3008_v45 = vpop.permute.xlu0 %3007 }
 0x687   : > { %7902 = vst [vmem:[#allocation87_spill] sm:$0xff] %v6972_v55  ;;  %v2776_v55 = vsel %vm2773_vm5, %v6686_v24, %v6720_v59 }
 0x68b   : > { %3189 = vrot.lane.b32.xlu1 %v2896_v21, %s4020_s23 }
 0x68c   : > { %3141 = vrot.lane.b32.xlu2 %v2778_v60, %s4020_s23  ;;  %3187 = vrot.lane.b32.xlu0 %v6831_v27, %s4020_s23  ;;  %v2894_v60 = vsel %vm2891_vm15, %v6815_v17, %v6859_v62  ;;  %v2557_v62 = vsel %vm2550_vm3, %v6622_v38, %v6649_v35 }
 0x68d   : > { %v6983_v51 = vpop.permute.xlu1 %3015 }
 0x68e   : > { %v6985_v29 = vpop.permute.xlu2 %3029  ;;  %v3014_v57 = vpop.permute.xlu0 %3013 }
 0x68f   : > { %7903 = vst [vmem:[#allocation93_spill] sm:$0xff] %v6985_v29 }
 0x693   : > { %3133 = vrot.lane.b32.xlu1 %v6686_v24, %s4020_s23 }
 0x694   : > { %3079 = vrot.lane.b32.xlu2 %v6633_v28, %s4020_s23  ;;  %3081 = vrot.lane.b32.xlu0 %v2636_v11, %s4020_s23 }
 0x695   : > { %v6995_v33 = vpop.permute.xlu1 %3021 }
 0x696   : > { %v6997_v27 = vpop.permute.xlu2 %3035  ;;  %v6999_v21 = vpop.permute.xlu0 %3019 }
 0x697   : > { %7904 = vst [vmem:[#allocation92_spill] sm:$0xff] %v6997_v27 }
 0x69b   : > { %3183 = vrot.lane.b32.xlu1 %v2894_v60, %s4020_s23  ;;  %v2892_v60 = vsel %vm2891_vm15, %v6800_v22, %v6845_v46  ;;  %v2695_v46 = vsel %vm2688_vm11, %v6572_v34, %v6607_v53 }
 0x69c   : > { %3135 = vrot.lane.b32.xlu2 %v2776_v55, %s4020_s23  ;;  %3181 = vrot.lane.b32.xlu0 %v6815_v17, %s4020_s23 }
 0x69d   : > { %v7011_v28 = vpop.permute.xlu1 %3027 }
 0x69e   : > { %v7013_v11 = vpop.permute.xlu2 %3041  ;;  %v3026_v29 = vpop.permute.xlu0 %3025 }
 0x69f   : > { %7905 = vst [vmem:[#allocation96_spill] sm:$0xff] %v7013_v11  ;;  %v3225_v11 = vsel %vm2198_vm9, %v3014_v57, %v6983_v51 }
 0x6a3   : > { %3127 = vrot.lane.b32.xlu1 %v6669_v36, %s4020_s23  ;;  %v2643_v36 = vsel %vm2635_vm4, %v6692_v25, %v6690_v40  ;;  %v2781_v40 = vsel %vm2773_vm5, %v6762_v8, %v6760_v31  ;;  %v2693_v31 = vsel %vm2688_vm11, %v6549_v23, %v6590_v26  ;;  %v2641_v8 = vsel %vm2635_vm4, %v6684_v0, %v6682_v15 }
 0x6a4   : > { %3073 = vrot.lane.b32.xlu2 %v6622_v38, %s4020_s23  ;;  %3075 = vrot.lane.b32.xlu0 %v2557_v62, %s4020_s23  ;;  %v2863_v15 = vsel %vm2858_vm7, %v6764_v56, %v6813_v19  ;;  %v3229_v19 = vsel %vm2198_vm9, %v3026_v29, %v7011_v28  ;;  %v3227_v29 = vsel %vm2198_vm9, %v6999_v21, %v6995_v33 }
 0x6a5   : > { %v7023_v24 = vpop.permute.xlu1 %3033 }
 0x6a6   : > { %v7025_v17 = vpop.permute.xlu2 %3047  ;;  %v3032_v55 = vpop.permute.xlu0 %3031 }
 0x6a7   : > { %v3231_v0 = vsel %vm2198_vm9, %v3032_v55, %v7023_v24 }
 0x6ab   : > { %3177 = vrot.lane.b32.xlu1 %v2892_v60, %s4020_s23 }
 0x6ac   : > { %3129 = vrot.lane.b32.xlu2 %v2774_v1, %s4020_s23  ;;  %3175 = vrot.lane.b32.xlu0 %v6800_v22, %s4020_s23 }
 0x6ad   : > { %v7037_v38 = vpop.permute.xlu1 %3039 }
 0x6ae   : > { %v7039_v62 = vpop.permute.xlu2 %3053  ;;  %v3038_v27 = vpop.permute.xlu0 %3037 }
 0x6b3   : > { %3123 = vrot.lane.b32.xlu1 %v2695_v46, %s4020_s23  ;;  %v2865_v46 = vsel %vm2858_vm7, %v6783_v10, %v6829_v41 }
 0x6b4   : > { %3101 = vrot.lane.b32.xlu2 %v2643_v36, %s4020_s23  ;;  %3121 = vrot.lane.b32.xlu0 %v6572_v34, %s4020_s23  ;;  %v3223_v34 = vsel %vm2198_vm9, %v3008_v45, %v6970_v39 }
 0x6b5   : > { %v7051_v22 = vpop.permute.xlu1 %3045 }
 0x6b6   : > { %v7053_v1 = vpop.permute.xlu2 %3059  ;;  %v3044_v60 = vpop.permute.xlu0 %3043 }
 0x6bb   : > { %3171 = vrot.lane.b32.xlu1 %v2865_v46, %s4020_s23 }
 0x6bc   : > { %3149 = vrot.lane.b32.xlu2 %v2781_v40, %s4020_s23  ;;  %3169 = vrot.lane.b32.xlu0 %v6783_v10, %s4020_s23  ;;  %v3235_v10 = vsel %vm2198_vm9, %v3044_v60, %v7051_v22 }
 0x6bd   : > { %v7069_v25 = vpop.permute.xlu1 %3051 }
 0x6be   : > { %v7071_v57 = vpop.permute.xlu2 %3065  ;;  %v3050_v36 = vpop.permute.xlu0 %3049 }
 0x6bf   : > { %v3237_v41 = vsel %vm2198_vm9, %v3050_v36, %v7069_v25  ;;  %v3233_v36 = vsel %vm2198_vm9, %v3038_v27, %v7037_v38 }
 0x6c0   : > { %3371 = vmatpush.bf16.msra.mxu0 %v3237_v41 }
 0x6c3   : > { %3117 = vrot.lane.b32.xlu1 %v2693_v31, %s4020_s23 }
 0x6c4   : > { %3095 = vrot.lane.b32.xlu2 %v2641_v8, %s4020_s23  ;;  %3115 = vrot.lane.b32.xlu0 %v6549_v23, %s4020_s23  ;;  %v2779_v23 = vsel %vm2773_vm5, %v6741_v16, %v6739_v7  ;;  %v7906_v7 = vld [vmem:[#allocation99_spill] sm:$0xff] }
 0x6c5   : > { %3372 = vmatpush.bf16.msra.mxu0 %v3235_v10  ;;  %v7087_v45 = vpop.permute.xlu1 %3057  ;;  %v2691_v16 = vsel %vm2688_vm11, %v7906_v7, %v6576_v49  ;;  %v7907_v10 = vld [vmem:[#allocation6_spill] sm:$0xff] }
 0x6c6   : > { %v7089_v46 = vpop.permute.xlu2 %3071  ;;  %v7091_v40 = vpop.permute.xlu0 %3055 }
 0x6c9   : > { %3373 = vmatpush.bf16.msra.mxu0 %v3233_v36  ;;  %v2993_v36 = vunpack.c.l.b16 %v7907_v10 }
 0x6cb   : > { %3165 = vrot.lane.b32.xlu1 %v2863_v15, %s4020_s23  ;;  %v7141_v21 = vpack.c.b16 %v2993_v36, %v2993_v36 }
 0x6cc   : > { %3143 = vrot.lane.b32.xlu2 %v2779_v23, %s4020_s23  ;;  %3163 = vrot.lane.b32.xlu0 %v6764_v56, %s4020_s23  ;;  %v2639_v56 = vsel %vm2635_vm4, %v6667_v30, %v6665_v4  ;;  %v2861_v4 = vsel %vm2858_vm7, %v6743_v43, %v6798_v3  ;;  %v7908_v30 = vld [vmem:[#allocation84_spill] sm:$0xff] }
 0x6cd   : > { %3374 = vmatpush.bf16.msra.mxu0 %v3231_v0  ;;  %v7107_v27 = vpop.permute.xlu1 %3063  ;;  %v2777_v15 = vsel %vm2773_vm5, %v6720_v59, %v7908_v30  ;;  %v2983_v59 = vsel %vm2976_vm6, %v6907_v9, %v6954_v37 }
 0x6ce   : > { %v3092_v60 = vpop.permute.xlu2 %3091  ;;  %v7109_v41 = vpop.permute.xlu0 %3061 }
 0x6d1   : > { %3375 = vmatpush.bf16.msra.mxu0 %v3229_v19 }
 0x6d3   : > { %3111 = vrot.lane.b32.xlu1 %v2691_v16, %s4020_s23  ;;  %v7909_v16 = vld [vmem:[#allocation101_spill] sm:$0xff] }
 0x6d4   : > { %3089 = vrot.lane.b32.xlu2 %v2639_v56, %s4020_s23  ;;  %3109 = vrot.lane.b32.xlu0 %v7906_v7, %s4020_s23  ;;  %v7910_v56 = vld [vmem:[#allocation97_spill] sm:$0xff] }
 0x6d5   : > { %3376 = vmatpush.bf16.msra.mxu0 %v3227_v29  ;;  %v7126_v55 = vpop.permute.xlu1 %3069 }
 0x6d6   : > { %v7128_v31 = vpop.permute.xlu2 %3147  ;;  %v3068_v8 = vpop.permute.xlu0 %3067 }
 0x6d9   : > { %3377 = vmatpush.bf16.msra.mxu0 %v3225_v11 }
 0x6db   : > { %3159 = vrot.lane.b32.xlu1 %v2861_v4, %s4020_s23 }
 0x6dc   : > { %3137 = vrot.lane.b32.xlu2 %v2777_v15, %s4020_s23  ;;  %3157 = vrot.lane.b32.xlu0 %v6743_v43, %s4020_s23  ;;  %v7912_v15 = vld [vmem:[#allocation83_spill] sm:$0xff] }
 0x6dd   : > { %3378 = vmatpush.bf16.msra.mxu0 %v3223_v34  ;;  %v7143_v23 = vpop.permute.xlu1 %3099 }
 0x6de   : > { %v3086_v11 = vpop.permute.xlu2 %3085  ;;  %v3098_v0 = vpop.permute.xlu0 %3097 }
 0x6df   : > { %v3253_v3 = vsel %vm2198_vm9, %v3098_v0, %v7143_v23  ;;  %v2859_v0 = vsel %vm2858_vm7, %v7912_v15, %v6781_v42 }
 0x6e0   : > { %3379 = vmatmul.bf16.vlgmr.msra.gmra.mxu0 %v7141_v21  ;;  %3384 = vmatpush.bf16.msra.mxu1 %v3253_v3 }
 0x6e3   : > { %3219 = vrot.lane.b32.xlu1 %v2983_v59, %s4020_s23 }
 0x6e4   : > { %3197 = vrot.lane.b32.xlu2 %v6893_v18, %s4020_s23  ;;  %3217 = vrot.lane.b32.xlu0 %v6907_v9, %s4020_s23  ;;  %v2689_v18 = vsel %vm2688_vm11, %v7910_v56, %v7909_v16  ;;  %v7911_v9 = vld [vmem:[#allocation81_spill] sm:$0xff] }
 0x6e5   : > { %v3146_v43 = vpop.permute.xlu1 %3145  ;;  %v2637_v29 = vsel %vm2635_vm4, %v6658_v44, %v7911_v9  ;;  %v7913_v44 = vld [vmem:[#allocation89_spill] sm:$0xff] }
 0x6e6   : > { %v7156_v34 = vpop.permute.xlu2 %3141  ;;  %v7158_v19 = vpop.permute.xlu0 %3093  ;;  %v3269_v7 = vsel %vm2198_vm9, %v3146_v43, %v7128_v31  ;;  %v2775_v3 = vsel %vm2773_vm5, %v6703_v50, %v7913_v44  ;;  %v2981_v50 = vsel %vm2976_vm6, %v6890_v32, %v6939_v6 }
 0x6e7   : > { %3397 = vmatpush.bf16.msra.mxu2 %v3269_v7  ;;  %v3251_v37 = vsel %vm2198_vm9, %v3092_v60, %v7158_v19 }
 0x6e8   : > { %3385 = vmatpush.bf16.msra.mxu1 %v3251_v37 }
 0x6eb   : > { %3105 = vrot.lane.b32.xlu1 %v2689_v18, %s4020_s23 }
 0x6ec   : > { %3083 = vrot.lane.b32.xlu2 %v2637_v29, %s4020_s23  ;;  %3103 = vrot.lane.b32.xlu0 %v7910_v56, %s4020_s23  ;;  %v3243_v56 = vsel %vm2198_vm9, %v3068_v8, %v7126_v55  ;;  %v3241_v29 = vsel %vm2198_vm9, %v7109_v41, %v7107_v27  ;;  %v3239_v41 = vsel %vm2198_vm9, %v7091_v40, %v7087_v45 }
 0x6ed   : > { %v7174_v36 = vpop.permute.xlu1 %3195  ;;  %v2979_v40 = vsel %vm2976_vm6, %v6875_v52, %v6923_v5 }
 0x6ee   : > { %v3080_v4 = vpop.permute.xlu2 %3079  ;;  %v3194_v60 = vpop.permute.xlu0 %3193 }
 0x6ef   : > { %v3285_v30 = vsel %vm2198_vm9, %v3194_v60, %v7174_v36  ;;  %v7914_v60 = vld [vmem:[#allocation104_spill] sm:$0xff] }
 0x6f0   : > { %3410 = vmatpush.bf16.msra.mxu3 %v3285_v30 }
 0x6f3   : > { %3153 = vrot.lane.b32.xlu1 %v2859_v0, %s4020_s23 }
 0x6f4   : > { %3131 = vrot.lane.b32.xlu2 %v2775_v3, %s4020_s23  ;;  %3151 = vrot.lane.b32.xlu0 %v7912_v15, %s4020_s23 }
 0x6f5   : > { %v3140_v59 = vpop.permute.xlu1 %3139 }
 0x6f6   : > { %v7188_v43 = vpop.permute.xlu2 %3135  ;;  %v7190_v7 = vpop.permute.xlu0 %3087  ;;  %v3267_v37 = vsel %vm2198_vm9, %v3140_v59, %v7156_v34 }
 0x6f7   : > { %3398 = vmatpush.bf16.msra.mxu2 %v3267_v37  ;;  %v3249_v42 = vsel %vm2198_vm9, %v3086_v11, %v7190_v7 }
 0x6f8   : > { %3386 = vmatpush.bf16.msra.mxu1 %v3249_v42 }
 0x6fb   : > { %3213 = vrot.lane.b32.xlu1 %v2981_v50, %s4020_s23 }
 0x6fc   : > { %3191 = vrot.lane.b32.xlu2 %v6878_v54, %s4020_s23  ;;  %3211 = vrot.lane.b32.xlu0 %v6890_v32, %s4020_s23  ;;  %v2696_v54 = vsel %vm2688_vm11, %v6607_v53, %v7914_v60  ;;  %v7915_v32 = vld [vmem:[#allocation82_spill] sm:$0xff] }
 0x6fd   : > { %v7206_v18 = vpop.permute.xlu1 %3189  ;;  %v2558_v8 = vsel %vm2550_vm3, %v6649_v35, %v7915_v32  ;;  %v7920_v32 = vld [vmem:[#allocation96_spill] sm:$0xff] }
 0x6fe   : > { %v3074_v9 = vpop.permute.xlu2 %3073  ;;  %v3188_v11 = vpop.permute.xlu0 %3187 }
 0x6ff   : > { %v3283_v6 = vsel %vm2198_vm9, %v3188_v11, %v7206_v18  ;;  %v7917_v11 = vld [vmem:[#allocation102_spill] sm:$0xff] }
 0x700   : > { %3411 = vmatpush.bf16.msra.mxu3 %v3283_v6 }
 0x703   : > { %3185 = vrot.lane.b32.xlu1 %v6865_v20, %s4020_s23  ;;  %v7916_v20 = vld [vmem:[#allocation103_spill] sm:$0xff] }
 0x704   : > { %3077 = vrot.lane.b32.xlu2 %v2558_v8, %s4020_s23  ;;  %3125 = vrot.lane.b32.xlu0 %v2696_v54, %s4020_s23  ;;  %v2694_v44 = vsel %vm2688_vm11, %v6590_v26, %v7916_v20  ;;  %v2977_v26 = vsel %vm2976_vm6, %v6861_v47, %v6905_v12  ;;  %v7918_v54 = vld [vmem:[#allocation100_spill] sm:$0xff]  ;;  %v3234_v8 = vsel %vm2198_vm9, %v7037_v38, %v7920_v32 }
 0x705   : > { %v3134_v30 = vpop.permute.xlu1 %3133 }
 0x706   : > { %v7226_v15 = vpop.permute.xlu2 %3129  ;;  %v7228_v0 = vpop.permute.xlu0 %3081  ;;  %v3265_v53 = vsel %vm2198_vm9, %v3134_v30, %v7188_v43 }
 0x707   : > { %3399 = vmatpush.bf16.msra.mxu2 %v3265_v53  ;;  %v3247_v35 = vsel %vm2198_vm9, %v3080_v4, %v7228_v0 }
 0x708   : > { %3387 = vmatpush.bf16.msra.mxu1 %v3247_v35  ;;  %v7923_v35 = vld [vmem:[#allocation93_spill] sm:$0xff] }
 0x709   : > { %v3230_v38 = vsel %vm2198_vm9, %v7011_v28, %v7923_v35 }
 0x70b   : > { %3119 = vrot.lane.b32.xlu1 %v2694_v44, %s4020_s23 }
 0x70c   : > { %3205 = vrot.lane.b32.xlu2 %v6875_v52, %s4020_s23  ;;  %3207 = vrot.lane.b32.xlu0 %v2979_v40, %s4020_s23 }
 0x70d   : > { %v7244_v3 = vpop.permute.xlu1 %3183 }
 0x70e   : > { %v7246_v59 = vpop.permute.xlu2 %3101  ;;  %v3182_v4 = vpop.permute.xlu0 %3181 }
 0x70f   : > { %v3281_v37 = vsel %vm2198_vm9, %v3182_v4, %v7244_v3  ;;  %v7924_v4 = vld [vmem:[#allocation87_spill] sm:$0xff] }
 0x710   : > { %3412 = vmatpush.bf16.msra.mxu3 %v3281_v37 }
 0x713   : > { %3201 = vrot.lane.b32.xlu1 %v2977_v26, %s4020_s23  ;;  %v7925_v26 = vld [vmem:[#allocation88_spill] sm:$0xff] }
 0x714   : > { %3179 = vrot.lane.b32.xlu2 %v6849_v58, %s4020_s23  ;;  %3199 = vrot.lane.b32.xlu0 %v6861_v47, %s4020_s23  ;;  %v2692_v58 = vsel %vm2688_vm11, %v6576_v49, %v7917_v11  ;;  %v2994_v49 = vunpack.c.h.b16 %v7907_v10  ;;  %v3238_v10 = vsel %vm2198_vm9, %v7069_v25, %v7039_v62  ;;  %v7919_v62 = vld [vmem:[#allocation90_spill] sm:$0xff]  ;;  %v7926_v11 = vld [vmem:[#allocation91_spill] sm:$0xff] }
 0x715   : > { %v3128_v52 = vpop.permute.xlu1 %3127 }
 0x716   : > { %v7258_v5 = vpop.permute.xlu2 %3149  ;;  %v7260_v42 = vpop.permute.xlu0 %3075  ;;  %v3263_v50 = vsel %vm2198_vm9, %v3128_v52, %v7226_v15  ;;  %v3226_v52 = vsel %vm2198_vm9, %v6983_v51, %v7925_v26 }
 0x717   : > { %3400 = vmatpush.bf16.msra.mxu2 %v3263_v50  ;;  %v3245_v12 = vsel %vm2198_vm9, %v3074_v9, %v7260_v42 }
 0x718   : > { %3388 = vmatpush.bf16.msra.mxu1 %v3245_v12 }
 0x71b   : > { %3221 = vrot.lane.b32.xlu1 %v6960_v63, %s4020_s23  ;;  %v2690_v63 = vsel %vm2688_vm11, %v7909_v16, %v7918_v54 }
 0x71c   : > { %3113 = vrot.lane.b32.xlu2 %v2692_v58, %s4020_s23  ;;  %3173 = vrot.lane.b32.xlu0 %v6835_v48, %s4020_s23  ;;  %v7289_v48 = vpack.c.b16 %v2994_v49, %v2994_v49  ;;  %v3224_v58 = vsel %vm2198_vm9, %v6970_v39, %v7926_v11 }
 0x71d   : > { %3389 = vmatpush.bf16.msra.mxu1 %v3243_v56  ;;  %v7274_v47 = vpop.permute.xlu1 %3177 }
 0x71e   : > { %v7276_v6 = vpop.permute.xlu2 %3095  ;;  %v3176_v60 = vpop.permute.xlu0 %3175 }
 0x71f   : > { %v3279_v9 = vsel %vm2198_vm9, %v3176_v60, %v7274_v47 }
 0x720   : > { %3413 = vmatpush.bf16.msra.mxu3 %v3279_v9 }
 0x721   : > { %3390 = vmatpush.bf16.msra.mxu1 %v3241_v29 }
 0x723   : > { %3215 = vrot.lane.b32.xlu1 %v6945_v61, %s4020_s23 }
 0x724   : > { %3107 = vrot.lane.b32.xlu2 %v2690_v63, %s4020_s23  ;;  %3167 = vrot.lane.b32.xlu0 %v6819_v2, %s4020_s23  ;;  %v3236_v2 = vsel %vm2198_vm9, %v7051_v22, %v7025_v17 }
 0x725   : > { %3391 = vmatpush.bf16.msra.mxu1 %v3239_v41  ;;  %v7291_v56 = vpop.permute.xlu1 %3123 }
 0x726   : > { %v7296_v29 = vpop.permute.xlu2 %3143  ;;  %v3122_v16 = vpop.permute.xlu0 %3121 }
 0x727   : > { %v3261_v61 = vsel %vm2198_vm9, %v3122_v16, %v7291_v56 }
 0x728   : > { %3392 = vmatmul.bf16.vlgmr.msra.gmra.mxu1 %v7289_v48  ;;  %3401 = vmatpush.bf16.msra.mxu2 %v3261_v61 }
 0x729   : > { %3436 = vmatpush.bf16.msrb.mxu1 %v3238_v10 }
 0x72b   : > { %3155 = vrot.lane.b32.xlu1 %v6787_v14, %s4020_s23  ;;  %v7921_v14 = vld [vmem:[#allocation92_spill] sm:$0xff] }
 0x72c   : > { %3161 = vrot.lane.b32.xlu2 %v7919_v62, %s4020_s23  ;;  %3209 = vrot.lane.b32.xlu0 %v6929_v13, %s4020_s23  ;;  %v3232_v30 = vsel %vm2198_vm9, %v7023_v24, %v7921_v14  ;;  %v7922_v13 = vld [vmem:[#allocation86_spill] sm:$0xff]  ;;  %v3228_v24 = vsel %vm2198_vm9, %v6995_v33, %v7924_v4 }
 0x72d   : > { %3437 = vmatpush.bf16.msrb.mxu1 %v3236_v2  ;;  %v7310_v25 = vpop.permute.xlu1 %3171  ;;  %v7927_v2 = vld [vmem:[#allocation9_spill] sm:$0xff] }
 0x72e   : > { %v7315_v41 = vpop.permute.xlu2 %3089  ;;  %v3170_v17 = vpop.permute.xlu0 %3169  ;;  %v2995_v62 = vunpack.c.l.b16 %v7927_v2  ;;  %v2996_v35 = vunpack.c.h.b16 %v7927_v2 }
 0x72f   : > { %v3277_v22 = vsel %vm2198_vm9, %v3170_v17, %v7310_v25 }
 0x730   : > { %3414 = vmatpush.bf16.msra.mxu3 %v3277_v22 }
 0x731   : > { %3438 = vmatpush.bf16.msrb.mxu1 %v3234_v8 }
 0x734   : > { %3203 = vrot.lane.b32.xlu2 %v7922_v13, %s4020_s23  ;;  %v3254_v13 = vsel %vm2198_vm9, %v7143_v23, %v7246_v59  ;;  %v3250_v23 = vsel %vm2198_vm9, %v7190_v7, %v7315_v41 }
 0x735   : > { %3439 = vmatpush.bf16.msrb.mxu1 %v3232_v30  ;;  %v7324_v53 = vpop.permute.xlu1 %3117  ;;  %v7370_v30 = vpack.c.b16 %v2995_v62, %v2995_v62 }
 0x736   : > { %v7329_v20 = vpop.permute.xlu2 %3137  ;;  %v3116_v44 = vpop.permute.xlu0 %3115 }
 0x737   : > { %v3259_v40 = vsel %vm2198_vm9, %v3116_v44, %v7324_v53 }
 0x738   : > { %3402 = vmatpush.bf16.msra.mxu2 %v3259_v40 }
 0x739   : > { %3440 = vmatpush.bf16.msrb.mxu1 %v3230_v38  ;;  %v3252_v38 = vsel %vm2198_vm9, %v7158_v19, %v7276_v6  ;;  %v3270_v19 = vsel %vm2198_vm9, %v7128_v31, %v7258_v5  ;;  %v3268_v6 = vsel %vm2198_vm9, %v7156_v34, %v7296_v29  ;;  %v3244_v34 = vsel %vm2198_vm9, %v7126_v55, %v7089_v46 }
 0x73a   : > { %v3240_v46 = vsel %vm2198_vm9, %v7087_v45, %v7053_v1  ;;  %v7928_v1 = vld [vmem:[#allocation12_spill] sm:$0xff] }
 0x73b   : > { %v2997_v45 = vunpack.c.l.b16 %v7928_v1 }
 0x73d   : > { %3441 = vmatpush.bf16.msrb.mxu1 %v3228_v24  ;;  %v7336_v37 = vpop.permute.xlu1 %3165 }
 0x73e   : > { %v7341_v28 = vpop.permute.xlu2 %3197  ;;  %v3164_v50 = vpop.permute.xlu0 %3163 }
 0x73f   : > { %v3275_v12 = vsel %vm2198_vm9, %v3164_v50, %v7336_v37 }
 0x740   : > { %3415 = vmatpush.bf16.msra.mxu3 %v3275_v12 }
 0x741   : > { %3442 = vmatpush.bf16.msrb.mxu1 %v3226_v52  ;;  %v7384_v52 = vpack.c.b16 %v2996_v35, %v2996_v35 }
 0x745   : > { %3443 = vmatpush.bf16.msrb.mxu1 %v3224_v58  ;;  %v7349_v33 = vpop.permute.xlu1 %3111  ;;  %v3501_v58 = vld [vmem:[%s4093_s29] sm:$0x3f] }
 0x746   : > { %v3084_v60 = vpop.permute.xlu2 %3083  ;;  %v3110_v9 = vpop.permute.xlu0 %3109 }
 0x747   : > { %v3257_v51 = vsel %vm2198_vm9, %v3110_v9, %v7349_v33  ;;  %v3248_v59 = vsel %vm2198_vm9, %v7228_v0, %v3084_v60  ;;  %v3266_v0 = vsel %vm2198_vm9, %v7188_v43, %v7329_v20  ;;  %v3502_v60 = vunpack.c.l.bf16 %v3501_v58 }
 0x748   : > { %3444 = vmatmul.bf16.vlgmr.msrb.gmra.mxu1 %v7141_v21  ;;  %3403 = vmatpush.bf16.msra.mxu2 %v3257_v51  ;;  %v3242_v43 = vsel %vm2198_vm9, %v7107_v27, %v7071_v57 }
 0x749   : > { %3506 = vst [vmem:[#allocation1] ss:$2 sm:$0xff] %v3502_v60 }
 0x74d   : > { %v7353_v49 = vpop.permute.xlu1 %3159 }
 0x74e   : > { %v3132_v54 = vpop.permute.xlu2 %3131  ;;  %v3158_v63 = vpop.permute.xlu0 %3157 }
 0x74f   : > { %v3273_v10 = vsel %vm2198_vm9, %v3158_v63, %v7353_v49  ;;  %v3264_v29 = vsel %vm2198_vm9, %v7226_v15, %v3132_v54 }
 0x750   : > { %3416 = vmatpush.bf16.msra.mxu3 %v3273_v10  ;;  %v3510_v57 = vld.sshfl [vmem:[#allocation1 + $0x8] sm:$0xff pattern:$0x75316420] }
 0x751   : > { %3514 = vrot.lane.b32.xlu0 %v3510_v57, %s4025_s30 }
 0x755   : > { %v7357_v39 = vpop.permute.xlu1 %3219 }
 0x756   : > { %v7359_v16 = vpop.permute.xlu2 %3191  ;;  %v3218_v21 = vpop.permute.xlu0 %3217 }
 0x757   : > { %v3293_v61 = vsel %vm2198_vm9, %v3218_v21, %v7357_v39  ;;  %v3002_v21 = vpack.c.b16 %v2997_v45, %v2997_v45  ;;  %v3284_v2 = vsel %vm2198_vm9, %v7206_v18, %v7359_v16 }
 0x758   : > { %3427 = vmatpush.bf16.msrb.mxu0 %v3293_v61  ;;  %v3503_v61 = vunpack.c.h.bf16 %v3501_v58 }
 0x75a   : > { %3508 = vst [vmem:[#allocation1 + $0x10] ss:$2 sm:$0xff] %v3503_v61 }
 0x75d   : > { %v7364_v32 = vpop.f32.mrf.mxu0  ;;  %v7366_v8 = vpop.permute.xlu1 %3105 }
 0x75e   : > { %v3078_v17 = vpop.permute.xlu2 %3077  ;;  %v3104_v22 = vpop.permute.xlu0 %3103 }
 0x75f   : > { %v3255_v14 = vsel %vm2198_vm9, %v3104_v22, %v7366_v8  ;;  %v3246_v5 = vsel %vm2198_vm9, %v7260_v42, %v3078_v17 }
 0x760   : > { %3404 = vmatpush.bf16.msra.mxu2 %v3255_v14 }
 0x761   : > { %v3511_v17 = vld.sshfl [vmem:[#allocation1 + $0x10] sm:$0xff pattern:$0x75316420] }
 0x762   : > { %3516 = vrot.lane.b32.xlu1 %v3511_v17, %s4025_s30 }
 0x763   : > { %3405 = vmatmul.bf16.vlgmr.msra.gmra.mxu2 %v7370_v30 }
 0x764   : > { %3449 = vmatpush.bf16.msrb.mxu2 %v3254_v13 }
 0x765   : > { %v7380_v44 = vpop.permute.xlu1 %3153  ;;  %v3382_v40 = vpop.f32.mrf.mxu0 }
 0x766   : > { %v3206_v4 = vpop.permute.xlu2 %3205  ;;  %v3152_v24 = vpop.permute.xlu0 %3151 }
 0x767   : > { %v3271_v26 = vsel %vm2198_vm9, %v3152_v24, %v7380_v44  ;;  %v7929_v24 = vld [vmem:[#allocation85_spill] sm:$0xff] }
 0x768   : > { %3450 = vmatpush.bf16.msrb.mxu2 %v3252_v38  ;;  %3417 = vmatpush.bf16.msra.mxu3 %v3271_v26 }
 0x76b   : > { %3418 = vmatmul.bf16.vlgmr.msra.gmra.mxu3 %v7384_v52 }
 0x76c   : > { %3451 = vmatpush.bf16.msrb.mxu2 %v3250_v23  ;;  %3462 = vmatpush.bf16.msrb.mxu3 %v3270_v19 }
 0x76d   : > { %v7398_v50 = vpop.permute.xlu1 %3213 }
 0x76e   : > { %v3212_v7 = vpop.permute.xlu0 %3211  ;;  %v7400_v41 = vpop.permute.xlu2 %3179 }
 0x76f   : > { %v3291_v31 = vsel %vm2198_vm9, %v3212_v7, %v7398_v50  ;;  %v3280_v22 = vsel %vm2198_vm9, %v7274_v47, %v7400_v41 }
 0x770   : > { %3452 = vmatpush.bf16.msrb.mxu2 %v3248_v59  ;;  %3463 = vmatpush.bf16.msrb.mxu3 %v3268_v6 }
 0x771   : > { %3428 = vmatpush.bf16.msrb.mxu0 %v3291_v31 }
 0x774   : > { %3453 = vmatpush.bf16.msrb.mxu2 %v3246_v5  ;;  %3464 = vmatpush.bf16.msrb.mxu3 %v3266_v0 }
 0x775   : > { %v3186_v12 = vpop.permute.xlu1 %3185 }
 0x776   : > { %v3126_v11 = vpop.permute.xlu0 %3125  ;;  %v3114_v20 = vpop.permute.xlu2 %3113 }
 0x777   : > { %v3262_v42 = vsel %vm2198_vm9, %v7291_v56, %v3126_v11  ;;  %v3258_v27 = vsel %vm2198_vm9, %v7349_v33, %v3114_v20  ;;  %v3509_v33 = vld.sshfl [vmem:[#allocation1] sm:$0xff pattern:$0x75316420] }
 0x778   : > { %3454 = vmatpush.bf16.msrb.mxu2 %v3244_v34  ;;  %3465 = vmatpush.bf16.msrb.mxu3 %v3264_v29 }
 0x779   : > { %3512 = vrot.lane.b32.xlu2 %v3509_v33, %s4025_s30 }
 0x77c   : > { %3455 = vmatpush.bf16.msrb.mxu2 %v3242_v43  ;;  %3466 = vmatpush.bf16.msrb.mxu3 %v3262_v42 }
 0x77d   : > { %v3120_v55 = vpop.permute.xlu1 %3119 }
 0x77e   : > { %v3208_v15 = vpop.permute.xlu0 %3207  ;;  %v3260_v9 = vsel %vm2198_vm9, %v7324_v53, %v3120_v55  ;;  %v3108_v51 = vpop.permute.xlu2 %3107 }
 0x77f   : > { %v3289_v56 = vsel %vm2198_vm9, %v3206_v4, %v3208_v15  ;;  %v3256_v53 = vsel %vm2198_vm9, %v7366_v8, %v3108_v51  ;;  %v3282_v8 = vsel %vm2198_vm9, %v7244_v3, %v3186_v12 }
 0x780   : > { %3456 = vmatpush.bf16.msrb.mxu2 %v3240_v46  ;;  %3467 = vmatpush.bf16.msrb.mxu3 %v3260_v9 }
 0x781   : > { %3429 = vmatpush.bf16.msrb.mxu0 %v3289_v56 }
 0x783   : > { %3457 = vmatmul.bf16.vlgmr.msrb.gmra.mxu2 %v7289_v48  ;;  %v3286_v48 = vsel %vm2198_vm9, %v7174_v36, %v7341_v28 }
 0x784   : > { %3468 = vmatpush.bf16.msrb.mxu3 %v3258_v27 }
 0x785   : > { %v3202_v54 = vpop.permute.xlu1 %3201 }
 0x786   : > { %v3200_v63 = vpop.permute.xlu0 %3199  ;;  %v3162_v18 = vpop.permute.xlu2 %3161 }
 0x787   : > { %v3287_v10 = vsel %vm2198_vm9, %v3200_v63, %v3202_v54  ;;  %v3274_v38 = vsel %vm2198_vm9, %v7353_v49, %v3162_v18 }
 0x788   : > { %3469 = vmatpush.bf16.msrb.mxu3 %v3256_v53  ;;  %3430 = vmatpush.bf16.msrb.mxu0 %v3287_v10 }
 0x78b   : > { %3470 = vmatmul.bf16.vlgmr.msrb.gmra.mxu3 %v7370_v30  ;;  %3811 = vmatmul.msk.bf16.vlgmr.msrb.gmra.mxu0 %vm3367_vm0, %v3002_v21 }
 0x78c   : > { %3475 = vmatpush.bf16.msra.mxu0 %v3286_v48 }
 0x78d   : > { %v3222_v62 = vpop.permute.xlu1 %3221 }
 0x78e   : > { %v3294_v36 = vsel %vm2198_vm9, %v7357_v39, %v3222_v62  ;;  %v3174_v28 = vpop.permute.xlu0 %3173  ;;  %v3204_v47 = vpop.permute.xlu2 %3203 }
 0x78f   : > { %3492 = vmatpush.bf16.msra.mxu1 %v3294_v36  ;;  %v3278_v30 = vsel %vm2198_vm9, %v7310_v25, %v3174_v28  ;;  %v3288_v4 = vsel %vm2198_vm9, %v3202_v54, %v3204_v47  ;;  %v3381_v25 = vadd.f32 %v7364_v32, %v7929_v24 }
 0x790   : > { %3476 = vmatpush.bf16.msra.mxu0 %v3284_v2 }
 0x794   : > { %3477 = vmatpush.bf16.msra.mxu0 %v3282_v8 }
 0x795   : > { %v3216_v14 = vpop.permute.xlu1 %3215 }
 0x796   : > { %v3168_v16 = vpop.permute.xlu0 %3167  ;;  %v3292_v39 = vsel %vm2198_vm9, %v7398_v50, %v3216_v14 }
 0x797   : > { %3493 = vmatpush.bf16.msra.mxu1 %v3292_v39  ;;  %v3276_v3 = vsel %vm2198_vm9, %v7336_v37, %v3168_v16 }
 0x798   : > { %3478 = vmatpush.bf16.msra.mxu0 %v3280_v22 }
 0x79c   : > { %3479 = vmatpush.bf16.msra.mxu0 %v3278_v30 }
 0x79d   : > { %v3156_v40 = vpop.permute.xlu1 %3155 }
 0x79e   : > { %v3210_v13 = vpop.permute.xlu0 %3209  ;;  %v3272_v37 = vsel %vm2198_vm9, %v7380_v44, %v3156_v40 }
 0x79f   : > { %v3290_v35 = vsel %vm2198_vm9, %v3208_v15, %v3210_v13  ;;  %vm3528_vm9 = vcmask 1043456  }
 0x7a0   : > { %3480 = vmatpush.bf16.msra.mxu0 %v3276_v3  ;;  %3494 = vmatpush.bf16.msra.mxu1 %v3290_v35 }
 0x7a4   : > { %3481 = vmatpush.bf16.msra.mxu0 %v3274_v38  ;;  %3495 = vmatpush.bf16.msra.mxu1 %v3288_v4 }
 0x7a5   : > { %v3393_v26 = vpop.f32.mrf.mxu1 }
 0x7a6   : > { %v3394_v23 = vadd.f32 %v3393_v26, %v3381_v25 }
 0x7a7   : > { %3812 = vmatmul.msk.bf16.vlgmr.msra.gmra.mxu1 %vm3367_vm0, %v3002_v21 }
 0x7a8   : > { %3482 = vmatpush.bf16.msra.mxu0 %v3272_v37 }
 0x7ab   : > { %3483 = vmatmul.bf16.vlgmr.msra.gmra.mxu0 %v7384_v52 }
 0x7ad   : > { %v3395_v19 = vpop.f32.mrf.mxu1 }
 0x7c3   : > { %v3515_v46 = vpop.permute.xlu0 %3514 }
 0x7c5   : > { %v3445_v49 = vpop.f32.mrf.mxu1 }
 0x7c6   : > { %v3446_v29 = vadd.f32 %v3445_v49, %v7929_v24 }
 0x7cd   : > { %v3447_v59 = vpop.f32.mrf.mxu1 }
 0x7d3   : > { %v3513_v20 = vpop.permute.xlu2 %3512 }
 0x7d4   : > { %v3517_v52 = vpop.permute.xlu1 %3516  ;;  %v3519_v57 = vsel %vm2635_vm4, %v3513_v20, %v3515_v46 }
 0x7d5   : > { %v3520_v15 = vsel %vm2635_vm4, %v3515_v46, %v3517_v52 }
 0x7e6   : > { %v3406_v6 = vpop.f32.mrf.mxu2 }
 0x7e7   : > { %v3407_v11 = vadd.f32 %v3406_v6, %v3394_v23 }
 0x7ee   : > { %v3419_v50 = vpop.f32.mrf.mxu3  ;;  %v3408_v7 = vpop.f32.mrf.mxu2 }
 0x7ef   : > { %v3420_v43 = vadd.f32 %v3419_v50, %v3407_v11 }
 0x7f6   : > { %v3421_v41 = vpop.f32.mrf.mxu3 }
 0x806   : > { %v3458_v31 = vpop.f32.mrf.mxu2 }
 0x807   : > { %v3459_v12 = vadd.f32 %v3458_v31, %v3446_v29 }
 0x808   : > { %v3432_v32 = vpop.f32.mrf.mxu0 }
 0x809   : > { %v3433_v9 = vadd.f32 %v3432_v32, %v3420_v43 }
 0x80b   : > { %v3523_v51 = vadd.f32 %v3519_v57, %v3433_v9 }
 0x80e   : > { %v3460_v5 = vpop.f32.mrf.mxu2  ;;  %v3471_v0 = vpop.f32.mrf.mxu3 }
 0x80f   : > { %v3472_v58 = vadd.f32 %v3471_v0, %v3459_v12 }
 0x810   : > { %v3434_v34 = vpop.f32.mrf.mxu0 }
 0x816   : > { %v3473_v44 = vpop.f32.mrf.mxu3 }
 0x824   : > { %v3497_v42 = vpop.f32.mrf.mxu1 }
 0x828   : > { %v3484_v60 = vpop.f32.mrf.mxu0 }
 0x829   : > { %v3485_v55 = vadd.f32 %v3484_v60, %v3472_v58 }
 0x82b   : > { %v3498_v56 = vadd.f32 %v3497_v42, %v3485_v55 }
 0x82c   : > { %v3499_v45 = vpop.f32.mrf.mxu1 }
 0x82d   : > { %v3524_v27 = vadd.f32 %v3520_v15, %v3498_v56 }
 0x82f   : > { %v3527_v1 = vrot.slane %v3524_v27, 4 }
 0x830   : > { %v3486_v54 = vpop.f32.mrf.mxu0 }
 0x831   : > { %v3529_v63 = vsel %vm3528_vm9, %v3523_v51, %v3527_v1 }
 0x832   : > { %3531 = vst [vmem:[%s4088_s25] sm:$0xff] %v3529_v63 }
 0x833 PF: > { %s13_s16 = sadd.s32 1, %s3998_s16   ;;  %s7930_s12 = smov %s3990_s14 }
 0x834   : > { %p10_p11 = scmp.ge.s32.totalorder %s13_s16, 42   ;;  %s7931_s13 = smov %s3994_s15 }
 0x835   : > { %s7932_s14 = smov %s7935_s17  ;;  %s7933_s15 = smov %s7939_s18 }
 0x836   :  { %12 = sbr.rel (!%p10_p11) target bundleno = 3 (0x3), region = 81 }

</bundles_post_ra>
